<compile_context>
chip_gen: v7x
topology: tpu7x:2x2x1
jax: 0.10.0
libtpu: 0.0.40
codegen_flags: <defaults>
</compile_context>

<pallas_src>
import functools
import math

import jax
import jax.numpy as jnp
from jax.experimental import pallas as pl
from jax.experimental.pallas import tpu as pltpu

NUM_GROUPS = 4
EPS = 1e-5


# ------------------------------------------------------------------ kernel --

def _dwconv_gn_pwconv_kernel(x_ref, wdw_ref, bdw_ref, g_ref, beta_ref,
                             gmat_ref, wpw_ref, wpwT_ref, bpw_ref,
                             o_ref, xp_ref, *, H, W, C, eps):
    """Fused depthwise-3x3 conv + GroupNorm + 1x1 conv for one sample.

    x_ref:    (H, W, C)       unpadded NHWC input tile
    wdw_ref:  (9, C)          depthwise taps, row k = (kh, kw) = (k//3, k%3)
    bdw_ref:  (1, C)          depthwise bias
    g_ref:    (1, C)          GroupNorm gamma
    beta_ref: (1, C)          GroupNorm beta
    gmat_ref: (C, C)          constant group-averaging matrix (1/(H*W*Cg))
    wpw_ref:  (C, Cout)       1x1 conv weight
    wpwT_ref: (Cout, C)       same weight transposed (for row-broadcast scaling)
    bpw_ref:  (1, Cout)       1x1 conv bias
    o_ref:    (Cout, H*W)     output tile (channel-major, lane-dense)
    xp_ref:   (H+2, W+2, C)   VMEM scratch: zero-padded input
    """
    f32 = jnp.float32

    # ---- in-kernel 'same' zero padding (no XLA-side jnp.pad / HBM copy) ----
    # Zero only the border every step (scratch is fully rewritten -> no
    # cross-step / cross-core state dependence), then drop x into the interior.
    xp_ref[pl.ds(0, 1), :, :] = jnp.zeros((1, W + 2, C), f32)
    xp_ref[pl.ds(H + 1, 1), :, :] = jnp.zeros((1, W + 2, C), f32)
    xp_ref[:, pl.ds(0, 1), :] = jnp.zeros((H + 2, 1, C), f32)
    xp_ref[:, pl.ds(W + 1, 1), :] = jnp.zeros((H + 2, 1, C), f32)
    xp_ref[pl.ds(1, H), pl.ds(1, W), :] = x_ref[...]

    wdw = wdw_ref[...]                                     # (9, C)

    # ---- depthwise 3x3 conv, WITHOUT bias (bias folded into stats below) ---
    # Outer loop over dw: the (sublane-shifted) W slab is materialized once
    # per dw; inner dh slices are free leading-dim row offsets.
    acc = None
    for dw in range(3):
        xw = xp_ref[:, pl.ds(dw, W), :]                    # (H+2, W, C)
        for dh in range(3):
            k = 3 * dh + dw
            term = xw[dh:dh + H, :, :] * wdw[k:k + 1, :]
            acc = term if acc is None else acc + term
    # (H,W,C) -> (H*W, C); layout-free when W % 8 == 0 (perf note only).
    yf = acc.reshape(H * W, C)                             # (N, C), f32

    # ---- GroupNorm statistics (f32, single pass over yf) -------------------
    # yf is the raw (near zero-mean) conv output; the depthwise bias enters
    # analytically, which also reduces the E[x^2]-mu^2 cancellation exposure:
    #   sum(y)   = sum(yf) + N*b
    #   sum(y^2) = sum(yf^2) + 2*b*sum(yf) + N*b^2
    n = f32(H * W)
    b = bdw_ref[...]                                       # (1, C)
    s1 = jnp.sum(yf, axis=0, keepdims=True)                # (1, C)
    s2 = jnp.sum(yf * yf, axis=0, keepdims=True)           # (1, C)
    s1y = s1 + n * b
    s2y = s2 + (2.0 * b) * s1 + n * b * b
    # One (2,C)@(C,C) matmul broadcasts the group means back per channel.
    stats = jnp.dot(jnp.concatenate([s1y, s2y], axis=0), gmat_ref[...],
                    preferred_element_type=f32)            # (2, C)
    mu = stats[0:1, :]
    var = stats[1:2, :] - mu * mu
    inv = jax.lax.rsqrt(var + eps)                         # (1, C)

    # ---- fold GN affine + depthwise bias into the 1x1 conv -----------------
    #   yn = yf * scale + shift   (per-channel)  =>
    #   out = yf @ (Wpw * scale_col) + (shift @ Wpw + b_pw)
    scale = inv * g_ref[...]                               # (1, C)
    shift = (b - mu) * scale + beta_ref[...]               # (1, C)
    wpw_s = jnp.transpose(wpwT_ref[...] * scale)           # (C, Cout), row-scaled
    shift_o = jnp.dot(shift, wpw_ref[...],
                      preferred_element_type=f32) + bpw_ref[...]   # (1, Cout)

    # ---- pointwise 1x1 conv: bf16 MXU operands, f32 accumulate -------------
    out = jnp.dot(yf.astype(jnp.bfloat16), wpw_s.astype(jnp.bfloat16),
                  preferred_element_type=f32)              # (N, Cout)
    out = out + shift_o
    # In-kernel transpose (XLU) -> channel-major output; wrapper reshape only.
    o_ref[...] = jnp.transpose(out).astype(o_ref.dtype)    # (Cout, N)


# ----------------------------------------------------------------- wrapper --

def depthwise_conv2d_forward(x_nchw, params):
    """x: (B, C_in, H, W) NCHW float32 -> (B, C_out, H, W)."""
    B, C, H, W = x_nchw.shape
    Cout = params['w_pw'].shape[1]
    assert C % NUM_GROUPS == 0
    cg = C // NUM_GROUPS

    # Only XLA-side prep left: NCHW -> NHWC relayout of the input.
    x = jnp.transpose(x_nchw, (0, 2, 3, 1))                # (B, H, W, C)

    # Constant group-averaging matrix gmat[j,c] = 1/(H*W*cg) if same group.
    grp = jnp.arange(C, dtype=jnp.int32) // cg
    gmat = (grp[:, None] == grp[None, :]).astype(jnp.float32) / float(H * W * cg)

    w_pw = params['w_pw']                                  # (C, Cout)
    kernel = functools.partial(_dwconv_gn_pwconv_kernel, H=H, W=W, C=C, eps=EPS)

    out = pl.pallas_call(
        kernel,
        out_shape=jax.ShapeDtypeStruct((B, Cout, H * W), jnp.float32),
        grid=(B,),
        in_specs=[
            pl.BlockSpec((None, H, W, C), lambda b: (b, 0, 0, 0)),   # x
            pl.BlockSpec((9, C), lambda b: (0, 0)),                  # w_dw
            pl.BlockSpec((1, C), lambda b: (0, 0)),                  # b_dw
            pl.BlockSpec((1, C), lambda b: (0, 0)),                  # gamma
            pl.BlockSpec((1, C), lambda b: (0, 0)),                  # beta
            pl.BlockSpec((C, C), lambda b: (0, 0)),                  # gmat
            pl.BlockSpec((C, Cout), lambda b: (0, 0)),               # w_pw
            pl.BlockSpec((Cout, C), lambda b: (0, 0)),               # w_pw^T
            pl.BlockSpec((1, Cout), lambda b: (0, 0)),               # b_pw
        ],
        out_specs=pl.BlockSpec((None, Cout, H * W), lambda b: (b, 0, 0)),
        scratch_shapes=[pltpu.VMEM((H + 2, W + 2, C), jnp.float32)],
        compiler_params=pltpu.CompilerParams(
            dimension_semantics=("parallel",)),
    )(x,
      params['w_dw'].reshape(9, C),
      params['b_dw'].reshape(1, C),
      params['gamma'].reshape(1, C),
      params['beta'].reshape(1, C),
      gmat,
      w_pw,
      jnp.transpose(w_pw),
      params['b_pw'].reshape(1, Cout))

    # (B, Cout, H*W) -> (B, Cout, H, W): pure reshape, no relayout pass.
    return out.reshape(B, Cout, H, W)


# ------------------------------------------------------- pure-JAX reference --

def depthwise_conv2d_ref(x, p):
    """Same math in plain JAX/XLA (NCHW, conv_general_dilated), full f32."""
    B, C, H, W = x.shape
    # depthwise 3x3 conv
    w = jnp.transpose(p['w_dw'], (2, 0, 1))[:, None, :, :]       # (C, 1, 3, 3)
    y = jax.lax.conv_general_dilated(
        x, w, window_strides=(1, 1), padding=((1, 1), (1, 1)),
        dimension_numbers=('NCHW', 'OIHW', 'NCHW'),
        feature_group_count=C)
    y = y + p['b_dw'][None, :, None, None]
    # GroupNorm(NUM_GROUPS, C)
    G = NUM_GROUPS
    yg = y.reshape(B, G, C // G, H, W)
    mean = jnp.mean(yg, axis=(2, 3, 4), keepdims=True)
    var = jnp.mean((yg - mean) ** 2, axis=(2, 3, 4), keepdims=True)
    yn = ((yg - mean) / jnp.sqrt(var + EPS)).reshape(B, C, H, W)
    yn = yn * p['gamma'][None, :, None, None] + p['beta'][None, :, None, None]
    # 1x1 conv
    out = jnp.einsum('bchw,cd->bdhw', yn, p['w_pw'])
    return out + p['b_pw'][None, :, None, None]


# -------------------------------------------------------------------- main --

if __name__ == "__main__":
    # GroupNorm(4, dim_in) requires dim_in % 4 == 0; lane-friendly sizes.
    B, C_IN, C_OUT, H, W = 2, 64, 128, 16, 16

    key = jax.random.PRNGKey(0)
    k1, k2, k3, k4, k5, k6, kx = jax.random.split(key, 7)

    k_dw = 1.0 / math.sqrt(9.0)          # PyTorch conv default bound, fan_in=9
    k_pw = 1.0 / math.sqrt(float(C_IN))  # fan_in = C_IN for the 1x1 conv
    params = {
        'w_dw': jax.random.uniform(k1, (3, 3, C_IN), jnp.float32, -k_dw, k_dw),
        'b_dw': jax.random.uniform(k2, (C_IN,), jnp.float32, -k_dw, k_dw),
        'gamma': 1.0 + 0.1 * jax.random.normal(k3, (C_IN,), jnp.float32),
        'beta': 0.1 * jax.random.normal(k4, (C_IN,), jnp.float32),
        'w_pw': jax.random.uniform(k5, (C_IN, C_OUT), jnp.float32, -k_pw, k_pw),
        'b_pw': jax.random.uniform(k6, (C_OUT,), jnp.float32, -k_pw, k_pw),
    }
    x = jax.random.normal(kx, (B, C_IN, H, W), jnp.float32)

    fwd = jax.jit(depthwise_conv2d_forward)
    out = jax.block_until_ready(fwd(x, params))
    ref = jax.block_until_ready(depthwise_conv2d_ref(x, params))

    assert out.shape == (B, C_OUT, H, W), out.shape
    # Tolerance accounts for bf16 MXU operands in the 1x1 conv (f32 accumulate);
    # reference is pure f32.
    if not bool(jnp.allclose(out, ref, atol=2e-2, rtol=2e-2)):
        err = float(jnp.max(jnp.abs(out - ref)))
        raise AssertionError(f"Pallas output mismatch vs reference, max|diff|={err}")
    print("KERNEL_OK")
</pallas_src>

<mosaic_0001>
module attributes {stable_mosaic.version = 11 : i64} {
  func.func @_dwconv_gn_pwconv_kernel(%arg0: i32, %arg1: memref<1x16x16x64xf32, #tpu.memory_space<vmem>>, %arg2: memref<9x64xf32, #tpu.memory_space<vmem>>, %arg3: memref<1x64xf32, #tpu.memory_space<vmem>>, %arg4: memref<1x64xf32, #tpu.memory_space<vmem>>, %arg5: memref<1x64xf32, #tpu.memory_space<vmem>>, %arg6: memref<64x64xf32, #tpu.memory_space<vmem>>, %arg7: memref<64x128xf32, #tpu.memory_space<vmem>>, %arg8: memref<128x64xf32, #tpu.memory_space<vmem>>, %arg9: memref<1x128xf32, #tpu.memory_space<vmem>>, %arg10: memref<1x128x256xf32, #tpu.memory_space<vmem>>, %arg11: memref<18x18x64xf32, #tpu.memory_space<vmem>>) attributes {dimension_semantics = [#tpu.dimension_semantics<parallel>], iteration_bounds = array<i64: 2>, scalar_prefetch = 0 : i64, scratch_operands = 1 : i64, tpu.core_type = #tpu.core_type<tc>, window_params = [{transform_indices = @transform_0, window_bounds = array<i64: 1, 16, 16, 64>}, {pipeline_mode = #tpu.pipeline_mode<synchronous>, transform_indices = @transform_1, window_bounds = array<i64: 9, 64>}, {pipeline_mode = #tpu.pipeline_mode<synchronous>, transform_indices = @transform_2, window_bounds = array<i64: 1, 64>}, {pipeline_mode = #tpu.pipeline_mode<synchronous>, transform_indices = @transform_3, window_bounds = array<i64: 1, 64>}, {pipeline_mode = #tpu.pipeline_mode<synchronous>, transform_indices = @transform_4, window_bounds = array<i64: 1, 64>}, {pipeline_mode = #tpu.pipeline_mode<synchronous>, transform_indices = @transform_5, window_bounds = array<i64: 64, 64>}, {pipeline_mode = #tpu.pipeline_mode<synchronous>, transform_indices = @transform_6, window_bounds = array<i64: 64, 128>}, {pipeline_mode = #tpu.pipeline_mode<synchronous>, transform_indices = @transform_7, window_bounds = array<i64: 128, 64>}, {pipeline_mode = #tpu.pipeline_mode<synchronous>, transform_indices = @transform_8, window_bounds = array<i64: 1, 128>}, {transform_indices = @transform_9, window_bounds = array<i64: 1, 128, 256>}]} {
    %cst = arith.constant 0.000000e+00 : f32
    %0 = vector.broadcast %cst : f32 to vector<1x18x64xf32>
    %c0 = arith.constant 0 : index
    %c0_0 = arith.constant 0 : index
    %c0_1 = arith.constant 0 : index
    %1 = vector.load %arg11[%c0, %c0_0, %c0_1] : memref<18x18x64xf32, #tpu.memory_space<vmem>>, vector<1x18x64xf32>
    tpu.vector_store %arg11[%c0, %c0_0, %c0_1], %0 {strides = array<i32>} : memref<18x18x64xf32, #tpu.memory_space<vmem>>, vector<1x18x64xf32>,
    %cst_2 = arith.constant 0.000000e+00 : f32
    %2 = vector.broadcast %cst_2 : f32 to vector<1x18x64xf32>
    %c17 = arith.constant 17 : index
    %c0_3 = arith.constant 0 : index
    %c0_4 = arith.constant 0 : index
    %3 = vector.load %arg11[%c17, %c0_3, %c0_4] : memref<18x18x64xf32, #tpu.memory_space<vmem>>, vector<1x18x64xf32>
    tpu.vector_store %arg11[%c17, %c0_3, %c0_4], %2 {strides = array<i32>} : memref<18x18x64xf32, #tpu.memory_space<vmem>>, vector<1x18x64xf32>,
    %cst_5 = arith.constant 0.000000e+00 : f32
    %4 = vector.broadcast %cst_5 : f32 to vector<18x1x64xf32>
    %c0_6 = arith.constant 0 : index
    %c0_7 = arith.constant 0 : index
    %c0_8 = arith.constant 0 : index
    %5 = vector.load %arg11[%c0_6, %c0_7, %c0_8] : memref<18x18x64xf32, #tpu.memory_space<vmem>>, vector<18x1x64xf32>
    tpu.vector_store %arg11[%c0_6, %c0_7, %c0_8], %4 {strides = array<i32>} : memref<18x18x64xf32, #tpu.memory_space<vmem>>, vector<18x1x64xf32>,
    %cst_9 = arith.constant 0.000000e+00 : f32
    %6 = vector.broadcast %cst_9 : f32 to vector<18x1x64xf32>
    %c0_10 = arith.constant 0 : index
    %c17_11 = arith.constant 17 : index
    %c0_12 = arith.constant 0 : index
    %7 = vector.load %arg11[%c0_10, %c17_11, %c0_12] : memref<18x18x64xf32, #tpu.memory_space<vmem>>, vector<18x1x64xf32>
    tpu.vector_store %arg11[%c0_10, %c17_11, %c0_12], %6 {strides = array<i32>} : memref<18x18x64xf32, #tpu.memory_space<vmem>>, vector<18x1x64xf32>,
    %c0_13 = arith.constant 0 : index
    %c0_14 = arith.constant 0 : index
    %c0_15 = arith.constant 0 : index
    %c0_16 = arith.constant 0 : index
    %8 = vector.load %arg1[%c0_13, %c0_14, %c0_15, %c0_16] : memref<1x16x16x64xf32, #tpu.memory_space<vmem>>, vector<1x16x16x64xf32>
    %9 = vector.shape_cast %8 : vector<1x16x16x64xf32> to vector<16x16x64xf32>
    %c1 = arith.constant 1 : index
    %c1_17 = arith.constant 1 : index
    %c0_18 = arith.constant 0 : index
    %10 = vector.load %arg11[%c1, %c1_17, %c0_18] : memref<18x18x64xf32, #tpu.memory_space<vmem>>, vector<16x16x64xf32>
    tpu.vector_store %arg11[%c1, %c1_17, %c0_18], %9 {strides = array<i32>} : memref<18x18x64xf32, #tpu.memory_space<vmem>>, vector<16x16x64xf32>,
    %c0_19 = arith.constant 0 : index
    %c0_20 = arith.constant 0 : index
    %11 = vector.load %arg2[%c0_19, %c0_20] : memref<9x64xf32, #tpu.memory_space<vmem>>, vector<9x64xf32>
    %c0_21 = arith.constant 0 : index
    %c0_22 = arith.constant 0 : index
    %c0_23 = arith.constant 0 : index
    %12 = vector.load %arg11[%c0_21, %c0_22, %c0_23] : memref<18x18x64xf32, #tpu.memory_space<vmem>>, vector<18x16x64xf32>
    %13 = vector.extract_strided_slice %12 {offsets = [0, 0, 0], sizes = [16, 16, 64], strides = [1, 1, 1]} : vector<18x16x64xf32> to vector<16x16x64xf32>
    %14 = vector.extract_strided_slice %11 {offsets = [0, 0], sizes = [1, 64], strides = [1, 1]} : vector<9x64xf32> to vector<1x64xf32>
    %15 = vector.shape_cast %14 : vector<1x64xf32> to vector<1x1x64xf32>
    %16 = vector.broadcast %15 : vector<1x1x64xf32> to vector<16x16x64xf32>
    %17 = arith.mulf %13, %16 : vector<16x16x64xf32>
    %18 = vector.extract_strided_slice %12 {offsets = [1, 0, 0], sizes = [16, 16, 64], strides = [1, 1, 1]} : vector<18x16x64xf32> to vector<16x16x64xf32>
    %19 = vector.extract_strided_slice %11 {offsets = [3, 0], sizes = [1, 64], strides = [1, 1]} : vector<9x64xf32> to vector<1x64xf32>
    %20 = vector.shape_cast %19 : vector<1x64xf32> to vector<1x1x64xf32>
    %21 = vector.broadcast %20 : vector<1x1x64xf32> to vector<16x16x64xf32>
    %22 = arith.mulf %18, %21 : vector<16x16x64xf32>
    %23 = arith.addf %17, %22 : vector<16x16x64xf32>
    %24 = vector.extract_strided_slice %12 {offsets = [2, 0, 0], sizes = [16, 16, 64], strides = [1, 1, 1]} : vector<18x16x64xf32> to vector<16x16x64xf32>
    %25 = vector.extract_strided_slice %11 {offsets = [6, 0], sizes = [1, 64], strides = [1, 1]} : vector<9x64xf32> to vector<1x64xf32>
    %26 = vector.shape_cast %25 : vector<1x64xf32> to vector<1x1x64xf32>
    %27 = vector.broadcast %26 : vector<1x1x64xf32> to vector<16x16x64xf32>
    %28 = arith.mulf %24, %27 : vector<16x16x64xf32>
    %29 = arith.addf %23, %28 : vector<16x16x64xf32>
    %c0_24 = arith.constant 0 : index
    %c1_25 = arith.constant 1 : index
    %c0_26 = arith.constant 0 : index
    %30 = vector.load %arg11[%c0_24, %c1_25, %c0_26] : memref<18x18x64xf32, #tpu.memory_space<vmem>>, vector<18x16x64xf32>
    %31 = vector.extract_strided_slice %30 {offsets = [0, 0, 0], sizes = [16, 16, 64], strides = [1, 1, 1]} : vector<18x16x64xf32> to vector<16x16x64xf32>
    %32 = vector.extract_strided_slice %11 {offsets = [1, 0], sizes = [1, 64], strides = [1, 1]} : vector<9x64xf32> to vector<1x64xf32>
    %33 = vector.shape_cast %32 : vector<1x64xf32> to vector<1x1x64xf32>
    %34 = vector.broadcast %33 : vector<1x1x64xf32> to vector<16x16x64xf32>
    %35 = arith.mulf %31, %34 : vector<16x16x64xf32>
    %36 = arith.addf %29, %35 : vector<16x16x64xf32>
    %37 = vector.extract_strided_slice %30 {offsets = [1, 0, 0], sizes = [16, 16, 64], strides = [1, 1, 1]} : vector<18x16x64xf32> to vector<16x16x64xf32>
    %38 = vector.extract_strided_slice %11 {offsets = [4, 0], sizes = [1, 64], strides = [1, 1]} : vector<9x64xf32> to vector<1x64xf32>
    %39 = vector.shape_cast %38 : vector<1x64xf32> to vector<1x1x64xf32>
    %40 = vector.broadcast %39 : vector<1x1x64xf32> to vector<16x16x64xf32>
    %41 = arith.mulf %37, %40 : vector<16x16x64xf32>
    %42 = arith.addf %36, %41 : vector<16x16x64xf32>
    %43 = vector.extract_strided_slice %30 {offsets = [2, 0, 0], sizes = [16, 16, 64], strides = [1, 1, 1]} : vector<18x16x64xf32> to vector<16x16x64xf32>
    %44 = vector.extract_strided_slice %11 {offsets = [7, 0], sizes = [1, 64], strides = [1, 1]} : vector<9x64xf32> to vector<1x64xf32>
    %45 = vector.shape_cast %44 : vector<1x64xf32> to vector<1x1x64xf32>
    %46 = vector.broadcast %45 : vector<1x1x64xf32> to vector<16x16x64xf32>
    %47 = arith.mulf %43, %46 : vector<16x16x64xf32>
    %48 = arith.addf %42, %47 : vector<16x16x64xf32>
    %c0_27 = arith.constant 0 : index
    %c2 = arith.constant 2 : index
    %c0_28 = arith.constant 0 : index
    %49 = vector.load %arg11[%c0_27, %c2, %c0_28] : memref<18x18x64xf32, #tpu.memory_space<vmem>>, vector<18x16x64xf32>
    %50 = vector.extract_strided_slice %49 {offsets = [0, 0, 0], sizes = [16, 16, 64], strides = [1, 1, 1]} : vector<18x16x64xf32> to vector<16x16x64xf32>
    %51 = vector.extract_strided_slice %11 {offsets = [2, 0], sizes = [1, 64], strides = [1, 1]} : vector<9x64xf32> to vector<1x64xf32>
    %52 = vector.shape_cast %51 : vector<1x64xf32> to vector<1x1x64xf32>
    %53 = vector.broadcast %52 : vector<1x1x64xf32> to vector<16x16x64xf32>
    %54 = arith.mulf %50, %53 : vector<16x16x64xf32>
    %55 = arith.addf %48, %54 : vector<16x16x64xf32>
    %56 = vector.extract_strided_slice %49 {offsets = [1, 0, 0], sizes = [16, 16, 64], strides = [1, 1, 1]} : vector<18x16x64xf32> to vector<16x16x64xf32>
    %57 = vector.extract_strided_slice %11 {offsets = [5, 0], sizes = [1, 64], strides = [1, 1]} : vector<9x64xf32> to vector<1x64xf32>
    %58 = vector.shape_cast %57 : vector<1x64xf32> to vector<1x1x64xf32>
    %59 = vector.broadcast %58 : vector<1x1x64xf32> to vector<16x16x64xf32>
    %60 = arith.mulf %56, %59 : vector<16x16x64xf32>
    %61 = arith.addf %55, %60 : vector<16x16x64xf32>
    %62 = vector.extract_strided_slice %49 {offsets = [2, 0, 0], sizes = [16, 16, 64], strides = [1, 1, 1]} : vector<18x16x64xf32> to vector<16x16x64xf32>
    %63 = vector.extract_strided_slice %11 {offsets = [8, 0], sizes = [1, 64], strides = [1, 1]} : vector<9x64xf32> to vector<1x64xf32>
    %64 = vector.shape_cast %63 : vector<1x64xf32> to vector<1x1x64xf32>
    %65 = vector.broadcast %64 : vector<1x1x64xf32> to vector<16x16x64xf32>
    %66 = arith.mulf %62, %65 : vector<16x16x64xf32>
    %67 = arith.addf %61, %66 : vector<16x16x64xf32>
    %68 = vector.shape_cast %67 : vector<16x16x64xf32> to vector<256x64xf32>
    %c0_29 = arith.constant 0 : index
    %c0_30 = arith.constant 0 : index
    %69 = vector.load %arg3[%c0_29, %c0_30] : memref<1x64xf32, #tpu.memory_space<vmem>>, vector<1x64xf32>
    %cst_31 = arith.constant dense<0.000000e+00> : vector<64xf32>
    %70 = vector.multi_reduction <add>, %68, %cst_31 [0] : vector<256x64xf32> to vector<64xf32>
    %71 = vector.shape_cast %70 : vector<64xf32> to vector<1x64xf32>
    %72 = arith.mulf %68, %68 : vector<256x64xf32>
    %cst_32 = arith.constant dense<0.000000e+00> : vector<64xf32>
    %73 = vector.multi_reduction <add>, %72, %cst_32 [0] : vector<256x64xf32> to vector<64xf32>
    %74 = vector.shape_cast %73 : vector<64xf32> to vector<1x64xf32>
    %cst_33 = arith.constant 2.560000e+02 : f32
    %75 = vector.broadcast %cst_33 : f32 to vector<1x64xf32>
    %76 = arith.mulf %75, %69 : vector<1x64xf32>
    %77 = arith.addf %71, %76 : vector<1x64xf32>
    %cst_34 = arith.constant 2.000000e+00 : f32
    %78 = vector.broadcast %cst_34 : f32 to vector<1x64xf32>
    %79 = arith.mulf %78, %69 : vector<1x64xf32>
    %80 = arith.mulf %79, %71 : vector<1x64xf32>
    %81 = arith.addf %74, %80 : vector<1x64xf32>
    %cst_35 = arith.constant 2.560000e+02 : f32
    %82 = vector.broadcast %cst_35 : f32 to vector<1x64xf32>
    %83 = arith.mulf %82, %69 : vector<1x64xf32>
    %84 = arith.mulf %83, %69 : vector<1x64xf32>
    %85 = arith.addf %81, %84 : vector<1x64xf32>
    %86 = tpu.concatenate %77, %85 in 0 : vector<1x64xf32>, vector<1x64xf32> -> vector<2x64xf32>
    %c0_36 = arith.constant 0 : index
    %c0_37 = arith.constant 0 : index
    %87 = vector.load %arg6[%c0_36, %c0_37] : memref<64x64xf32, #tpu.memory_space<vmem>>, vector<64x64xf32>
    %cst_38 = arith.constant dense<0.000000e+00> : vector<2x64xf32>
    %88 = tpu.matmul %86, %87, %cst_38 {dimension_numbers = #tpu.dot_dimension_numbers<[1], [0], [0], [1], [0, 0, 1, 1], [], []>} : vector<2x64xf32>, vector<64x64xf32>, vector<2x64xf32> -> vector<2x64xf32>
    %89 = vector.extract_strided_slice %88 {offsets = [0, 0], sizes = [1, 64], strides = [1, 1]} : vector<2x64xf32> to vector<1x64xf32>
    %90 = vector.extract_strided_slice %88 {offsets = [1, 0], sizes = [1, 64], strides = [1, 1]} : vector<2x64xf32> to vector<1x64xf32>
    %91 = arith.mulf %89, %89 : vector<1x64xf32>
    %92 = arith.subf %90, %91 : vector<1x64xf32>
    %cst_39 = arith.constant 9.99999974E-6 : f32
    %93 = vector.broadcast %cst_39 : f32 to vector<1x64xf32>
    %94 = arith.addf %92, %93 : vector<1x64xf32>
    %95 = math.rsqrt %94 : vector<1x64xf32>
    %c0_40 = arith.constant 0 : index
    %c0_41 = arith.constant 0 : index
    %96 = vector.load %arg4[%c0_40, %c0_41] : memref<1x64xf32, #tpu.memory_space<vmem>>, vector<1x64xf32>
    %97 = arith.mulf %95, %96 : vector<1x64xf32>
    %98 = arith.subf %69, %89 : vector<1x64xf32>
    %99 = arith.mulf %98, %97 : vector<1x64xf32>
    %c0_42 = arith.constant 0 : index
    %c0_43 = arith.constant 0 : index
    %100 = vector.load %arg5[%c0_42, %c0_43] : memref<1x64xf32, #tpu.memory_space<vmem>>, vector<1x64xf32>
    %101 = arith.addf %99, %100 : vector<1x64xf32>
    %c0_44 = arith.constant 0 : index
    %c0_45 = arith.constant 0 : index
    %102 = vector.load %arg8[%c0_44, %c0_45] : memref<128x64xf32, #tpu.memory_space<vmem>>, vector<128x64xf32>
    %103 = vector.broadcast %97 : vector<1x64xf32> to vector<128x64xf32>
    %104 = arith.mulf %102, %103 : vector<128x64xf32>
    %105 = tpu.transpose %104, [1, 0] : vector<128x64xf32> -> vector<64x128xf32>
    %c0_46 = arith.constant 0 : index
    %c0_47 = arith.constant 0 : index
    %106 = vector.load %arg7[%c0_46, %c0_47] : memref<64x128xf32, #tpu.memory_space<vmem>>, vector<64x128xf32>
    %cst_48 = arith.constant dense<0.000000e+00> : vector<1x128xf32>
    %107 = tpu.matmul %101, %106, %cst_48 {dimension_numbers = #tpu.dot_dimension_numbers<[1], [0], [0], [1], [0, 0, 1, 1], [], []>} : vector<1x64xf32>, vector<64x128xf32>, vector<1x128xf32> -> vector<1x128xf32>
    %c0_49 = arith.constant 0 : index
    %c0_50 = arith.constant 0 : index
    %108 = vector.load %arg9[%c0_49, %c0_50] : memref<1x128xf32, #tpu.memory_space<vmem>>, vector<1x128xf32>
    %109 = arith.addf %107, %108 : vector<1x128xf32>
    %110 = arith.truncf %68 : vector<256x64xf32> to vector<256x64xbf16>
    %111 = arith.truncf %105 : vector<64x128xf32> to vector<64x128xbf16>
    %cst_51 = arith.constant dense<0.000000e+00> : vector<256x128xf32>
    %112 = tpu.matmul %110, %111, %cst_51 {dimension_numbers = #tpu.dot_dimension_numbers<[1], [0], [0], [1], [0, 0, 1, 1], [], []>} : vector<256x64xbf16>, vector<64x128xbf16>, vector<256x128xf32> -> vector<256x128xf32>
    %113 = vector.broadcast %109 : vector<1x128xf32> to vector<256x128xf32>
    %114 = arith.addf %112, %113 : vector<256x128xf32>
    %115 = tpu.transpose %114, [1, 0] : vector<256x128xf32> -> vector<128x256xf32>
    %c0_52 = arith.constant 0 : index
    %c0_53 = arith.constant 0 : index
    %c0_54 = arith.constant 0 : index
    %116 = vector.load %arg10[%c0_52, %c0_53, %c0_54] : memref<1x128x256xf32, #tpu.memory_space<vmem>>, vector<1x128x256xf32>
    %117 = vector.shape_cast %116 : vector<1x128x256xf32> to vector<128x256xf32>
    %118 = vector.shape_cast %115 : vector<128x256xf32> to vector<1x128x256xf32>
    tpu.vector_store %arg10[%c0_52, %c0_53, %c0_54], %118 {strides = array<i32>} : memref<1x128x256xf32, #tpu.memory_space<vmem>>, vector<1x128x256xf32>,
    return
  }
  func.func @transform_0(%arg0: i32) -> (i32, i32, i32, i32) {
    %c0_i32 = arith.constant 0 : i32
    %c0_i32_0 = arith.constant 0 : i32
    %c0_i32_1 = arith.constant 0 : i32
    %c0_i32_2 = arith.constant 0 : i32
    return %arg0, %c0_i32, %c0_i32_0, %c0_i32_1 : i32, i32, i32, i32
  }
  func.func @transform_1(%arg0: i32) -> (i32, i32) {
    %c0_i32 = arith.constant 0 : i32
    %c0_i32_0 = arith.constant 0 : i32
    %c0_i32_1 = arith.constant 0 : i32
    return %c0_i32, %c0_i32_0 : i32, i32
  }
  func.func @transform_2(%arg0: i32) -> (i32, i32) {
    %c0_i32 = arith.constant 0 : i32
    %c0_i32_0 = arith.constant 0 : i32
    %c0_i32_1 = arith.constant 0 : i32
    return %c0_i32, %c0_i32_0 : i32, i32
  }
  func.func @transform_3(%arg0: i32) -> (i32, i32) {
    %c0_i32 = arith.constant 0 : i32
    %c0_i32_0 = arith.constant 0 : i32
    %c0_i32_1 = arith.constant 0 : i32
    return %c0_i32, %c0_i32_0 : i32, i32
  }
  func.func @transform_4(%arg0: i32) -> (i32, i32) {
    %c0_i32 = arith.constant 0 : i32
    %c0_i32_0 = arith.constant 0 : i32
    %c0_i32_1 = arith.constant 0 : i32
    return %c0_i32, %c0_i32_0 : i32, i32
  }
  func.func @transform_5(%arg0: i32) -> (i32, i32) {
    %c0_i32 = arith.constant 0 : i32
    %c0_i32_0 = arith.constant 0 : i32
    %c0_i32_1 = arith.constant 0 : i32
    return %c0_i32, %c0_i32_0 : i32, i32
  }
  func.func @transform_6(%arg0: i32) -> (i32, i32) {
    %c0_i32 = arith.constant 0 : i32
    %c0_i32_0 = arith.constant 0 : i32
    %c0_i32_1 = arith.constant 0 : i32
    return %c0_i32, %c0_i32_0 : i32, i32
  }
  func.func @transform_7(%arg0: i32) -> (i32, i32) {
    %c0_i32 = arith.constant 0 : i32
    %c0_i32_0 = arith.constant 0 : i32
    %c0_i32_1 = arith.constant 0 : i32
    return %c0_i32, %c0_i32_0 : i32, i32
  }
  func.func @transform_8(%arg0: i32) -> (i32, i32) {
    %c0_i32 = arith.constant 0 : i32
    %c0_i32_0 = arith.constant 0 : i32
    %c0_i32_1 = arith.constant 0 : i32
    return %c0_i32, %c0_i32_0 : i32, i32
  }
  func.func @transform_9(%arg0: i32) -> (i32, i32, i32) {
    %c0_i32 = arith.constant 0 : i32
    %c0_i32_0 = arith.constant 0 : i32
    %c0_i32_1 = arith.constant 0 : i32
    return %arg0, %c0_i32, %c0_i32_0 : i32, i32, i32
  }
}

</mosaic_0001>

<bundles_post_ra>
// kernel: depthwise_conv2d_forward.1
= control target key start
LH: loop header
LB: loop body
LE: loop exit
PB: predicated region body
PF: predicated region fallthrough
CT: control target
= control target key end

     0   :  { %14 = vsyncpa [#allocation4], 0  ;;  %s4502_s0 = inlined_call_operand.hbm [shape: f32[2,16,16,64], index: 0, kind: input, shape index: {}]   ;;  %s4503_s1 = inlined_call_operand.vmem [shape: f32[9,64], index: 1, kind: input, shape index: {}]   ;;  %s4504_s2 = inlined_call_operand.vmem [shape: f32[1,64], index: 2, kind: input, shape index: {}]   ;;  %s4505_s3 = inlined_call_operand.vmem [shape: f32[1,64], index: 3, kind: input, shape index: {}]   ;;  %s4506_s4 = inlined_call_operand.vmem [shape: f32[1,64], index: 4, kind: input, shape index: {}]   ;;  %s4507_s5 = inlined_call_operand.vmem [shape: f32[64,64], index: 5, kind: input, shape index: {}]   ;;  %s4508_s6 = inlined_call_operand.vmem [shape: f32[64,128], index: 6, kind: input, shape index: {}]   ;;  %s4509_s7 = inlined_call_operand.vmem [shape: f32[128,64], index: 7, kind: input, shape index: {}]   ;;  %s4510_s8 = inlined_call_operand.vmem [shape: f32[1,128], index: 8, kind: input, shape index: {}]   ;;  %s4511_s9 = inlined_call_operand.vmem [shape: f32[2,128,256], index: 9, kind: output, shape index: {}]  }
   0x1   :  { %16 = vsyncpa [#allocation4 + $0x1], 0  ;;  %s2353_s30 = smov 0   ;;  %s2355_s10 = smov 0  }
   0x2   :  { %s2357_s11 = smov 0   ;;  %s2359_s12 = smov 0  }
   0x3 LB: > { %s2372_s13 = sadd.s32 4294967295, %s2294_s12   ;;  %s2375_s14 = sadd.s32 1, %s2294_s12   ;;  %s2294_s12 = sphi %s2359_s12, %s5040_s12   ;;  %s2290_s11 = sphi %s2357_s11, %s5039_s11   ;;  %s2286_s10 = sphi %s2355_s10, %s5038_s10   ;;  %s2282_s30 = sphi %s2353_s30, %s5037_s30  }
   0x4   : > { %s26_s15 = ssub.s32 %s2294_s12, %s2375_s14  ;;  %s29_s16 = sadd.s32 1, %s2290_s11 }
   0x5   : > { %p27_p0 = scmp.eq.s32.totalorder %s26_s15, 0  ;;  %p36_p1 = scmp.ne.s32.totalorder %s2290_s11, %s2286_s10 }
   0x6   : > { %p37_p2 = scmp.eq.s32.totalorder %s2294_s12, 0  ;;  %p42_p3 = scmp.ne.s32.totalorder %s2286_s10, %s2282_s30 }
   0x7   : > { %s2385_s17 = scalar_select %p27_p0, %s2290_s11, %s29_s16  }
   0x8   : > { %p38_p4 = por %p37_p2, %p36_p1  ;;  %p43_p5 = scmp.eq.s32.totalorder %s2372_s13, 0 }
   0x9   : > { %p2189_p6 = scmp.lt.s32.totalorder %s2294_s12, 2  ;;  %s284_s19 = sand.u32 1, %s2290_s11  }
   0xa   : > { %p2389_p7 = por %p43_p5, %p42_p3  ;;  %s2004_s20 = sshll.u32 %s284_s19, 8 }
   0xb   : > { %s2033_s21 = sshll.u32 %s2294_s12, 12  ;;  %s288_s25 = scalar_lea.vmem [#allocation3], %s2004_s20 }
   0xc   : > { %s2398_s24 = scalar_lea.hbm %s4502_s0, %s2033_s21  ;;  %s295_s26 = sshll.u32 %s288_s25, 4  ;;  %s2400_s26 = int_to_ptr.vmem [resolvable:$true] %s295_s26 }
   0xd   : > { %p2402_p8 = pnand %p2189_p6, %p38_p4  ;;  %s2407_s28 = scalar_lea.sflag [#allocation4], %s284_s19 }
   0xe   : > { %s2230_s29 = scalar_lea.hbm %s2398_s24, 4096  ;;  %s2235_s16 = scalar_lea.hbm %s4502_s0, 8192 }
   0xf   : > { %p2231_p10 = scmp.ne.s32.totalorder %s2398_s24, %s2230_s29  ;;  %p2232_p11 = pneg %p2402_p8 }
  0x10   : > { %p2236_p0 = scmp.lt.u32.totalorder %s2398_s24, %s4502_s0  ;;  %p2237_p1 = scmp.lt.u32.totalorder %s2235_s16, %s2230_s29 }
  0x11   : > { %p2233_p12 = pnand %p2232_p11, %p2231_p10  ;;  %p2239_p3 = scmp.lt.u32.totalorder %s2230_s29, %s2398_s24 }
  0x12   : > { %p2238_p2 = por %p2237_p1, %p2236_p0 }
  0x13   : > { %p2234_p13 = pneg %p2233_p12 }
  0x14   : > { %p2240_p4 = por %p2239_p3, %p2238_p2 }
  0x16   : > { %p2241_p5 = pnand %p2240_p4, %p2234_p13 }
  0x18   : > { %2244 = shalt.err (!%p2241_p5)
}
  0x19   : > { %s2245_s19 = scalar_lea.vmem %s2400_s26, 4096  ;;  %s2296_s22 = smov [#allocation3]  }
  0x1a   : > { %p2246_p6 = scmp.ne.s32.totalorder %s2400_s26, %s2245_s19  ;;  %s2250_s23 = sshll.u32 %s2296_s22, 4  ;;  %s2251_s23 = int_to_ptr.vmem [resolvable:$false] %s2250_s23 }
  0x1b   : > { %s2252_s25 = scalar_lea.vmem %s2251_s23, 8192  ;;  %p2253_p9 = scmp.lt.s32.totalorder %s2400_s26, %s2251_s23 }
  0x1c   : > { %p2248_p10 = pnand %p2246_p6, %p2232_p11  ;;  %p2254_p0 = scmp.lt.s32.totalorder %s2252_s25, %s2245_s19 }
  0x1e   : > { %p2249_p12 = pneg %p2248_p10  ;;  %p2255_p1 = por %p2254_p0, %p2253_p9 }
  0x20   : > { %p2256_p2 = pnand %p2255_p1, %p2249_p12 }
  0x22   : > { %2259 = shalt.err (!%p2256_p2)
}
  0x23   : > { %s2297_s29 = smov 128   ;;  %s2298_s30 = smov 8  }
  0x24   : > { %2188 = dma.hbm_to_vmem [thread:$0]  (!%p2402_p8), %s2398_s24, 4096, %s2400_s26, %s2407_s28, %s2297_s29, %s2297_s29, %s2298_s30  }
  0x25   : > { %p303_p11 = scmp.lt.s32.totalorder %s2294_s12, 3  ;;  %p4667_p13 = scmp.ge.s32.totalorder %s2294_s12, 1 }
  0x27   : > { %p304_p3 = pnand %p4667_p13, %p303_p11 }
  0x29   : > { %307 = sbr.rel (%p304_p3) target bundleno = 1134 (0x46e), region = 56 }
  0x30   : > { %s309_s15 = sand.u32 1, %s2286_s10  }
  0x31   : > { %s2008_s16 = sshll.u32 %s309_s15, 8  ;;  %s310_s20 = scalar_lea.sflag [#allocation4], %s309_s15 }
  0x32   : > { %s2439_s21 = scalar_lea.vmem [#allocation3], %s2008_s16 }
  0x33   : > { %2277 = dma.done.wait (%p2389_p7), %s310_s20, 4096  }
  0x34   : > { %2279 = vsyncadd (%p2389_p7), %s310_s20, 4294963200  ;;  %vm354_vm0 = vcmask 523264   ;;  %v4514_v0 = vmov 0.0|0.0   ;;  %vm2300_vm1 = vmmov 0   ;;  %v2301_v1 = vmov 0.0   ;;  %v1338_v2 = vld [vmem:[%s4507_s5] sm:$0xff] }
  0x35   : > { %2151 = vmatprep.subr.bf16.mxu0 %v4514_v0  ;;  %2089 = vmatprep.mubr.msk.f32.mxu0 %vm2300_vm1, %v2301_v1  ;;  %355 = vst.msk [vmem:[#allocation2] sm:$0xff] %vm354_vm0, %v2301_v1  ;;  %356 = vst.msk [vmem:[#allocation2 + $0x8] sm:$0xff] %vm354_vm0, %v2301_v1  ;;  %vm357_vm2 = vcmask 517120   ;;  %vm363_vm3 = vcmask 516096   ;;  %v1339_v3 = vld [vmem:[%s4507_s5 + $0x8] sm:$0xff]  ;;  %v1340_v4 = vld [vmem:[%s4507_s5 + $0x10] sm:$0xff]  ;;  %v503_v46 = vlaneseq }
  0x36   : > { %360 = vst.msk [vmem:[#allocation2 + $0x198] sm:$0xff] %vm354_vm0, %v2301_v1  ;;  %361 = vst.msk [vmem:[#allocation2 + $0x1a0] sm:$0xff] %vm354_vm0, %v2301_v1  ;;  %2163 = vmatprep.subr.bf16.mxu1 %v4514_v0  ;;  %2108 = vmatprep.mubr.msk.f32.mxu1 %vm2300_vm1, %v2301_v1  ;;  %v2152_v5 = vpack.c.bf16 %v1339_v3, %v1338_v2  ;;  %v1341_v6 = vld [vmem:[%s4507_s5 + $0x18] sm:$0xff]  ;;  %v1342_v7 = vld [vmem:[%s4507_s5 + $0x20] sm:$0xff]  ;;  %vm1336_vm4 = vcmask 1040384   ;;  %p348_p7 = scmp.lt.s32.totalorder %s2372_s13, 1 }
  0x37   : > { %358 = vst.msk [vmem:[#allocation2 + $0x10] sm:$0x3] %vm357_vm2, %v2301_v1  ;;  %362 = vst.msk [vmem:[#allocation2 + $0x1a8] sm:$0x3] %vm357_vm2, %v2301_v1  ;;  %v1343_v8 = vld [vmem:[%s4507_s5 + $0x28] sm:$0xff]  ;;  %v400_v9 = vld [vmem:[%s2439_s21] sm:$0xff]  ;;  %v2155_v10 = vpack.c.bf16 %v1341_v6, %v1340_v4 }
  0x38   : > { %364 = vst.msk [vmem:[#allocation2] sm:$0x1] %vm363_vm3, %v2301_v1  ;;  %365 = vst.msk [vmem:[#allocation2 + $0x18] sm:$0x1] %vm363_vm3, %v2301_v1  ;;  %2153 = vmatpush3.bf16.msra.mxu0 %v2152_v5  ;;  %v401_v11 = vld [vmem:[%s2439_s21 + $0x8] sm:$0xff]  ;;  %v402_v12 = vld [vmem:[%s2439_s21 + $0x10] sm:$0xff]  ;;  %v2158_v25 = vpack.c.bf16 %v1343_v8, %v1342_v7 }
  0x39   : > { %366 = vst.msk [vmem:[#allocation2 + $0x30] sm:$0x1] %vm363_vm3, %v2301_v1  ;;  %367 = vst.msk [vmem:[#allocation2 + $0x48] sm:$0x1] %vm363_vm3, %v2301_v1  ;;  %v403_v13 = vld [vmem:[%s2439_s21 + $0x18] sm:$0xff]  ;;  %2154 = vmatprep.subr.bf16.mxu0 %v4514_v0  ;;  %v404_v14 = vld [vmem:[%s2439_s21 + $0x20] sm:$0xff] }
  0x3a   : > { %368 = vst.msk [vmem:[#allocation2 + $0x60] sm:$0x1] %vm363_vm3, %v2301_v1  ;;  %369 = vst.msk [vmem:[#allocation2 + $0x78] sm:$0x1] %vm363_vm3, %v2301_v1  ;;  %v405_v15 = vld [vmem:[%s2439_s21 + $0x28] sm:$0xff]  ;;  %v406_v16 = vld [vmem:[%s2439_s21 + $0x30] sm:$0xff] }
  0x3b   : > { %370 = vst.msk [vmem:[#allocation2 + $0x90] sm:$0x1] %vm363_vm3, %v2301_v1  ;;  %371 = vst.msk [vmem:[#allocation2 + $0xa8] sm:$0x1] %vm363_vm3, %v2301_v1  ;;  %v407_v17 = vld [vmem:[%s2439_s21 + $0x38] sm:$0xff]  ;;  %v408_v18 = vld [vmem:[%s2439_s21 + $0x40] sm:$0xff] }
  0x3c   : > { %372 = vst.msk [vmem:[#allocation2 + $0xc0] sm:$0x1] %vm363_vm3, %v2301_v1  ;;  %373 = vst.msk [vmem:[#allocation2 + $0xd8] sm:$0x1] %vm363_vm3, %v2301_v1  ;;  %v409_v19 = vld [vmem:[%s2439_s21 + $0x48] sm:$0xff]  ;;  %v1344_v20 = vld [vmem:[%s4507_s5 + $0x30] sm:$0xff]  ;;  %2156 = vmatpush3.bf16.msra.mxu0 %v2155_v10 }
  0x3d   : > { %374 = vst.msk [vmem:[#allocation2 + $0xf0] sm:$0x1] %vm363_vm3, %v2301_v1  ;;  %375 = vst.msk [vmem:[#allocation2 + $0x108] sm:$0x1] %vm363_vm3, %v2301_v1  ;;  %v1345_v21 = vld [vmem:[%s4507_s5 + $0x38] sm:$0xff]  ;;  %v410_v22 = vld [vmem:[%s2439_s21 + $0x50] sm:$0xff]  ;;  %2157 = vmatprep.subr.bf16.mxu0 %v4514_v0 }
  0x3e   : > { %376 = vst.msk [vmem:[#allocation2 + $0x120] sm:$0x1] %vm363_vm3, %v2301_v1  ;;  %377 = vst.msk [vmem:[#allocation2 + $0x138] sm:$0x1] %vm363_vm3, %v2301_v1  ;;  %v411_v23 = vld [vmem:[%s2439_s21 + $0x58] sm:$0xff]  ;;  %v412_v24 = vld [vmem:[%s2439_s21 + $0x60] sm:$0xff]  ;;  %v2161_v38 = vpack.c.bf16 %v1345_v21, %v1344_v20 }
  0x3f   : > { %378 = vst.msk [vmem:[#allocation2 + $0x150] sm:$0x1] %vm363_vm3, %v2301_v1  ;;  %379 = vst.msk [vmem:[#allocation2 + $0x168] sm:$0x1] %vm363_vm3, %v2301_v1  ;;  %v413_v26 = vld [vmem:[%s2439_s21 + $0x68] sm:$0xff]  ;;  %v414_v27 = vld [vmem:[%s2439_s21 + $0x70] sm:$0xff] }
  0x40   : > { %380 = vst.msk [vmem:[#allocation2 + $0x180] sm:$0x1] %vm363_vm3, %v2301_v1  ;;  %381 = vst.msk [vmem:[#allocation2 + $0x198] sm:$0x1] %vm363_vm3, %v2301_v1  ;;  %v415_v28 = vld [vmem:[%s2439_s21 + $0x78] sm:$0xff]  ;;  %v416_v29 = vld [vmem:[%s2439_s21 + $0x80] sm:$0xff]  ;;  %2159 = vmatpush3.bf16.msra.mxu0 %v2158_v25 }
  0x41   : > { %383 = vst.msk [vmem:[#allocation2 + $0x29] sm:$0x1] %vm363_vm3, %v2301_v1  ;;  %384 = vst.msk [vmem:[#allocation2 + $0x41] sm:$0x1] %vm363_vm3, %v2301_v1  ;;  %v417_v30 = vld [vmem:[%s2439_s21 + $0x88] sm:$0xff]  ;;  %v418_v31 = vld [vmem:[%s2439_s21 + $0x90] sm:$0xff]  ;;  %2160 = vmatprep.subr.bf16.mxu0 %v4514_v0 }
  0x42   : > { %385 = vst.msk [vmem:[#allocation2 + $0x59] sm:$0x1] %vm363_vm3, %v2301_v1  ;;  %386 = vst.msk [vmem:[#allocation2 + $0x71] sm:$0x1] %vm363_vm3, %v2301_v1  ;;  %v419_v32 = vld [vmem:[%s2439_s21 + $0x98] sm:$0xff]  ;;  %v420_v33 = vld [vmem:[%s2439_s21 + $0xa0] sm:$0xff] }
  0x43   : > { %387 = vst.msk [vmem:[#allocation2 + $0x89] sm:$0x1] %vm363_vm3, %v2301_v1  ;;  %388 = vst.msk [vmem:[#allocation2 + $0xa1] sm:$0x1] %vm363_vm3, %v2301_v1  ;;  %v421_v34 = vld [vmem:[%s2439_s21 + $0xa8] sm:$0xff]  ;;  %v422_v35 = vld [vmem:[%s2439_s21 + $0xb0] sm:$0xff] }
  0x44   : > { %389 = vst.msk [vmem:[#allocation2 + $0xb9] sm:$0x1] %vm363_vm3, %v2301_v1  ;;  %390 = vst.msk [vmem:[#allocation2 + $0xd1] sm:$0x1] %vm363_vm3, %v2301_v1  ;;  %v423_v36 = vld [vmem:[%s2439_s21 + $0xb8] sm:$0xff]  ;;  %v424_v37 = vld [vmem:[%s2439_s21 + $0xc0] sm:$0xff]  ;;  %2162 = vmatpush3.bf16.msra.mxu0 %v2161_v38 }
  0x45   : > { %391 = vst.msk [vmem:[#allocation2 + $0xe9] sm:$0x1] %vm363_vm3, %v2301_v1  ;;  %392 = vst.msk [vmem:[#allocation2 + $0x101] sm:$0x1] %vm363_vm3, %v2301_v1  ;;  %v425_v39 = vld [vmem:[%s2439_s21 + $0xc8] sm:$0xff]  ;;  %v426_v40 = vld [vmem:[%s2439_s21 + $0xd0] sm:$0xff] }
  0x46   : > { %393 = vst.msk [vmem:[#allocation2 + $0x119] sm:$0x1] %vm363_vm3, %v2301_v1  ;;  %394 = vst.msk [vmem:[#allocation2 + $0x131] sm:$0x1] %vm363_vm3, %v2301_v1  ;;  %v427_v41 = vld [vmem:[%s2439_s21 + $0xd8] sm:$0xff]  ;;  %v428_v42 = vld [vmem:[%s2439_s21 + $0xe0] sm:$0xff] }
  0x47   : > { %395 = vst.msk [vmem:[#allocation2 + $0x149] sm:$0x1] %vm363_vm3, %v2301_v1  ;;  %396 = vst.msk [vmem:[#allocation2 + $0x161] sm:$0x1] %vm363_vm3, %v2301_v1  ;;  %v429_v43 = vld [vmem:[%s2439_s21 + $0xe8] sm:$0xff]  ;;  %v430_v44 = vld [vmem:[%s2439_s21 + $0xf0] sm:$0xff] }
  0x48   : > { %397 = vst.msk [vmem:[#allocation2 + $0x179] sm:$0x1] %vm363_vm3, %v2301_v1  ;;  %398 = vst.msk [vmem:[#allocation2 + $0x191] sm:$0x1] %vm363_vm3, %v2301_v1  ;;  %v431_v45 = vld [vmem:[%s2439_s21 + $0xf8] sm:$0xff]  ;;  %v2580_v47 = vshrl.u32 %v503_v46, 7 }
  0x49   : > { %382 = vst.msk [vmem:[#allocation2 + $0x11] sm:$0x1] %vm363_vm3, %v2301_v1  ;;  %399 = vst.msk [vmem:[#allocation2 + $0x1a9] sm:$0x1] %vm363_vm3, %v2301_v1  ;;  %v465_v49 = vld [vmem:[%s4503_s1] sm:$0xff]  ;;  %v468_v59 = vld [vmem:[#allocation2 + $0x8] sm:$0xff] }
  0x4a   : > { %433 = vst.msk [vmem:[#allocation2 + $0x19] sm:$0xff] %vm354_vm0, %v400_v9  ;;  %434 = vst.msk [vmem:[#allocation2 + $0x21] sm:$0xff] %vm354_vm0, %v401_v11  ;;  %v4512_v48 = vsub.s32 0, %v2580_v47  ;;  %v541_v50 = vsub.s32 3, %v2580_v47  ;;  %v609_v51 = vsub.s32 6, %v2580_v47  ;;  %v4513_v52 = vsub.s32 1, %v2580_v47 }
  0x4b   : > { %435 = vst.msk [vmem:[#allocation2 + $0x31] sm:$0xff] %vm354_vm0, %v402_v12  ;;  %436 = vst.msk [vmem:[#allocation2 + $0x39] sm:$0xff] %vm354_vm0, %v403_v13  ;;  %v781_v53 = vsub.s32 4, %v2580_v47  ;;  %v849_v54 = vsub.s32 7, %v2580_v47  ;;  %v953_v55 = vsub.s32 2, %v2580_v47  ;;  %v1021_v57 = vsub.s32 5, %v2580_v47 }
  0x4c   : > { %437 = vst.msk [vmem:[#allocation2 + $0x49] sm:$0xff] %vm354_vm0, %v404_v14  ;;  %438 = vst.msk [vmem:[#allocation2 + $0x51] sm:$0xff] %vm354_vm0, %v405_v15  ;;  %v2594_v56 = vrot.slane %v465_v49, %v4512_v48  ;;  %v467_v58 = vld [vmem:[#allocation2] sm:$0xff]  ;;  %v2597_v61 = vrot.slane %v465_v49, %v541_v50  ;;  %v2599_v62 = vrot.slane %v465_v49, %v609_v51  ;;  %s5042_s13 = smov (!%p348_p7, %s2372_s13), 1 }
  0x4d   : > { %439 = vst.msk [vmem:[#allocation2 + $0x61] sm:$0xff] %vm354_vm0, %v406_v16  ;;  %440 = vst.msk [vmem:[#allocation2 + $0x69] sm:$0xff] %vm354_vm0, %v407_v17  ;;  %v2607_v3 = vrot.slane %v465_v49, %v4513_v52  ;;  %v2609_v4 = vrot.slane %v465_v49, %v781_v53  ;;  %v2611_v5 = vrot.slane %v465_v49, %v849_v54  ;;  %s2034_s15 = sshll.u32 %s5042_s13, 8 }
  0x4e   : > { %441 = vst.msk [vmem:[#allocation2 + $0x79] sm:$0xff] %vm354_vm0, %v408_v18  ;;  %442 = vst.msk [vmem:[#allocation2 + $0x81] sm:$0xff] %vm354_vm0, %v409_v19  ;;  %v2613_v6 = vrot.slane %v465_v49, %v953_v55  ;;  %v2622_v10 = vmul.f32 %v2594_v56, %v467_v58  ;;  %v2625_v11 = vmul.f32 %v2594_v56, %v468_v59  ;;  %s4455_s12 = scalar_lea.vmem %s4511_s9, %s2034_s15 }
  0x4f   : > { %443 = vst.msk [vmem:[#allocation2 + $0x91] sm:$0xff] %vm354_vm0, %v410_v22  ;;  %444 = vst.msk [vmem:[#allocation2 + $0x99] sm:$0xff] %vm354_vm0, %v411_v23  ;;  %v2630_v13 = vrot.slane %v465_v49, %v1021_v57 }
  0x50   : > { %445 = vst.msk [vmem:[#allocation2 + $0xa9] sm:$0xff] %vm354_vm0, %v412_v24  ;;  %446 = vst.msk [vmem:[#allocation2 + $0xb1] sm:$0xff] %vm354_vm0, %v413_v26 }
  0x51   : > { %447 = vst.msk [vmem:[#allocation2 + $0xc1] sm:$0xff] %vm354_vm0, %v414_v27  ;;  %448 = vst.msk [vmem:[#allocation2 + $0xc9] sm:$0xff] %vm354_vm0, %v415_v28  ;;  %v469_v60 = vld [vmem:[#allocation2 + $0x18] sm:$0xff]  ;;  %v470_v63 = vld [vmem:[#allocation2 + $0x20] sm:$0xff] }
  0x52   : > { %449 = vst.msk [vmem:[#allocation2 + $0xd9] sm:$0xff] %vm354_vm0, %v416_v29  ;;  %450 = vst.msk [vmem:[#allocation2 + $0xe1] sm:$0xff] %vm354_vm0, %v417_v30  ;;  %v2601_v1 = vld [vmem:[#allocation2 + $0x30] sm:$0xff]  ;;  %v2603_v2 = vld [vmem:[#allocation2 + $0x38] sm:$0xff]  ;;  %v2628_v12 = vmul.f32 %v2594_v56, %v469_v60  ;;  %v2639_v17 = vmul.f32 %v2594_v56, %v470_v63  ;;  %v544_v50 = vmul.f32 %v2597_v61, %v470_v63 }
  0x53   : > { %451 = vst.msk [vmem:[#allocation2 + $0xf1] sm:$0xff] %vm354_vm0, %v418_v31  ;;  %452 = vst.msk [vmem:[#allocation2 + $0xf9] sm:$0xff] %vm354_vm0, %v419_v32  ;;  %v2615_v7 = vld [vmem:[#allocation2 + $0x48] sm:$0xff]  ;;  %v2617_v8 = vld [vmem:[#allocation2 + $0x50] sm:$0xff]  ;;  %v2643_v18 = vmul.f32 %v2594_v56, %v2601_v1  ;;  %v2647_v19 = vmul.f32 %v2594_v56, %v2603_v2  ;;  %v545_v59 = vmul.f32 %v2597_v61, %v2601_v1 }
  0x54   : > { %453 = vst.msk [vmem:[#allocation2 + $0x109] sm:$0xff] %vm354_vm0, %v420_v33  ;;  %454 = vst.msk [vmem:[#allocation2 + $0x111] sm:$0xff] %vm354_vm0, %v421_v34  ;;  %v2619_v9 = vld [vmem:[#allocation2 + $0x60] sm:$0xff]  ;;  %v2632_v14 = vld [vmem:[#allocation2 + $0x68] sm:$0xff]  ;;  %v2651_v20 = vmul.f32 %v2594_v56, %v2615_v7  ;;  %v2661_v24 = vmul.f32 %v2594_v56, %v2617_v8 }
  0x55   : > { %455 = vst.msk [vmem:[#allocation2 + $0x121] sm:$0xff] %vm354_vm0, %v422_v35  ;;  %456 = vst.msk [vmem:[#allocation2 + $0x129] sm:$0xff] %vm354_vm0, %v423_v36  ;;  %v2634_v15 = vld [vmem:[#allocation2 + $0x78] sm:$0xff]  ;;  %v2636_v16 = vld [vmem:[#allocation2 + $0x80] sm:$0xff]  ;;  %v2665_v25 = vmul.f32 %v2594_v56, %v2619_v9  ;;  %v2669_v26 = vmul.f32 %v2594_v56, %v2632_v14 }
  0x56   : > { %457 = vst.msk [vmem:[#allocation2 + $0x139] sm:$0xff] %vm354_vm0, %v424_v37  ;;  %458 = vst.msk [vmem:[#allocation2 + $0x141] sm:$0xff] %vm354_vm0, %v425_v39  ;;  %v2653_v21 = vld [vmem:[#allocation2 + $0x90] sm:$0xff]  ;;  %v2655_v22 = vld [vmem:[#allocation2 + $0x98] sm:$0xff]  ;;  %v2673_v27 = vmul.f32 %v2594_v56, %v2634_v15  ;;  %v2683_v31 = vmul.f32 %v2594_v56, %v2636_v16 }
  0x57   : > { %459 = vst.msk [vmem:[#allocation2 + $0x151] sm:$0xff] %vm354_vm0, %v426_v40  ;;  %460 = vst.msk [vmem:[#allocation2 + $0x159] sm:$0xff] %vm354_vm0, %v427_v41  ;;  %v2657_v23 = vld [vmem:[#allocation2 + $0xa8] sm:$0xff]  ;;  %v2675_v28 = vld [vmem:[#allocation2 + $0xb0] sm:$0xff]  ;;  %v2687_v32 = vmul.f32 %v2594_v56, %v2653_v21  ;;  %v2691_v33 = vmul.f32 %v2594_v56, %v2655_v22  ;;  %v543_v41 = vmul.f32 %v2597_v61, %v469_v60 }
  0x58   : > { %461 = vst.msk [vmem:[#allocation2 + $0x169] sm:$0xff] %vm354_vm0, %v428_v42  ;;  %462 = vst.msk [vmem:[#allocation2 + $0x171] sm:$0xff] %vm354_vm0, %v429_v43  ;;  %v2677_v29 = vld [vmem:[#allocation2 + $0xc0] sm:$0xff]  ;;  %v2679_v30 = vld [vmem:[#allocation2 + $0xc8] sm:$0xff]  ;;  %v2695_v34 = vmul.f32 %v2594_v56, %v2657_v23  ;;  %v2705_v38 = vmul.f32 %v2594_v56, %v2675_v28 }
  0x59   : > { %463 = vst.msk [vmem:[#allocation2 + $0x181] sm:$0xff] %vm354_vm0, %v430_v44  ;;  %464 = vst.msk [vmem:[#allocation2 + $0x189] sm:$0xff] %vm354_vm0, %v431_v45  ;;  %v2697_v35 = vld [vmem:[#allocation2 + $0xd8] sm:$0xff]  ;;  %v2699_v36 = vld [vmem:[#allocation2 + $0xe0] sm:$0xff]  ;;  %v2709_v39 = vmul.f32 %v2594_v56, %v2677_v29  ;;  %v2713_v40 = vmul.f32 %v2594_v56, %v2679_v30 }
  0x5a   : > { %4668 = vst [vmem:[#allocation6_spill] sm:$0xff] %v2580_v47  ;;  %4669 = vst [vmem:[#allocation7_spill] sm:$0xff] %v2599_v62  ;;  %v2701_v37 = vld [vmem:[#allocation2 + $0xf0] sm:$0xff]  ;;  %v2716_v42 = vld [vmem:[#allocation2 + $0xf8] sm:$0xff]  ;;  %v2724_v45 = vmul.f32 %v2594_v56, %v2697_v35  ;;  %v2728_v46 = vmul.f32 %v2594_v56, %v2699_v36 }
  0x5b   : > { %4670 = vst [vmem:[#allocation8_spill] sm:$0xff] %v2601_v1  ;;  %4671 = vst [vmem:[#allocation9_spill] sm:$0xff] %v2603_v2  ;;  %v2718_v43 = vld [vmem:[#allocation2 + $0x108] sm:$0xff]  ;;  %v2720_v44 = vld [vmem:[#allocation2 + $0x110] sm:$0xff]  ;;  %v2732_v49 = vmul.f32 %v2594_v56, %v2701_v37  ;;  %v2743_v55 = vmul.f32 %v2594_v56, %v2716_v42  ;;  %v547_v1 = vmul.f32 %v2597_v61, %v2615_v7 }
  0x5c   : > { %4672 = vst [vmem:[#allocation10_spill] sm:$0xff] %v2607_v3  ;;  %4673 = vst [vmem:[#allocation11_spill] sm:$0xff] %v2609_v4  ;;  %v2735_v51 = vld [vmem:[#allocation2 + $0x120] sm:$0xff]  ;;  %v2737_v53 = vld [vmem:[#allocation2 + $0x128] sm:$0xff]  ;;  %v2747_v57 = vmul.f32 %v2594_v56, %v2718_v43  ;;  %v2751_v58 = vmul.f32 %v2594_v56, %v2720_v44 }
  0x5d   : > { %4674 = vst [vmem:[#allocation12_spill] sm:$0xff] %v2611_v5  ;;  %4675 = vst [vmem:[#allocation13_spill] sm:$0xff] %v2613_v6  ;;  %v2739_v54 = vld [vmem:[#allocation2 + $0x138] sm:$0xff]  ;;  %v2755_v60 = vld [vmem:[#allocation2 + $0x140] sm:$0xff]  ;;  %v2763_v52 = vmul.f32 %v2594_v56, %v2735_v51  ;;  %v2767_v0 = vmul.f32 %v2594_v56, %v2737_v53 }
  0x5e   : > { %4676 = vst [vmem:[#allocation14_spill] sm:$0xff] %v2615_v7  ;;  %4677 = vst [vmem:[#allocation15_spill] sm:$0xff] %v2617_v8  ;;  %v2757_v63 = vld [vmem:[#allocation2 + $0x150] sm:$0xff]  ;;  %v2759_v48 = vld [vmem:[#allocation2 + $0x158] sm:$0xff]  ;;  %v2771_v47 = vmul.f32 %v2594_v56, %v2739_v54  ;;  %v534_v4 = vmul.f32 %v2594_v56, %v2755_v60  ;;  %v552_v7 = vmul.f32 %v2597_v61, %v2636_v16 }
  0x5f   : > { %4678 = vst [vmem:[#allocation16_spill] sm:$0xff] %v2619_v9  ;;  %4679 = vst [vmem:[#allocation17_spill] sm:$0xff] %v2630_v13  ;;  %v546_v13 = vmul.f32 %v2597_v61, %v2603_v2  ;;  %v2775_v6 = vld [vmem:[#allocation2 + $0x168] sm:$0xff]  ;;  %v2777_v5 = vld [vmem:[#allocation2 + $0x170] sm:$0xff]  ;;  %v535_v3 = vmul.f32 %v2594_v56, %v2757_v63  ;;  %v536_v62 = vmul.f32 %v2594_v56, %v2759_v48 }
  0x60   : > { %4680 = vst [vmem:[#allocation18_spill] sm:$0xff] %v2632_v14  ;;  %4681 = vst [vmem:[#allocation19_spill] sm:$0xff] %v2634_v15  ;;  %v538_v2 = vmul.f32 %v2594_v56, %v2777_v5 }
  0x61   : > { %4682 = vst [vmem:[#allocation20_spill] sm:$0xff] %v2636_v16  ;;  %4683 = vst [vmem:[#allocation21_spill] sm:$0xff] %v2653_v21  ;;  %v559_v16 = vmul.f32 %v2597_v61, %v2697_v35 }
  0x62   : > { %4684 = vst [vmem:[#allocation22_spill] sm:$0xff] %v2655_v22  ;;  %4685 = vst [vmem:[#allocation23_spill] sm:$0xff] %v2657_v23 }
  0x63   : > { %4686 = vst [vmem:[#allocation24_spill] sm:$0xff] %v2675_v28  ;;  %4687 = vst [vmem:[#allocation25_spill] sm:$0xff] %v2677_v29 }
  0x64   : > { %4688 = vst [vmem:[#allocation26_spill] sm:$0xff] %v2679_v30  ;;  %4689 = vst [vmem:[#allocation27_spill] sm:$0xff] %v2697_v35  ;;  %v2837_v35 = vld [vmem:[#allocation2 + $0x188] sm:$0xff] }
  0x65   : > { %4690 = vst [vmem:[#allocation28_spill] sm:$0xff] %v2699_v36  ;;  %4691 = vst [vmem:[#allocation29_spill] sm:$0xff] %v2701_v37 }
  0x66   : > { %4692 = vst [vmem:[#allocation30_spill] sm:$0xff] %v2716_v42  ;;  %4693 = vst [vmem:[#allocation31_spill] sm:$0xff] %v2718_v43 }
  0x67   : > { %4694 = vst [vmem:[#allocation32_spill] sm:$0xff] %v2720_v44  ;;  %4695 = vst [vmem:[#allocation33_spill] sm:$0xff] %v2728_v46  ;;  %v2850_v46 = vadd.f32 %v543_v41, %v2622_v10  ;;  %v4731_v41 = vld [vmem:[#allocation9_spill] sm:$0xff] }
  0x68   : > { %4696 = vst [vmem:[#allocation34_spill] sm:$0xff] %v2732_v49  ;;  %4697 = vst [vmem:[#allocation35_spill] sm:$0xff] %v2735_v51  ;;  %v2827_v49 = vld [vmem:[#allocation2 + $0x180] sm:$0xff] }
  0x69   : > { %4698 = vst [vmem:[#allocation36_spill] sm:$0xff] %v2737_v53  ;;  %4699 = vst [vmem:[#allocation37_spill] sm:$0xff] %v2739_v54 }
  0x6a   : > { %4700 = vst [vmem:[#allocation38_spill] sm:$0xff] %v2743_v55  ;;  %4701 = vst [vmem:[#allocation39_spill] sm:$0xff] %v2747_v57  ;;  %v551_v57 = vmul.f32 %v2597_v61, %v2634_v15  ;;  %v553_v55 = vmul.f32 %v2597_v61, %v2653_v21  ;;  %v558_v15 = vmul.f32 %v2597_v61, %v2679_v30 }
  0x6b   : > { %4702 = vst [vmem:[#allocation40_spill] sm:$0xff] %v2751_v58  ;;  %4703 = vst [vmem:[#allocation41_spill] sm:$0xff] %v2755_v60  ;;  %v550_v58 = vmul.f32 %v2597_v61, %v2632_v14  ;;  %v557_v14 = vmul.f32 %v2597_v61, %v2677_v29  ;;  %v560_v21 = vmul.f32 %v2597_v61, %v2699_v36 }
  0x6c   : > { %4704 = vst [vmem:[#allocation42_spill] sm:$0xff] %v2757_v63  ;;  %4705 = vst [vmem:[#allocation43_spill] sm:$0xff] %v2759_v48  ;;  %v564_v29 = vmul.f32 %v2597_v61, %v2720_v44  ;;  %v565_v30 = vmul.f32 %v2597_v61, %v2735_v51  ;;  %v566_v36 = vmul.f32 %v2597_v61, %v2737_v53 }
  0x6d   : > { %4706 = vst [vmem:[#allocation44_spill] sm:$0xff] %v2763_v52  ;;  %4707 = vst [vmem:[#allocation45_spill] sm:$0xff] %v2767_v0  ;;  %v548_v0 = vmul.f32 %v2597_v61, %v2617_v8  ;;  %v549_v52 = vmul.f32 %v2597_v61, %v2619_v9  ;;  %v555_v8 = vmul.f32 %v2597_v61, %v2657_v23 }
  0x6e   : > { %4708 = vst [vmem:[#allocation46_spill] sm:$0xff] %v2771_v47  ;;  %4709 = vst [vmem:[#allocation47_spill] sm:$0xff] %v2775_v6  ;;  %v537_v47 = vmul.f32 %v2594_v56, %v2775_v6  ;;  %v554_v56 = vmul.f32 %v2597_v61, %v2655_v22  ;;  %v556_v9 = vmul.f32 %v2597_v61, %v2675_v28 }
  0x6f   : > { %4710 = vst [vmem:[#allocation48_spill] sm:$0xff] %v2777_v5  ;;  %v561_v22 = vmul.f32 %v2597_v61, %v2701_v37  ;;  %v562_v23 = vmul.f32 %v2597_v61, %v2716_v42  ;;  %v563_v28 = vmul.f32 %v2597_v61, %v2718_v43  ;;  %4711 = vst [vmem:[#allocation49_spill] sm:$0xff] %v2827_v49 }
  0x70   : > { %v567_v37 = vmul.f32 %v2597_v61, %v2739_v54  ;;  %v568_v42 = vmul.f32 %v2597_v61, %v2755_v60  ;;  %v569_v43 = vmul.f32 %v2597_v61, %v2757_v63  ;;  %v570_v44 = vmul.f32 %v2597_v61, %v2759_v48 }
  0x71   : > { %v571_v51 = vmul.f32 %v2597_v61, %v2775_v6  ;;  %v572_v53 = vmul.f32 %v2597_v61, %v2777_v5  ;;  %v573_v54 = vmul.f32 %v2597_v61, %v2827_v49  ;;  %v574_v60 = vmul.f32 %v2597_v61, %v2837_v35 }
  0x72   : > { %v2853_v63 = vadd.f32 %v544_v50, %v2625_v11  ;;  %v2856_v48 = vadd.f32 %v545_v59, %v2628_v12  ;;  %v2859_v6 = vadd.f32 %v546_v13, %v2639_v17  ;;  %v2862_v5 = vadd.f32 %v547_v1, %v2643_v18  ;;  %v4733_v50 = vld [vmem:[#allocation15_spill] sm:$0xff] }
  0x73   : > { %v2865_v49 = vadd.f32 %v548_v0, %v2647_v19  ;;  %v2868_v61 = vadd.f32 %v549_v52, %v2651_v20  ;;  %v2871_v10 = vadd.f32 %v550_v58, %v2661_v24  ;;  %v2874_v11 = vadd.f32 %v551_v57, %v2665_v25  ;;  %v4739_v58 = vld [vmem:[#allocation22_spill] sm:$0xff] }
  0x74   : > { %v2877_v12 = vadd.f32 %v552_v7, %v2669_v26  ;;  %v2880_v13 = vadd.f32 %v553_v55, %v2673_v27  ;;  %v2883_v1 = vadd.f32 %v554_v56, %v2683_v31  ;;  %v2886_v0 = vadd.f32 %v555_v8, %v2687_v32  ;;  %v4712_v8 = vld [vmem:[#allocation33_spill] sm:$0xff] }
  0x75   : > { %v2889_v52 = vadd.f32 %v556_v9, %v2691_v33  ;;  %v2892_v17 = vadd.f32 %v557_v14, %v2695_v34  ;;  %v2895_v18 = vadd.f32 %v558_v15, %v2705_v38  ;;  %v2898_v7 = vadd.f32 %v559_v16, %v2709_v39  ;;  %v4713_v9 = vld [vmem:[#allocation34_spill] sm:$0xff]  ;;  %v4715_v15 = vld [vmem:[#allocation39_spill] sm:$0xff]  ;;  %v4716_v16 = vld [vmem:[#allocation40_spill] sm:$0xff] }
  0x76   : > { %v2901_v19 = vadd.f32 %v560_v21, %v2713_v40  ;;  %v2904_v20 = vadd.f32 %v561_v22, %v2724_v45  ;;  %v2907_v24 = vadd.f32 %v562_v23, %v4712_v8  ;;  %v2910_v25 = vadd.f32 %v563_v28, %v4713_v9  ;;  %v4714_v14 = vld [vmem:[#allocation38_spill] sm:$0xff]  ;;  %v4718_v21 = vld [vmem:[#allocation44_spill] sm:$0xff]  ;;  %v4720_v22 = vld [vmem:[#allocation45_spill] sm:$0xff] }
  0x77   : > { %v2913_v26 = vadd.f32 %v564_v29, %v4714_v14  ;;  %v2916_v27 = vadd.f32 %v565_v30, %v4715_v15  ;;  %v2919_v31 = vadd.f32 %v566_v36, %v4716_v16  ;;  %v2922_v32 = vadd.f32 %v567_v37, %v4718_v21  ;;  %v4722_v23 = vld [vmem:[#allocation46_spill] sm:$0xff]  ;;  %v4729_v36 = vld [vmem:[#allocation8_spill] sm:$0xff]  ;;  %v4730_v40 = vld [vmem:[#allocation7_spill] sm:$0xff] }
  0x78   : > { %v2925_v33 = vadd.f32 %v568_v42, %v4720_v22  ;;  %v2928_v34 = vadd.f32 %v569_v43, %v4722_v23  ;;  %v2930_v28 = vadd.f32 %v570_v44, %v534_v4  ;;  %v2932_v38 = vadd.f32 %v571_v51, %v535_v3  ;;  %v4732_v45 = vld [vmem:[#allocation14_spill] sm:$0xff]  ;;  %v4734_v3 = vld [vmem:[#allocation16_spill] sm:$0xff]  ;;  %v4738_v55 = vld [vmem:[#allocation21_spill] sm:$0xff] }
  0x79   : > { %4717 = vst [vmem:[#allocation33_spill] sm:$0xff] %v2919_v31  ;;  %4719 = vst [vmem:[#allocation34_spill] sm:$0xff] %v2922_v32  ;;  %v2934_v29 = vadd.f32 %v572_v53, %v536_v62  ;;  %v2936_v30 = vadd.f32 %v573_v54, %v537_v47  ;;  %v2938_v39 = vadd.f32 %v574_v60, %v538_v2  ;;  %v4735_v44 = vld [vmem:[#allocation18_spill] sm:$0xff]  ;;  %v4736_v2 = vld [vmem:[#allocation19_spill] sm:$0xff] }
  0x7a   : > { %4721 = vst [vmem:[#allocation38_spill] sm:$0xff] %v2925_v33  ;;  %4723 = vst [vmem:[#allocation39_spill] sm:$0xff] %v2928_v34  ;;  %v611_v37 = vmul.f32 %v4730_v40, %v4729_v36  ;;  %v612_v42 = vmul.f32 %v4730_v40, %v4731_v41  ;;  %v613_v43 = vmul.f32 %v4730_v40, %v4732_v45  ;;  %v4737_v53 = vld [vmem:[#allocation20_spill] sm:$0xff]  ;;  %v4740_v60 = vld [vmem:[#allocation23_spill] sm:$0xff] }
  0x7b   : > { %4724 = vst [vmem:[#allocation40_spill] sm:$0xff] %v2930_v28  ;;  %4725 = vst [vmem:[#allocation44_spill] sm:$0xff] %v2932_v38  ;;  %v614_v4 = vmul.f32 %v4730_v40, %v4733_v50  ;;  %v615_v62 = vmul.f32 %v4730_v40, %v4734_v3  ;;  %v616_v47 = vmul.f32 %v4730_v40, %v4735_v44  ;;  %v4741_v8 = vld [vmem:[#allocation24_spill] sm:$0xff]  ;;  %v4742_v14 = vld [vmem:[#allocation25_spill] sm:$0xff] }
  0x7c   : > { %4726 = vst [vmem:[#allocation45_spill] sm:$0xff] %v2934_v29  ;;  %4727 = vst [vmem:[#allocation46_spill] sm:$0xff] %v2936_v30  ;;  %v617_v51 = vmul.f32 %v4730_v40, %v4736_v2  ;;  %v618_v54 = vmul.f32 %v4730_v40, %v4737_v53  ;;  %v619_v57 = vmul.f32 %v4730_v40, %v4738_v55  ;;  %v4743_v16 = vld [vmem:[#allocation26_spill] sm:$0xff]  ;;  %v4744_v22 = vld [vmem:[#allocation27_spill] sm:$0xff] }
  0x7d   : > { %4728 = vst [vmem:[#allocation50_spill] sm:$0xff] %v2938_v39  ;;  %v620_v59 = vmul.f32 %v4730_v40, %v4739_v58  ;;  %v621_v56 = vmul.f32 %v4730_v40, %v4740_v60  ;;  %v622_v9 = vmul.f32 %v4730_v40, %v4741_v8  ;;  %v623_v15 = vmul.f32 %v4730_v40, %v4742_v14  ;;  %v501_v36 = vld [vmem:[#allocation2 + $0x198] sm:$0xff]  ;;  %v4745_v41 = vld [vmem:[#allocation28_spill] sm:$0xff]  ;;  %v4746_v50 = vld [vmem:[#allocation29_spill] sm:$0xff] }
  0x7e   : > { %v624_v21 = vmul.f32 %v4730_v40, %v4743_v16  ;;  %v625_v23 = vmul.f32 %v4730_v40, %v4744_v22  ;;  %v626_v45 = vmul.f32 %v4730_v40, %v4745_v41  ;;  %v627_v3 = vmul.f32 %v4730_v40, %v4746_v50  ;;  %v4747_v44 = vld [vmem:[#allocation30_spill] sm:$0xff]  ;;  %v4748_v53 = vld [vmem:[#allocation31_spill] sm:$0xff]  ;;  %v502_v58 = vld [vmem:[#allocation2 + $0x1a0] sm:$0xff] }
  0x7f   : > { %v628_v2 = vmul.f32 %v4730_v40, %v4747_v44  ;;  %v629_v55 = vmul.f32 %v4730_v40, %v4748_v53  ;;  %v4749_v60 = vld [vmem:[#allocation32_spill] sm:$0xff]  ;;  %v4750_v14 = vld [vmem:[#allocation35_spill] sm:$0xff]  ;;  %v4752_v41 = vld [vmem:[#allocation37_spill] sm:$0xff]  ;;  %v642_v31 = vmul.f32 %v4730_v40, %v502_v58 }
  0x80   : > { %v630_v8 = vmul.f32 %v4730_v40, %v4749_v60  ;;  %v631_v16 = vmul.f32 %v4730_v40, %v4750_v14  ;;  %v4751_v22 = vld [vmem:[#allocation36_spill] sm:$0xff]  ;;  %v633_v30 = vmul.f32 %v4730_v40, %v4752_v41  ;;  %v4753_v50 = vld [vmem:[#allocation41_spill] sm:$0xff]  ;;  %v4754_v44 = vld [vmem:[#allocation42_spill] sm:$0xff]  ;;  %v640_v41 = vmul.f32 %v4730_v40, %v2837_v35 }
  0x81   : > { %v632_v39 = vmul.f32 %v4730_v40, %v4751_v22  ;;  %v634_v29 = vmul.f32 %v4730_v40, %v4753_v50  ;;  %v635_v38 = vmul.f32 %v4730_v40, %v4754_v44  ;;  %v4755_v53 = vld [vmem:[#allocation43_spill] sm:$0xff]  ;;  %v4757_v33 = vld [vmem:[#allocation48_spill] sm:$0xff]  ;;  %v4758_v32 = vld [vmem:[#allocation49_spill] sm:$0xff]  ;;  %v641_v50 = vmul.f32 %v4730_v40, %v501_v36 }
  0x82   : > { %v636_v28 = vmul.f32 %v4730_v40, %v4755_v53  ;;  %v4756_v34 = vld [vmem:[#allocation47_spill] sm:$0xff]  ;;  %v638_v14 = vmul.f32 %v4730_v40, %v4757_v33  ;;  %v639_v22 = vmul.f32 %v4730_v40, %v4758_v32  ;;  %v3003_v44 = vadd.f32 %v611_v37, %v2850_v46  ;;  %v676_v37 = vld [vmem:[#allocation2 + $0x9] sm:$0xff] }
  0x83   : > { %v637_v60 = vmul.f32 %v4730_v40, %v4756_v34  ;;  %v3006_v53 = vadd.f32 %v612_v42, %v2853_v63  ;;  %v3009_v34 = vadd.f32 %v613_v43, %v2856_v48  ;;  %v3012_v33 = vadd.f32 %v614_v4, %v2859_v6  ;;  %v3071_v42 = vld [vmem:[#allocation2 + $0x19] sm:$0xff] }
  0x84   : > { %v3015_v32 = vadd.f32 %v615_v62, %v2862_v5  ;;  %v3018_v35 = vadd.f32 %v616_v47, %v2865_v49  ;;  %v3021_v40 = vadd.f32 %v617_v51, %v2868_v61  ;;  %v3024_v46 = vadd.f32 %v618_v54, %v2871_v10  ;;  %4759 = vst [vmem:[#allocation8_spill] sm:$0xff] %v3071_v42  ;;  %v4771_v51 = vld [vmem:[#allocation40_spill] sm:$0xff] }
  0x85   : > { %v3027_v63 = vadd.f32 %v619_v57, %v2874_v11  ;;  %v3030_v48 = vadd.f32 %v620_v59, %v2877_v12  ;;  %v3033_v6 = vadd.f32 %v621_v56, %v2880_v13  ;;  %v3036_v5 = vadd.f32 %v622_v9, %v2883_v1  ;;  %v4773_v54 = vld [vmem:[#allocation44_spill] sm:$0xff]  ;;  %v4775_v57 = vld [vmem:[#allocation45_spill] sm:$0xff]  ;;  %v4777_v59 = vld [vmem:[#allocation46_spill] sm:$0xff] }
  0x86   : > { %v3039_v49 = vadd.f32 %v623_v15, %v2886_v0  ;;  %v3042_v61 = vadd.f32 %v624_v21, %v2889_v52  ;;  %v3045_v10 = vadd.f32 %v625_v23, %v2892_v17  ;;  %v3048_v11 = vadd.f32 %v626_v45, %v2895_v18  ;;  %v3105_v9 = vld [vmem:[#allocation2 + $0x51] sm:$0xff]  ;;  %v3107_v15 = vld [vmem:[#allocation2 + $0x61] sm:$0xff]  ;;  %v3109_v21 = vld [vmem:[#allocation2 + $0x69] sm:$0xff] }
  0x87   : > { %v3051_v12 = vadd.f32 %v627_v3, %v2898_v7  ;;  %v3054_v13 = vadd.f32 %v628_v2, %v2901_v19  ;;  %v3057_v1 = vadd.f32 %v629_v55, %v2904_v20  ;;  %v3060_v0 = vadd.f32 %v630_v8, %v2907_v24  ;;  %v675_v7 = vld [vmem:[#allocation2 + $0x1] sm:$0xff]  ;;  %v4761_v20 = vld [vmem:[#allocation34_spill] sm:$0xff]  ;;  %4779 = vst [vmem:[#allocation24_spill] sm:$0xff] %v3105_v9  ;;  %v3114_v45 = vld [vmem:[#allocation2 + $0x79] sm:$0xff] }
  0x88   : > { %v3063_v52 = vadd.f32 %v631_v16, %v2910_v25  ;;  %v3066_v17 = vadd.f32 %v632_v39, %v2913_v26  ;;  %v3069_v18 = vadd.f32 %v633_v30, %v2916_v27  ;;  %v4760_v19 = vld [vmem:[#allocation33_spill] sm:$0xff]  ;;  %v3077_v4 = vadd.f32 %v635_v38, %v4761_v20  ;;  %v4763_v24 = vld [vmem:[#allocation38_spill] sm:$0xff]  ;;  %v4765_v25 = vld [vmem:[#allocation39_spill] sm:$0xff]  ;;  %4780 = vst [vmem:[#allocation25_spill] sm:$0xff] %v3107_v15 }
  0x89   : > { %v3074_v43 = vadd.f32 %v634_v29, %v4760_v19  ;;  %v3080_v62 = vadd.f32 %v636_v28, %v4763_v24  ;;  %v3083_v47 = vadd.f32 %v637_v60, %v4765_v25  ;;  %v3085_v26 = vld [vmem:[#allocation2 + $0x21] sm:$0xff]  ;;  %v3087_v27 = vld [vmem:[#allocation2 + $0x31] sm:$0xff]  ;;  %v3089_v30 = vld [vmem:[#allocation2 + $0x39] sm:$0xff]  ;;  %v3094_v29 = vadd.f32 %v638_v14, %v4771_v51  ;;  %4781 = vst [vmem:[#allocation26_spill] sm:$0xff] %v3109_v21 }
  0x8a   : > { %4762 = vst [vmem:[#allocation7_spill] sm:$0xff] %v3077_v4  ;;  %4767 = vst [vmem:[#allocation15_spill] sm:$0xff] %v3085_v26  ;;  %v3091_v39 = vld [vmem:[#allocation2 + $0x49] sm:$0xff]  ;;  %v3097_v38 = vadd.f32 %v639_v22, %v4773_v54  ;;  %v3100_v28 = vadd.f32 %v640_v41, %v4775_v57  ;;  %v3103_v56 = vadd.f32 %v641_v50, %v4777_v59  ;;  %v3116_v3 = vld [vmem:[#allocation2 + $0x81] sm:$0xff] }
  0x8b   : > { %4764 = vst [vmem:[#allocation9_spill] sm:$0xff] %v3080_v62  ;;  %4766 = vst [vmem:[#allocation14_spill] sm:$0xff] %v3083_v47  ;;  %v4782_v23 = vld [vmem:[#allocation50_spill] sm:$0xff]  ;;  %v3124_v60 = vld [vmem:[#allocation2 + $0x99] sm:$0xff] }
  0x8c   : > { %4768 = vst [vmem:[#allocation16_spill] sm:$0xff] %v3087_v27  ;;  %4769 = vst [vmem:[#allocation18_spill] sm:$0xff] %v3089_v30  ;;  %v3112_v36 = vadd.f32 %v642_v31, %v4782_v23  ;;  %v3118_v2 = vld [vmem:[#allocation2 + $0x91] sm:$0xff]  ;;  %v3126_v14 = vld [vmem:[#allocation2 + $0xa9] sm:$0xff] }
  0x8d   : > { %4770 = vst [vmem:[#allocation19_spill] sm:$0xff] %v3091_v39  ;;  %4772 = vst [vmem:[#allocation20_spill] sm:$0xff] %v3094_v29  ;;  %v4787_v55 = vld [vmem:[#allocation10_spill] sm:$0xff]  ;;  %v3142_v20 = vld [vmem:[#allocation2 + $0xd9] sm:$0xff] }
  0x8e   : > { %4774 = vst [vmem:[#allocation21_spill] sm:$0xff] %v3097_v38  ;;  %4776 = vst [vmem:[#allocation22_spill] sm:$0xff] %v3100_v28  ;;  %v715_v58 = vmul.f32 %v4787_v55, %v675_v7  ;;  %v716_v8 = vmul.f32 %v4787_v55, %v676_v37  ;;  %v717_v16 = vmul.f32 %v4787_v55, %v3071_v42  ;;  %v3128_v22 = vld [vmem:[#allocation2 + $0xb1] sm:$0xff]  ;;  %v3138_v37 = vld [vmem:[#allocation2 + $0xc1] sm:$0xff] }
  0x8f   : > { %4778 = vst [vmem:[#allocation23_spill] sm:$0xff] %v3103_v56  ;;  %4783 = vst [vmem:[#allocation27_spill] sm:$0xff] %v3112_v36  ;;  %v718_v31 = vmul.f32 %v4787_v55, %v3085_v26  ;;  %v719_v41 = vmul.f32 %v4787_v55, %v3087_v27  ;;  %v720_v50 = vmul.f32 %v4787_v55, %v3089_v30  ;;  %v3140_v19 = vld [vmem:[#allocation2 + $0xc9] sm:$0xff]  ;;  %v3152_v57 = vld [vmem:[#allocation2 + $0xe1] sm:$0xff] }
  0x90   : > { %4784 = vst [vmem:[#allocation28_spill] sm:$0xff] %v3114_v45  ;;  %4785 = vst [vmem:[#allocation29_spill] sm:$0xff] %v3116_v3  ;;  %v721_v7 = vmul.f32 %v4787_v55, %v3091_v39  ;;  %v722_v24 = vmul.f32 %v4787_v55, %v3105_v9  ;;  %v723_v25 = vmul.f32 %v4787_v55, %v3107_v15  ;;  %v3154_v59 = vld [vmem:[#allocation2 + $0xf1] sm:$0xff]  ;;  %v3156_v23 = vld [vmem:[#allocation2 + $0xf9] sm:$0xff] }
  0x91   : > { %4786 = vst [vmem:[#allocation30_spill] sm:$0xff] %v3118_v2  ;;  %4788 = vst [vmem:[#allocation31_spill] sm:$0xff] %v3124_v60  ;;  %v724_v51 = vmul.f32 %v4787_v55, %v3109_v21  ;;  %v725_v54 = vmul.f32 %v4787_v55, %v3114_v45  ;;  %v726_v39 = vmul.f32 %v4787_v55, %v3116_v3  ;;  %v3166_v30 = vld [vmem:[#allocation2 + $0x109] sm:$0xff]  ;;  %v3168_v45 = vld [vmem:[#allocation2 + $0x111] sm:$0xff] }
  0x92   : > { %4789 = vst [vmem:[#allocation32_spill] sm:$0xff] %v3126_v14  ;;  %4790 = vst [vmem:[#allocation35_spill] sm:$0xff] %v3128_v22  ;;  %v727_v9 = vmul.f32 %v4787_v55, %v3118_v2  ;;  %v728_v15 = vmul.f32 %v4787_v55, %v3124_v60  ;;  %v729_v21 = vmul.f32 %v4787_v55, %v3126_v14  ;;  %v3170_v27 = vld [vmem:[#allocation2 + $0x121] sm:$0xff]  ;;  %v3180_v42 = vld [vmem:[#allocation2 + $0x129] sm:$0xff] }
  0x93   : > { %4791 = vst [vmem:[#allocation36_spill] sm:$0xff] %v3138_v37  ;;  %4792 = vst [vmem:[#allocation37_spill] sm:$0xff] %v3140_v19  ;;  %v730_v26 = vmul.f32 %v4787_v55, %v3128_v22  ;;  %v731_v3 = vmul.f32 %v4787_v55, %v3138_v37  ;;  %v732_v2 = vmul.f32 %v4787_v55, %v3140_v19  ;;  %v3182_v14 = vld [vmem:[#allocation2 + $0x139] sm:$0xff]  ;;  %v3184_v36 = vld [vmem:[#allocation2 + $0x141] sm:$0xff] }
  0x94   : > { %4793 = vst [vmem:[#allocation41_spill] sm:$0xff] %v3142_v20  ;;  %4794 = vst [vmem:[#allocation42_spill] sm:$0xff] %v3152_v57  ;;  %v733_v60 = vmul.f32 %v4787_v55, %v3142_v20  ;;  %v734_v56 = vmul.f32 %v4787_v55, %v3152_v57  ;;  %v735_v22 = vmul.f32 %v4787_v55, %v3154_v59  ;;  %v3194_v28 = vld [vmem:[#allocation2 + $0x151] sm:$0xff]  ;;  %v3196_v20 = vld [vmem:[#allocation2 + $0x159] sm:$0xff] }
  0x95   : > { %4795 = vst [vmem:[#allocation43_spill] sm:$0xff] %v3154_v59  ;;  %4796 = vst [vmem:[#allocation47_spill] sm:$0xff] %v3156_v23  ;;  %v736_v37 = vmul.f32 %v4787_v55, %v3156_v23  ;;  %v737_v19 = vmul.f32 %v4787_v55, %v3166_v30  ;;  %v3198_v38 = vld [vmem:[#allocation2 + $0x169] sm:$0xff]  ;;  %v738_v29 = vmul.f32 %v4787_v55, %v3168_v45  ;;  %v3208_v47 = vld [vmem:[#allocation2 + $0x171] sm:$0xff] }
  0x96   : > { %4797 = vst [vmem:[#allocation48_spill] sm:$0xff] %v3166_v30  ;;  %4798 = vst [vmem:[#allocation49_spill] sm:$0xff] %v3168_v45  ;;  %v739_v57 = vmul.f32 %v4787_v55, %v3170_v27  ;;  %v740_v59 = vmul.f32 %v4787_v55, %v3180_v42  ;;  %v741_v23 = vmul.f32 %v4787_v55, %v3182_v14 }
  0x97   : > { %4799 = vst [vmem:[#allocation33_spill] sm:$0xff] %v3170_v27  ;;  %4800 = vst [vmem:[#allocation34_spill] sm:$0xff] %v3180_v42  ;;  %v742_v30 = vmul.f32 %v4787_v55, %v3184_v36  ;;  %v743_v62 = vmul.f32 %v4787_v55, %v3194_v28  ;;  %v744_v45 = vmul.f32 %v4787_v55, %v3196_v20 }
  0x98   : > { %4801 = vst [vmem:[#allocation38_spill] sm:$0xff] %v3182_v14  ;;  %4802 = vst [vmem:[#allocation39_spill] sm:$0xff] %v3184_v36  ;;  %v745_v27 = vmul.f32 %v4787_v55, %v3198_v38  ;;  %v746_v42 = vmul.f32 %v4787_v55, %v3208_v47  ;;  %v3221_v4 = vadd.f32 %v715_v58, %v3003_v44  ;;  %v4823_v58 = vld [vmem:[#allocation8_spill] sm:$0xff] }
  0x99   : > { %4803 = vst [vmem:[#allocation40_spill] sm:$0xff] %v3194_v28  ;;  %4804 = vst [vmem:[#allocation44_spill] sm:$0xff] %v3196_v20  ;;  %v3224_v14 = vadd.f32 %v716_v8, %v3006_v53  ;;  %v3227_v36 = vadd.f32 %v717_v16, %v3009_v34  ;;  %v3230_v28 = vadd.f32 %v718_v31, %v3012_v33  ;;  %v4824_v8 = vld [vmem:[#allocation11_spill] sm:$0xff] }
  0x9a   : > { %4805 = vst [vmem:[#allocation45_spill] sm:$0xff] %v3198_v38  ;;  %4806 = vst [vmem:[#allocation46_spill] sm:$0xff] %v3208_v47  ;;  %v3233_v20 = vadd.f32 %v719_v41, %v3015_v32  ;;  %v3236_v38 = vadd.f32 %v720_v50, %v3018_v35  ;;  %v3239_v55 = vadd.f32 %v721_v7, %v3021_v40 }
  0x9b   : > { %v3242_v44 = vadd.f32 %v722_v24, %v3024_v46  ;;  %v3245_v53 = vadd.f32 %v723_v25, %v3027_v63  ;;  %v3248_v34 = vadd.f32 %v724_v51, %v3030_v48  ;;  %v3251_v33 = vadd.f32 %v725_v54, %v3033_v6  ;;  %v4832_v25 = vld [vmem:[#allocation28_spill] sm:$0xff]  ;;  %v4833_v54 = vld [vmem:[#allocation29_spill] sm:$0xff] }
  0x9c   : > { %v3254_v32 = vadd.f32 %v726_v39, %v3036_v5  ;;  %v3257_v35 = vadd.f32 %v727_v9, %v3039_v49  ;;  %v3260_v40 = vadd.f32 %v728_v15, %v3042_v61  ;;  %v3263_v46 = vadd.f32 %v729_v21, %v3045_v10 }
  0x9d   : > { %v3266_v63 = vadd.f32 %v730_v26, %v3048_v11  ;;  %v3269_v48 = vadd.f32 %v731_v3, %v3051_v12  ;;  %v3272_v6 = vadd.f32 %v732_v2, %v3054_v13  ;;  %v3275_v5 = vadd.f32 %v733_v60, %v3057_v1  ;;  %v4807_v13 = vld [vmem:[#allocation7_spill] sm:$0xff]  ;;  %v4809_v1 = vld [vmem:[#allocation9_spill] sm:$0xff] }
  0x9e   : > { %v3278_v49 = vadd.f32 %v734_v56, %v3060_v0  ;;  %v3281_v61 = vadd.f32 %v735_v22, %v3063_v52  ;;  %v3284_v10 = vadd.f32 %v736_v37, %v3066_v17  ;;  %v3287_v11 = vadd.f32 %v737_v19, %v3069_v18  ;;  %v4811_v0 = vld [vmem:[#allocation14_spill] sm:$0xff]  ;;  %v4813_v52 = vld [vmem:[#allocation20_spill] sm:$0xff]  ;;  %v4815_v17 = vld [vmem:[#allocation21_spill] sm:$0xff] }
  0x9f   : > { %v3290_v12 = vadd.f32 %v738_v29, %v3074_v43  ;;  %v3293_v26 = vadd.f32 %v739_v57, %v4807_v13  ;;  %v3296_v39 = vadd.f32 %v740_v59, %v4809_v1  ;;  %v3299_v56 = vadd.f32 %v741_v23, %v4811_v0  ;;  %v4817_v18 = vld [vmem:[#allocation22_spill] sm:$0xff]  ;;  %v4819_v43 = vld [vmem:[#allocation23_spill] sm:$0xff]  ;;  %v4836_v0 = vld [vmem:[#allocation32_spill] sm:$0xff] }
  0xa0   : > { %v3302_v9 = vadd.f32 %v742_v30, %v4813_v52  ;;  %v3305_v15 = vadd.f32 %v743_v62, %v4815_v17  ;;  %v3308_v21 = vadd.f32 %v744_v45, %v4817_v18  ;;  %v3311_v29 = vadd.f32 %v745_v27, %v4819_v43  ;;  %v4821_v3 = vld [vmem:[#allocation27_spill] sm:$0xff]  ;;  %v4826_v30 = vld [vmem:[#allocation16_spill] sm:$0xff]  ;;  %v4827_v62 = vld [vmem:[#allocation18_spill] sm:$0xff] }
  0xa1   : > { %4808 = vst [vmem:[#allocation50_spill] sm:$0xff] %v3293_v26  ;;  %4810 = vst [vmem:[#allocation10_spill] sm:$0xff] %v3296_v39  ;;  %v3314_v2 = vadd.f32 %v746_v42, %v4821_v3  ;;  %v783_v16 = vmul.f32 %v4824_v8, %v4823_v58  ;;  %v4825_v60 = vld [vmem:[#allocation15_spill] sm:$0xff]  ;;  %v785_v31 = vmul.f32 %v4824_v8, %v4826_v30  ;;  %v4829_v27 = vld [vmem:[#allocation24_spill] sm:$0xff] }
  0xa2   : > { %4812 = vst [vmem:[#allocation7_spill] sm:$0xff] %v3299_v56  ;;  %4814 = vst [vmem:[#allocation9_spill] sm:$0xff] %v3302_v9  ;;  %v784_v22 = vmul.f32 %v4824_v8, %v4825_v60  ;;  %v786_v41 = vmul.f32 %v4824_v8, %v4827_v62  ;;  %v4828_v45 = vld [vmem:[#allocation19_spill] sm:$0xff]  ;;  %v788_v7 = vmul.f32 %v4824_v8, %v4829_v27  ;;  %v4830_v42 = vld [vmem:[#allocation25_spill] sm:$0xff] }
  0xa3   : > { %4816 = vst [vmem:[#allocation14_spill] sm:$0xff] %v3305_v15  ;;  %4818 = vst [vmem:[#allocation20_spill] sm:$0xff] %v3308_v21  ;;  %v787_v50 = vmul.f32 %v4824_v8, %v4828_v45  ;;  %v789_v37 = vmul.f32 %v4824_v8, %v4830_v42  ;;  %v4831_v19 = vld [vmem:[#allocation26_spill] sm:$0xff]  ;;  %v791_v51 = vmul.f32 %v4824_v8, %v4832_v25  ;;  %v4835_v13 = vld [vmem:[#allocation31_spill] sm:$0xff] }
  0xa4   : > { %4820 = vst [vmem:[#allocation21_spill] sm:$0xff] %v3311_v29  ;;  %4822 = vst [vmem:[#allocation22_spill] sm:$0xff] %v3314_v2  ;;  %v790_v24 = vmul.f32 %v4824_v8, %v4831_v19  ;;  %v792_v57 = vmul.f32 %v4824_v8, %v4833_v54  ;;  %v4834_v59 = vld [vmem:[#allocation30_spill] sm:$0xff]  ;;  %v794_v1 = vmul.f32 %v4824_v8, %v4835_v13  ;;  %v4837_v17 = vld [vmem:[#allocation35_spill] sm:$0xff] }
  0xa5   : > { %v793_v23 = vmul.f32 %v4824_v8, %v4834_v59  ;;  %v795_v52 = vmul.f32 %v4824_v8, %v4836_v0  ;;  %v796_v18 = vmul.f32 %v4824_v8, %v4837_v17  ;;  %v4838_v43 = vld [vmem:[#allocation36_spill] sm:$0xff]  ;;  %v4839_v58 = vld [vmem:[#allocation37_spill] sm:$0xff]  ;;  %v4841_v19 = vld [vmem:[#allocation42_spill] sm:$0xff]  ;;  %v3385_v26 = vadd.f32 %v783_v16, %v3221_v4 }
  0xa6   : > { %v797_v3 = vmul.f32 %v4824_v8, %v4838_v43  ;;  %v798_v60 = vmul.f32 %v4824_v8, %v4839_v58  ;;  %v4840_v25 = vld [vmem:[#allocation41_spill] sm:$0xff]  ;;  %v800_v59 = vmul.f32 %v4824_v8, %v4841_v19  ;;  %v4842_v42 = vld [vmem:[#allocation43_spill] sm:$0xff]  ;;  %v4844_v45 = vld [vmem:[#allocation48_spill] sm:$0xff]  ;;  %v3406_v4 = vadd.f32 %v790_v24, %v3242_v44 }
  0xa7   : > { %v799_v54 = vmul.f32 %v4824_v8, %v4840_v25  ;;  %v801_v13 = vmul.f32 %v4824_v8, %v4842_v42  ;;  %v4843_v27 = vld [vmem:[#allocation47_spill] sm:$0xff]  ;;  %v803_v17 = vmul.f32 %v4824_v8, %v4844_v45  ;;  %v4845_v62 = vld [vmem:[#allocation49_spill] sm:$0xff]  ;;  %v4848_v25 = vld [vmem:[#allocation34_spill] sm:$0xff] }
  0xa8   : > { %v802_v0 = vmul.f32 %v4824_v8, %v4843_v27  ;;  %v804_v43 = vmul.f32 %v4824_v8, %v4845_v62  ;;  %v4846_v30 = vld [vmem:[#allocation33_spill] sm:$0xff]  ;;  %v806_v19 = vmul.f32 %v4824_v8, %v4848_v25  ;;  %v4849_v29 = vld [vmem:[#allocation38_spill] sm:$0xff]  ;;  %v4850_v21 = vld [vmem:[#allocation39_spill] sm:$0xff]  ;;  %v812_v25 = vmul.f32 %v4824_v8, %v3208_v47 }
  0xa9   : > { %v805_v58 = vmul.f32 %v4824_v8, %v4846_v30  ;;  %v3362_v2 = vld [vmem:[#allocation2 + $0x181] sm:$0xff]  ;;  %v807_v42 = vmul.f32 %v4824_v8, %v4849_v29  ;;  %v808_v27 = vmul.f32 %v4824_v8, %v4850_v21  ;;  %v3372_v9 = vld [vmem:[#allocation2 + $0x189] sm:$0xff]  ;;  %v3397_v47 = vadd.f32 %v787_v50, %v3233_v20 }
  0xaa   : > { %4847 = vst [vmem:[#allocation23_spill] sm:$0xff] %v3362_v2  ;;  %v4851_v15 = vld [vmem:[#allocation40_spill] sm:$0xff]  ;;  %v4853_v30 = vld [vmem:[#allocation45_spill] sm:$0xff]  ;;  %v813_v29 = vmul.f32 %v4824_v8, %v3362_v2  ;;  %v814_v21 = vmul.f32 %v4824_v8, %v3372_v9  ;;  %v3400_v2 = vadd.f32 %v788_v7, %v3236_v38  ;;  %v3418_v20 = vadd.f32 %v794_v1, %v3254_v32 }
  0xab   : > { %v809_v45 = vmul.f32 %v4824_v8, %v4851_v15  ;;  %v4852_v62 = vld [vmem:[#allocation44_spill] sm:$0xff]  ;;  %v811_v39 = vmul.f32 %v4824_v8, %v4853_v30  ;;  %v3388_v15 = vadd.f32 %v784_v22, %v3224_v14  ;;  %v3394_v30 = vadd.f32 %v786_v41, %v3230_v28 }
  0xac   : > { %v810_v56 = vmul.f32 %v4824_v8, %v4852_v62  ;;  %v3391_v62 = vadd.f32 %v785_v31, %v3227_v36  ;;  %v3403_v8 = vadd.f32 %v789_v37, %v3239_v55  ;;  %v3409_v14 = vadd.f32 %v791_v51, %v3245_v53  ;;  %v4872_v24 = vld [vmem:[#allocation12_spill] sm:$0xff] }
  0xad   : > { %v3412_v36 = vadd.f32 %v792_v57, %v3248_v34  ;;  %v3415_v28 = vadd.f32 %v793_v23, %v3251_v33  ;;  %v3421_v38 = vadd.f32 %v795_v52, %v3257_v35  ;;  %v3424_v55 = vadd.f32 %v796_v18, %v3260_v40 }
  0xae   : > { %v3427_v44 = vadd.f32 %v797_v3, %v3263_v46  ;;  %v3430_v53 = vadd.f32 %v798_v60, %v3266_v63  ;;  %v3433_v34 = vadd.f32 %v799_v54, %v3269_v48  ;;  %v3436_v33 = vadd.f32 %v800_v59, %v3272_v6  ;;  %v4855_v6 = vld [vmem:[#allocation50_spill] sm:$0xff] }
  0xaf   : > { %v3439_v32 = vadd.f32 %v801_v13, %v3275_v5  ;;  %v3442_v35 = vadd.f32 %v802_v0, %v3278_v49  ;;  %v3445_v40 = vadd.f32 %v803_v17, %v3281_v61  ;;  %v3448_v46 = vadd.f32 %v804_v43, %v3284_v10  ;;  %v4857_v5 = vld [vmem:[#allocation10_spill] sm:$0xff]  ;;  %v4859_v49 = vld [vmem:[#allocation7_spill] sm:$0xff]  ;;  %v4861_v61 = vld [vmem:[#allocation9_spill] sm:$0xff] }
  0xb0   : > { %v3451_v63 = vadd.f32 %v805_v58, %v3287_v11  ;;  %v3454_v48 = vadd.f32 %v806_v19, %v3290_v12  ;;  %v3457_v16 = vadd.f32 %v807_v42, %v4855_v6  ;;  %v3460_v22 = vadd.f32 %v808_v27, %v4857_v5  ;;  %v4863_v10 = vld [vmem:[#allocation14_spill] sm:$0xff]  ;;  %v4865_v11 = vld [vmem:[#allocation20_spill] sm:$0xff]  ;;  %v4867_v12 = vld [vmem:[#allocation21_spill] sm:$0xff] }
  0xb1   : > { %v3463_v31 = vadd.f32 %v809_v45, %v4859_v49  ;;  %v3466_v41 = vadd.f32 %v810_v56, %v4861_v61  ;;  %v3469_v50 = vadd.f32 %v811_v39, %v4863_v10  ;;  %v3472_v7 = vadd.f32 %v812_v25, %v4865_v11  ;;  %v4869_v42 = vld [vmem:[#allocation22_spill] sm:$0xff]  ;;  %v4871_v27 = vld [vmem:[#allocation16_spill] sm:$0xff]  ;;  %v4874_v56 = vld [vmem:[#allocation19_spill] sm:$0xff] }
  0xb2   : > { %4854 = vst [vmem:[#allocation27_spill] sm:$0xff] %v3454_v48  ;;  %4856 = vst [vmem:[#allocation8_spill] sm:$0xff] %v3457_v16  ;;  %v3475_v37 = vadd.f32 %v813_v29, %v4867_v12  ;;  %v3478_v19 = vadd.f32 %v814_v21, %v4869_v42  ;;  %v851_v51 = vmul.f32 %v4872_v24, %v4871_v27  ;;  %v4873_v45 = vld [vmem:[#allocation18_spill] sm:$0xff]  ;;  %v4875_v39 = vld [vmem:[#allocation24_spill] sm:$0xff] }
  0xb3   : > { %4858 = vst [vmem:[#allocation11_spill] sm:$0xff] %v3460_v22  ;;  %4860 = vst [vmem:[#allocation15_spill] sm:$0xff] %v3463_v31  ;;  %v852_v54 = vmul.f32 %v4872_v24, %v4873_v45  ;;  %v853_v57 = vmul.f32 %v4872_v24, %v4874_v56  ;;  %v854_v59 = vmul.f32 %v4872_v24, %v4875_v39  ;;  %v4876_v25 = vld [vmem:[#allocation25_spill] sm:$0xff]  ;;  %v4877_v29 = vld [vmem:[#allocation26_spill] sm:$0xff] }
  0xb4   : > { %4862 = vst [vmem:[#allocation50_spill] sm:$0xff] %v3466_v41  ;;  %4864 = vst [vmem:[#allocation10_spill] sm:$0xff] %v3469_v50  ;;  %v855_v23 = vmul.f32 %v4872_v24, %v4876_v25  ;;  %v856_v13 = vmul.f32 %v4872_v24, %v4877_v29  ;;  %v4878_v21 = vld [vmem:[#allocation28_spill] sm:$0xff]  ;;  %v4879_v0 = vld [vmem:[#allocation29_spill] sm:$0xff] }
  0xb5   : > { %4866 = vst [vmem:[#allocation7_spill] sm:$0xff] %v3472_v7  ;;  %4868 = vst [vmem:[#allocation9_spill] sm:$0xff] %v3475_v37  ;;  %v857_v1 = vmul.f32 %v4872_v24, %v4878_v21  ;;  %v858_v52 = vmul.f32 %v4872_v24, %v4879_v0  ;;  %v4880_v17 = vld [vmem:[#allocation30_spill] sm:$0xff]  ;;  %v4881_v43 = vld [vmem:[#allocation31_spill] sm:$0xff] }
  0xb6   : > { %4870 = vst [vmem:[#allocation14_spill] sm:$0xff] %v3478_v19  ;;  %v859_v18 = vmul.f32 %v4872_v24, %v4880_v17  ;;  %v860_v3 = vmul.f32 %v4872_v24, %v4881_v43  ;;  %v4882_v58 = vld [vmem:[#allocation32_spill] sm:$0xff]  ;;  %v4883_v6 = vld [vmem:[#allocation35_spill] sm:$0xff]  ;;  %v4885_v10 = vld [vmem:[#allocation37_spill] sm:$0xff] }
  0xb7   : > { %v861_v60 = vmul.f32 %v4872_v24, %v4882_v58  ;;  %v862_v5 = vmul.f32 %v4872_v24, %v4883_v6  ;;  %v4884_v49 = vld [vmem:[#allocation36_spill] sm:$0xff]  ;;  %v864_v11 = vmul.f32 %v4872_v24, %v4885_v10  ;;  %v4886_v12 = vld [vmem:[#allocation41_spill] sm:$0xff]  ;;  %v4887_v45 = vld [vmem:[#allocation42_spill] sm:$0xff] }
  0xb8   : > { %v863_v61 = vmul.f32 %v4872_v24, %v4884_v49  ;;  %v865_v42 = vmul.f32 %v4872_v24, %v4886_v12  ;;  %v709_v27 = vld [vmem:[#allocation2 + $0x199] sm:$0xff]  ;;  %v866_v56 = vmul.f32 %v4872_v24, %v4887_v45  ;;  %v710_v43 = vld [vmem:[#allocation2 + $0x1a1] sm:$0xff]  ;;  %v4893_v12 = vld [vmem:[#allocation34_spill] sm:$0xff] }
  0xb9   : > { %v4888_v39 = vld [vmem:[#allocation43_spill] sm:$0xff]  ;;  %v4890_v0 = vld [vmem:[#allocation48_spill] sm:$0xff]  ;;  %v4891_v58 = vld [vmem:[#allocation49_spill] sm:$0xff]  ;;  %v872_v19 = vmul.f32 %v4872_v24, %v4893_v12  ;;  %v882_v48 = vmul.f32 %v4872_v24, %v710_v43 }
  0xba   : > { %v867_v25 = vmul.f32 %v4872_v24, %v4888_v39  ;;  %v4889_v29 = vld [vmem:[#allocation47_spill] sm:$0xff]  ;;  %v869_v17 = vmul.f32 %v4872_v24, %v4890_v0  ;;  %v870_v6 = vmul.f32 %v4872_v24, %v4891_v58  ;;  %v4892_v49 = vld [vmem:[#allocation33_spill] sm:$0xff]  ;;  %v4894_v45 = vld [vmem:[#allocation38_spill] sm:$0xff] }
  0xbb   : > { %v868_v21 = vmul.f32 %v4872_v24, %v4889_v29  ;;  %v871_v10 = vmul.f32 %v4872_v24, %v4892_v49  ;;  %v873_v37 = vmul.f32 %v4872_v24, %v4894_v45  ;;  %v4895_v39 = vld [vmem:[#allocation39_spill] sm:$0xff]  ;;  %v4896_v29 = vld [vmem:[#allocation40_spill] sm:$0xff]  ;;  %v4898_v31 = vld [vmem:[#allocation45_spill] sm:$0xff]  ;;  %v880_v45 = vmul.f32 %v4872_v24, %v3372_v9 }
  0xbc   : > { %v874_v7 = vmul.f32 %v4872_v24, %v4895_v39  ;;  %v875_v50 = vmul.f32 %v4872_v24, %v4896_v29  ;;  %v4897_v0 = vld [vmem:[#allocation44_spill] sm:$0xff]  ;;  %v877_v58 = vmul.f32 %v4872_v24, %v4898_v31  ;;  %v4899_v22 = vld [vmem:[#allocation46_spill] sm:$0xff]  ;;  %v4900_v16 = vld [vmem:[#allocation23_spill] sm:$0xff]  ;;  %v881_v39 = vmul.f32 %v4872_v24, %v709_v27 }
  0xbd   : > { %v876_v41 = vmul.f32 %v4872_v24, %v4897_v0  ;;  %v878_v49 = vmul.f32 %v4872_v24, %v4899_v22  ;;  %v879_v12 = vmul.f32 %v4872_v24, %v4900_v16  ;;  %v3543_v29 = vadd.f32 %v851_v51, %v3385_v26  ;;  %v916_v51 = vld [vmem:[#allocation2 + $0xa] sm:$0xff] }
  0xbe   : > { %v3546_v0 = vadd.f32 %v852_v54, %v3388_v15  ;;  %v3549_v31 = vadd.f32 %v853_v57, %v3391_v62  ;;  %v3552_v22 = vadd.f32 %v854_v59, %v3394_v30  ;;  %v3555_v16 = vadd.f32 %v855_v23, %v3397_v47  ;;  %v3611_v54 = vld [vmem:[#allocation2 + $0x1a] sm:$0xff] }
  0xbf   : > { %v3558_v9 = vadd.f32 %v856_v13, %v3400_v2  ;;  %v3561_v24 = vadd.f32 %v857_v1, %v3403_v8  ;;  %v3564_v26 = vadd.f32 %v858_v52, %v3406_v4  ;;  %v3567_v15 = vadd.f32 %v859_v18, %v3409_v14  ;;  %v4916_v1 = vld [vmem:[#allocation50_spill] sm:$0xff]  ;;  %v4920_v18 = vld [vmem:[#allocation7_spill] sm:$0xff] }
  0xc0   : > { %v3570_v62 = vadd.f32 %v860_v3, %v3412_v36  ;;  %v3573_v30 = vadd.f32 %v861_v60, %v3415_v28  ;;  %v3576_v47 = vadd.f32 %v862_v5, %v3418_v20  ;;  %v3579_v2 = vadd.f32 %v863_v61, %v3421_v38  ;;  %v4918_v52 = vld [vmem:[#allocation10_spill] sm:$0xff]  ;;  %v4922_v3 = vld [vmem:[#allocation9_spill] sm:$0xff] }
  0xc1   : > { %v3582_v8 = vadd.f32 %v864_v11, %v3424_v55  ;;  %v3585_v4 = vadd.f32 %v865_v42, %v3427_v44  ;;  %v3588_v14 = vadd.f32 %v866_v56, %v3430_v53  ;;  %v3591_v36 = vadd.f32 %v867_v25, %v3433_v34  ;;  %v915_v34 = vld [vmem:[#allocation2 + $0x2] sm:$0xff]  ;;  %v3645_v5 = vld [vmem:[#allocation2 + $0x52] sm:$0xff]  ;;  %v3649_v11 = vld [vmem:[#allocation2 + $0x6a] sm:$0xff] }
  0xc2   : > { %v3594_v28 = vadd.f32 %v868_v21, %v3436_v33  ;;  %v3597_v20 = vadd.f32 %v869_v17, %v3439_v32  ;;  %v3600_v38 = vadd.f32 %v870_v6, %v3442_v35  ;;  %v3603_v55 = vadd.f32 %v871_v10, %v3445_v40  ;;  %v4906_v33 = vld [vmem:[#allocation27_spill] sm:$0xff]  ;;  %v4908_v32 = vld [vmem:[#allocation8_spill] sm:$0xff]  ;;  %4924 = vst [vmem:[#allocation35_spill] sm:$0xff] %v3645_v5  ;;  %v4927_v42 = vld [vmem:[#allocation14_spill] sm:$0xff] }
  0xc3   : > { %v3606_v44 = vadd.f32 %v872_v19, %v3448_v46  ;;  %v3609_v53 = vadd.f32 %v873_v37, %v3451_v63  ;;  %v3614_v57 = vadd.f32 %v874_v7, %v4906_v33  ;;  %v3617_v59 = vadd.f32 %v875_v50, %v4908_v32  ;;  %v4910_v35 = vld [vmem:[#allocation11_spill] sm:$0xff]  ;;  %v3625_v46 = vld [vmem:[#allocation2 + $0x22] sm:$0xff]  ;;  %v3631_v19 = vld [vmem:[#allocation2 + $0x4a] sm:$0xff]  ;;  %4926 = vst [vmem:[#allocation37_spill] sm:$0xff] %v3649_v11 }
  0xc4   : > { %4901 = vst [vmem:[#allocation20_spill] sm:$0xff] %v3597_v20  ;;  %4902 = vst [vmem:[#allocation21_spill] sm:$0xff] %v3600_v38  ;;  %v3620_v23 = vadd.f32 %v876_v41, %v4910_v35  ;;  %v4912_v40 = vld [vmem:[#allocation15_spill] sm:$0xff]  ;;  %v3634_v7 = vadd.f32 %v878_v49, %v4916_v1  ;;  %v3637_v50 = vadd.f32 %v879_v12, %v4918_v52  ;;  %v3647_v61 = vld [vmem:[#allocation2 + $0x62] sm:$0xff] }
  0xc5   : > { %4903 = vst [vmem:[#allocation22_spill] sm:$0xff] %v3603_v55  ;;  %4904 = vst [vmem:[#allocation16_spill] sm:$0xff] %v3606_v44  ;;  %v3623_v13 = vadd.f32 %v877_v58, %v4912_v40  ;;  %v3627_v63 = vld [vmem:[#allocation2 + $0x32] sm:$0xff]  ;;  %v3629_v37 = vld [vmem:[#allocation2 + $0x3a] sm:$0xff]  ;;  %v3640_v41 = vadd.f32 %v880_v45, %v4920_v18  ;;  %v3643_v60 = vadd.f32 %v881_v39, %v4922_v3 }
  0xc6   : > { %4905 = vst [vmem:[#allocation12_spill] sm:$0xff] %v3609_v53  ;;  %4907 = vst [vmem:[#allocation18_spill] sm:$0xff] %v3614_v57  ;;  %v3652_v27 = vadd.f32 %v882_v48, %v4927_v42  ;;  %v3654_v56 = vld [vmem:[#allocation2 + $0x7a] sm:$0xff]  ;;  %v3656_v25 = vld [vmem:[#allocation2 + $0x82] sm:$0xff] }
  0xc7   : > { %4909 = vst [vmem:[#allocation19_spill] sm:$0xff] %v3617_v59  ;;  %4911 = vst [vmem:[#allocation24_spill] sm:$0xff] %v3620_v23  ;;  %v3658_v21 = vld [vmem:[#allocation2 + $0x92] sm:$0xff]  ;;  %v4932_v17 = vld [vmem:[#allocation13_spill] sm:$0xff] }
  0xc8   : > { %4913 = vst [vmem:[#allocation25_spill] sm:$0xff] %v3623_v13  ;;  %4914 = vst [vmem:[#allocation26_spill] sm:$0xff] %v3629_v37  ;;  %v955_v43 = vmul.f32 %v4932_v17, %v915_v34  ;;  %v956_v6 = vmul.f32 %v4932_v17, %v916_v51  ;;  %v957_v10 = vmul.f32 %v4932_v17, %v3611_v54  ;;  %v3664_v58 = vld [vmem:[#allocation2 + $0x9a] sm:$0xff]  ;;  %v3666_v49 = vld [vmem:[#allocation2 + $0xaa] sm:$0xff] }
  0xc9   : > { %4915 = vst [vmem:[#allocation28_spill] sm:$0xff] %v3631_v19  ;;  %4917 = vst [vmem:[#allocation29_spill] sm:$0xff] %v3634_v7  ;;  %v3668_v12 = vld [vmem:[#allocation2 + $0xb2] sm:$0xff]  ;;  %v958_v48 = vmul.f32 %v4932_v17, %v3625_v46  ;;  %v959_v45 = vmul.f32 %v4932_v17, %v3627_v63  ;;  %v960_v39 = vmul.f32 %v4932_v17, %v3629_v37  ;;  %v3678_v51 = vld [vmem:[#allocation2 + $0xc2] sm:$0xff] }
  0xca   : > { %4919 = vst [vmem:[#allocation30_spill] sm:$0xff] %v3637_v50  ;;  %4921 = vst [vmem:[#allocation31_spill] sm:$0xff] %v3640_v41  ;;  %v961_v34 = vmul.f32 %v4932_v17, %v3631_v19  ;;  %v3680_v33 = vld [vmem:[#allocation2 + $0xca] sm:$0xff]  ;;  %v3682_v32 = vld [vmem:[#allocation2 + $0xda] sm:$0xff]  ;;  %v962_v35 = vmul.f32 %v4932_v17, %v3645_v5  ;;  %v963_v40 = vmul.f32 %v4932_v17, %v3647_v61 }
  0xcb   : > { %4923 = vst [vmem:[#allocation32_spill] sm:$0xff] %v3643_v60  ;;  %4925 = vst [vmem:[#allocation36_spill] sm:$0xff] %v3647_v61  ;;  %v964_v1 = vmul.f32 %v4932_v17, %v3649_v11  ;;  %v965_v52 = vmul.f32 %v4932_v17, %v3654_v56  ;;  %v3692_v18 = vld [vmem:[#allocation2 + $0xe2] sm:$0xff]  ;;  %v3694_v3 = vld [vmem:[#allocation2 + $0xf2] sm:$0xff]  ;;  %v967_v60 = vmul.f32 %v4932_v17, %v3658_v21 }
  0xcc   : > { %4928 = vst [vmem:[#allocation41_spill] sm:$0xff] %v3652_v27  ;;  %4929 = vst [vmem:[#allocation42_spill] sm:$0xff] %v3654_v56  ;;  %v3696_v42 = vld [vmem:[#allocation2 + $0xfa] sm:$0xff]  ;;  %v966_v27 = vmul.f32 %v4932_v17, %v3656_v25  ;;  %v968_v61 = vmul.f32 %v4932_v17, %v3664_v58  ;;  %v969_v11 = vmul.f32 %v4932_v17, %v3666_v49  ;;  %v3706_v41 = vld [vmem:[#allocation2 + $0x10a] sm:$0xff] }
  0xcd   : > { %4930 = vst [vmem:[#allocation43_spill] sm:$0xff] %v3656_v25  ;;  %4931 = vst [vmem:[#allocation47_spill] sm:$0xff] %v3658_v21  ;;  %v3708_v56 = vld [vmem:[#allocation2 + $0x112] sm:$0xff]  ;;  %v3710_v5 = vld [vmem:[#allocation2 + $0x122] sm:$0xff]  ;;  %v970_v50 = vmul.f32 %v4932_v17, %v3668_v12  ;;  %v971_v25 = vmul.f32 %v4932_v17, %v3678_v51  ;;  %v972_v21 = vmul.f32 %v4932_v17, %v3680_v33 }
  0xce   : > { %4933 = vst [vmem:[#allocation48_spill] sm:$0xff] %v3664_v58  ;;  %4934 = vst [vmem:[#allocation49_spill] sm:$0xff] %v3666_v49  ;;  %v973_v58 = vmul.f32 %v4932_v17, %v3682_v32  ;;  %v3720_v7 = vld [vmem:[#allocation2 + $0x12a] sm:$0xff]  ;;  %v3722_v49 = vld [vmem:[#allocation2 + $0x13a] sm:$0xff]  ;;  %v974_v23 = vmul.f32 %v4932_v17, %v3692_v18  ;;  %v978_v57 = vmul.f32 %v4932_v17, %v3708_v56 }
  0xcf   : > { %4935 = vst [vmem:[#allocation33_spill] sm:$0xff] %v3668_v12  ;;  %4936 = vst [vmem:[#allocation34_spill] sm:$0xff] %v3678_v51  ;;  %v3724_v13 = vld [vmem:[#allocation2 + $0x142] sm:$0xff]  ;;  %v975_v12 = vmul.f32 %v4932_v17, %v3694_v3  ;;  %v976_v51 = vmul.f32 %v4932_v17, %v3696_v42  ;;  %v3734_v59 = vld [vmem:[#allocation2 + $0x152] sm:$0xff]  ;;  %v987_v44 = vadd.f32 %v955_v43, %v3543_v29 }
  0xd0   : > { %4937 = vst [vmem:[#allocation38_spill] sm:$0xff] %v3680_v33  ;;  %4938 = vst [vmem:[#allocation39_spill] sm:$0xff] %v3682_v32  ;;  %v977_v33 = vmul.f32 %v4932_v17, %v3706_v41  ;;  %v3736_v32 = vld [vmem:[#allocation2 + $0x15a] sm:$0xff]  ;;  %v3738_v19 = vld [vmem:[#allocation2 + $0x16a] sm:$0xff]  ;;  %v983_v53 = vmul.f32 %v4932_v17, %v3734_v59  ;;  %v989_v55 = vadd.f32 %v957_v10, %v3549_v31 }
  0xd1   : > { %4939 = vst [vmem:[#allocation40_spill] sm:$0xff] %v3692_v18  ;;  %4940 = vst [vmem:[#allocation44_spill] sm:$0xff] %v3694_v3  ;;  %v979_v18 = vmul.f32 %v4932_v17, %v3710_v5  ;;  %v980_v3 = vmul.f32 %v4932_v17, %v3720_v7  ;;  %v3748_v37 = vld [vmem:[#allocation2 + $0x172] sm:$0xff]  ;;  %v991_v38 = vadd.f32 %v959_v45, %v3555_v16  ;;  %v4952_v16 = vld [vmem:[#allocation17_spill] sm:$0xff] }
  0xd2   : > { %4941 = vst [vmem:[#allocation45_spill] sm:$0xff] %v3696_v42  ;;  %4942 = vst [vmem:[#allocation46_spill] sm:$0xff] %v3706_v41  ;;  %v981_v42 = vmul.f32 %v4932_v17, %v3722_v49  ;;  %v982_v41 = vmul.f32 %v4932_v17, %v3724_v13  ;;  %v3768_v20 = vadd.f32 %v962_v35, %v3564_v26  ;;  %v4962_v43 = vld [vmem:[#allocation28_spill] sm:$0xff] }
  0xd3   : > { %4943 = vst [vmem:[#allocation23_spill] sm:$0xff] %v3708_v56  ;;  %4944 = vst [vmem:[#allocation27_spill] sm:$0xff] %v3710_v5  ;;  %v984_v56 = vmul.f32 %v4932_v17, %v3736_v32  ;;  %v985_v5 = vmul.f32 %v4932_v17, %v3738_v19  ;;  %v3774_v29 = vadd.f32 %v964_v1, %v3570_v62 }
  0xd4   : > { %4945 = vst [vmem:[#allocation8_spill] sm:$0xff] %v3720_v7  ;;  %4946 = vst [vmem:[#allocation11_spill] sm:$0xff] %v3722_v49  ;;  %v986_v7 = vmul.f32 %v4932_v17, %v3748_v37  ;;  %v988_v49 = vadd.f32 %v956_v6, %v3546_v0  ;;  %v3777_v0 = vadd.f32 %v965_v52, %v3573_v30 }
  0xd5   : > { %4947 = vst [vmem:[#allocation15_spill] sm:$0xff] %v3724_v13  ;;  %4948 = vst [vmem:[#allocation50_spill] sm:$0xff] %v3734_v59  ;;  %v990_v13 = vadd.f32 %v958_v48, %v3552_v22  ;;  %v992_v59 = vadd.f32 %v960_v39, %v3558_v9  ;;  %v3780_v31 = vadd.f32 %v966_v27, %v3576_v47  ;;  %v3803_v47 = vld [vmem:[%s4503_s1 + $0x8] ss:$0 sm:$0xff]  ;;  %v4957_v27 = vld [vmem:[#allocation12_spill] sm:$0xff] }
  0xd6   : > { %4949 = vst [vmem:[#allocation10_spill] sm:$0xff] %v3736_v32  ;;  %4950 = vst [vmem:[#allocation7_spill] sm:$0xff] %v3738_v19  ;;  %v993_v32 = vadd.f32 %v961_v34, %v3561_v24  ;;  %v3771_v19 = vadd.f32 %v963_v40, %v3567_v15  ;;  %v3783_v22 = vadd.f32 %v967_v60, %v3579_v2  ;;  %v4963_v39 = vld [vmem:[#allocation19_spill] sm:$0xff] }
  0xd7   : > { %4951 = vst [vmem:[#allocation9_spill] sm:$0xff] %v3748_v37  ;;  %v1023_v9 = vmul.f32 %v4952_v16, %v3611_v54  ;;  %v1024_v24 = vmul.f32 %v4952_v16, %v3625_v46  ;;  %v3790_v26 = vadd.f32 %v968_v61, %v3582_v8  ;;  %v3793_v15 = vadd.f32 %v969_v11, %v3585_v4  ;;  %v4953_v54 = vld [vmem:[#allocation20_spill] sm:$0xff]  ;;  %v4954_v46 = vld [vmem:[#allocation21_spill] sm:$0xff]  ;;  %v4973_v40 = vld [vmem:[#allocation35_spill] sm:$0xff] }
  0xd8   : > { %v3796_v62 = vadd.f32 %v970_v50, %v3588_v14  ;;  %v1025_v30 = vmul.f32 %v4952_v16, %v3627_v63  ;;  %v3806_v2 = vadd.f32 %v971_v25, %v3591_v36  ;;  %v3809_v8 = vadd.f32 %v972_v21, %v3594_v28  ;;  %v4955_v50 = vld [vmem:[#allocation22_spill] sm:$0xff]  ;;  %v4956_v61 = vld [vmem:[#allocation16_spill] sm:$0xff] }
  0xd9   : > { %v3812_v4 = vadd.f32 %v973_v58, %v4953_v54  ;;  %v3815_v14 = vadd.f32 %v974_v23, %v4954_v46  ;;  %v3818_v60 = vadd.f32 %v975_v12, %v4955_v50  ;;  %v3821_v11 = vadd.f32 %v976_v51, %v4956_v61  ;;  %v4959_v36 = vld [vmem:[#allocation26_spill] sm:$0xff]  ;;  %v4979_v61 = vld [vmem:[#allocation41_spill] sm:$0xff] }
  0xda   : > { %v3824_v17 = vadd.f32 %v977_v33, %v4957_v27  ;;  %v1026_v25 = vmul.f32 %v4952_v16, %v4959_v36  ;;  %v4960_v28 = vld [vmem:[#allocation18_spill] sm:$0xff]  ;;  %v1027_v6 = vmul.f32 %v4952_v16, %v4962_v43  ;;  %v1055_v23 = vadd.f32 %v1023_v9, %v987_v44  ;;  %v4967_v33 = vld [vmem:[#allocation25_spill] sm:$0xff]  ;;  %v4974_v9 = vld [vmem:[#allocation31_spill] sm:$0xff] }
  0xdb   : > { %v3829_v21 = vadd.f32 %v978_v57, %v4960_v28  ;;  %v1056_v10 = vadd.f32 %v1024_v24, %v988_v49  ;;  %v1057_v58 = vadd.f32 %v1025_v30, %v989_v55  ;;  %v1091_v12 = vmul.f32 %v3803_v47, %v3627_v63  ;;  %v4965_v57 = vld [vmem:[#allocation24_spill] sm:$0xff]  ;;  %v4969_v44 = vld [vmem:[#allocation29_spill] sm:$0xff]  ;;  %v4971_v49 = vld [vmem:[#allocation30_spill] sm:$0xff] }
  0xdc   : > { %4958 = vst [vmem:[#allocation14_spill] sm:$0xff] %v3824_v17  ;;  %v1092_v48 = vmul.f32 %v3803_v47, %v4959_v36  ;;  %v1093_v45 = vmul.f32 %v3803_v47, %v4962_v43  ;;  %v3840_v34 = vadd.f32 %v979_v18, %v4963_v39  ;;  %v3843_v51 = vadd.f32 %v980_v3, %v4965_v57  ;;  %v4976_v3 = vld [vmem:[#allocation32_spill] sm:$0xff]  ;;  %v4982_v36 = vld [vmem:[#allocation42_spill] sm:$0xff]  ;;  %v4983_v28 = vld [vmem:[#allocation43_spill] sm:$0xff] }
  0xdd   : > { %4961 = vst [vmem:[#allocation13_spill] sm:$0xff] %v3829_v21  ;;  %v3846_v35 = vadd.f32 %v981_v42, %v4967_v33  ;;  %v3849_v55 = vadd.f32 %v982_v41, %v4969_v44  ;;  %v3852_v63 = vadd.f32 %v983_v53, %v4971_v49  ;;  %v1028_v1 = vmul.f32 %v4952_v16, %v4973_v40  ;;  %v4978_v42 = vld [vmem:[#allocation36_spill] sm:$0xff]  ;;  %v4984_v43 = vld [vmem:[#allocation47_spill] sm:$0xff] }
  0xde   : > { %4964 = vst [vmem:[#allocation17_spill] sm:$0xff] %v3840_v34  ;;  %4966 = vst [vmem:[#allocation20_spill] sm:$0xff] %v3843_v51  ;;  %v1058_v52 = vadd.f32 %v1026_v25, %v990_v13  ;;  %v1094_v18 = vmul.f32 %v3803_v47, %v4973_v40  ;;  %v3859_v24 = vadd.f32 %v984_v56, %v4974_v9  ;;  %v4981_v56 = vld [vmem:[#allocation37_spill] sm:$0xff]  ;;  %v4998_v34 = vld [vmem:[#allocation8_spill] sm:$0xff] }
  0xdf   : > { %4968 = vst [vmem:[#allocation21_spill] sm:$0xff] %v3846_v35  ;;  %4970 = vst [vmem:[#allocation22_spill] sm:$0xff] %v3849_v55  ;;  %v3862_v30 = vadd.f32 %v985_v5, %v4976_v3  ;;  %v1029_v41 = vmul.f32 %v4952_v16, %v4978_v42  ;;  %v1059_v54 = vadd.f32 %v1027_v6, %v991_v38  ;;  %v4987_v40 = vld [vmem:[#allocation33_spill] sm:$0xff]  ;;  %v4995_v35 = vld [vmem:[#allocation23_spill] sm:$0xff] }
  0xe0   : > { %4972 = vst [vmem:[#allocation16_spill] sm:$0xff] %v3852_v63  ;;  %4975 = vst [vmem:[#allocation12_spill] sm:$0xff] %v3859_v24  ;;  %v1095_v53 = vmul.f32 %v3803_v47, %v4978_v42  ;;  %v3868_v46 = vadd.f32 %v1091_v12, %v1055_v23  ;;  %v3870_v50 = vadd.f32 %v1092_v48, %v1056_v10  ;;  %v4986_v48 = vld [vmem:[#allocation49_spill] sm:$0xff]  ;;  %v4994_v63 = vld [vmem:[#allocation46_spill] sm:$0xff] }
  0xe1   : > { %4977 = vst [vmem:[#allocation26_spill] sm:$0xff] %v3862_v30  ;;  %v3872_v13 = vadd.f32 %v1093_v45, %v1057_v58  ;;  %v3875_v27 = vadd.f32 %v986_v7, %v4979_v61  ;;  %v1030_v5 = vmul.f32 %v4952_v16, %v4981_v56  ;;  %v1031_v25 = vmul.f32 %v4952_v16, %v4982_v36  ;;  %v4985_v7 = vld [vmem:[#allocation48_spill] sm:$0xff]  ;;  %v4990_v61 = vld [vmem:[#allocation39_spill] sm:$0xff] }
  0xe2   : > { %v1032_v38 = vmul.f32 %v4952_v16, %v4983_v28  ;;  %v1033_v6 = vmul.f32 %v4952_v16, %v4984_v43  ;;  %v1060_v23 = vadd.f32 %v1028_v1, %v992_v59  ;;  %v1096_v10 = vmul.f32 %v3803_v47, %v4981_v56  ;;  %v4992_v30 = vld [vmem:[#allocation44_spill] sm:$0xff]  ;;  %v5000_v17 = vld [vmem:[#allocation11_spill] sm:$0xff] }
  0xe3   : > { %4980 = vst [vmem:[#allocation18_spill] sm:$0xff] %v3875_v27  ;;  %v3887_v58 = vadd.f32 %v1094_v18, %v1058_v52  ;;  %v1034_v12 = vmul.f32 %v4952_v16, %v4985_v7  ;;  %v1035_v45 = vmul.f32 %v4952_v16, %v4986_v48  ;;  %v1061_v39 = vadd.f32 %v1029_v41, %v993_v32  ;;  %v4988_v52 = vld [vmem:[#allocation34_spill] sm:$0xff] }
  0xe4   : > { %v1097_v57 = vmul.f32 %v3803_v47, %v4982_v36  ;;  %v3895_v33 = vadd.f32 %v1095_v53, %v1059_v54  ;;  %v1156_v59 = vsel %vm354_vm0, %v3868_v46, 0.0  ;;  %v1157_v44 = vsel %vm354_vm0, %v3870_v50, 0.0  ;;  %v4989_v18 = vld [vmem:[#allocation38_spill] sm:$0xff]  ;;  %v4991_v36 = vld [vmem:[#allocation40_spill] sm:$0xff] }
  0xe5   : > { %v1159_v49 = vsel %vm354_vm0, %v3872_v13, 0.0  ;;  %v1036_v1 = vmul.f32 %v4952_v16, %v4987_v40  ;;  %v1037_v32 = vmul.f32 %v4952_v16, %v4988_v52  ;;  %v1038_v9 = vmul.f32 %v4952_v16, %v4989_v18 }
  0xe6   : > { %v1158_v3 = vadd.f32 %v1157_v44, %v1156_v59  ;;  %v1062_v42 = vadd.f32 %v1030_v5, %v3768_v20  ;;  %v1098_v41 = vmul.f32 %v3803_v47, %v4983_v28  ;;  %v3912_v54 = vadd.f32 %v1096_v10, %v1060_v23  ;;  %v4993_v44 = vld [vmem:[#allocation45_spill] sm:$0xff] }
  0xe7   : > { %v1161_v53 = vsel %vm354_vm0, %v3887_v58, 0.0  ;;  %v3918_v56 = vmul.f32 %v4952_v16, %v4990_v61  ;;  %v3922_v27 = vmul.f32 %v4952_v16, %v4991_v36  ;;  %v3926_v59 = vmul.f32 %v4952_v16, %v4992_v30 }
  0xe8   : > { %v1160_v20 = vadd.f32 %v1159_v49, %v1158_v3  ;;  %v1063_v5 = vadd.f32 %v1031_v25, %v3771_v19  ;;  %v1099_v28 = vmul.f32 %v3803_v47, %v4984_v43  ;;  %v3931_v23 = vadd.f32 %v1097_v57, %v1061_v39  ;;  %v4996_v3 = vld [vmem:[#allocation27_spill] sm:$0xff] }
  0xe9   : > { %v1163_v10 = vsel %vm354_vm0, %v3895_v33, 0.0  ;;  %v3937_v24 = vmul.f32 %v4952_v16, %v4993_v44  ;;  %v3941_v55 = vmul.f32 %v4952_v16, %v4994_v63  ;;  %v3945_v49 = vmul.f32 %v4952_v16, %v4995_v35 }
  0xea   : > { %v1162_v19 = vadd.f32 %v1161_v53, %v1160_v20  ;;  %v1064_v25 = vadd.f32 %v1032_v38, %v3774_v29  ;;  %v1100_v43 = vmul.f32 %v3803_v47, %v4985_v7  ;;  %v3950_v39 = vadd.f32 %v1098_v41, %v1062_v42  ;;  %v5002_v20 = vld [vmem:[#allocation15_spill] sm:$0xff] }
  0xeb   : > { %v1165_v57 = vsel %vm354_vm0, %v3912_v54, 0.0  ;;  %v3956_v51 = vmul.f32 %v4952_v16, %v4996_v3  ;;  %v3960_v21 = vmul.f32 %v4952_v16, %v4998_v34  ;;  %v3964_v53 = vmul.f32 %v4952_v16, %v5000_v17 }
  0xec   : > { %v1164_v29 = vadd.f32 %v1163_v10, %v1162_v19  ;;  %v1065_v38 = vadd.f32 %v1033_v6, %v3777_v0  ;;  %v1101_v7 = vmul.f32 %v3803_v47, %v4986_v48  ;;  %v3969_v42 = vadd.f32 %v1099_v28, %v1063_v5  ;;  %v3980_v19 = vld [vmem:[#allocation2 + $0x182] sm:$0xff]  ;;  %v5005_v0 = vld [vmem:[#allocation50_spill] sm:$0xff] }
  0xed   : > { %4997 = vst [vmem:[#allocation28_spill] sm:$0xff] %v3956_v51  ;;  %4999 = vst [vmem:[#allocation19_spill] sm:$0xff] %v3960_v21  ;;  %v1167_v41 = vsel %vm354_vm0, %v3931_v23, 0.0  ;;  %v3975_v51 = vmul.f32 %v4952_v16, %v5002_v20  ;;  %v1066_v21 = vadd.f32 %v1034_v12, %v3780_v31  ;;  %v3984_v6 = vmul.f32 %v4952_v16, %v5005_v0  ;;  %v5006_v48 = vld [vmem:[#allocation10_spill] sm:$0xff]  ;;  %v5008_v31 = vld [vmem:[#allocation7_spill] sm:$0xff] }
  0xee   : > { %5001 = vst [vmem:[#allocation24_spill] sm:$0xff] %v3964_v53  ;;  %v1102_v53 = vmul.f32 %v3803_v47, %v4987_v40  ;;  %v1166_v10 = vadd.f32 %v1165_v57, %v1164_v29  ;;  %5004 = vst [vmem:[#allocation29_spill] sm:$0xff] %v3980_v19  ;;  %v3988_v5 = vmul.f32 %v4952_v16, %v5006_v48 }
  0xef   : > { %5003 = vst [vmem:[#allocation25_spill] sm:$0xff] %v3975_v51  ;;  %v3990_v28 = vadd.f32 %v1100_v43, %v1064_v25  ;;  %v1169_v51 = vsel %vm354_vm0, %v3950_v39, 0.0  ;;  %v3996_v12 = vmul.f32 %v4952_v16, %v5008_v31  ;;  %v4000_v40 = vmul.f32 %v4952_v16, %v3748_v37 }
  0xf0   : > { %5007 = vst [vmem:[#allocation30_spill] sm:$0xff] %v3988_v5  ;;  %v4004_v57 = vmul.f32 %v4952_v16, %v3980_v19  ;;  %v1168_v29 = vadd.f32 %v1167_v41, %v1166_v10  ;;  %v1067_v5 = vadd.f32 %v1035_v45, %v3783_v22  ;;  %v1103_v25 = vmul.f32 %v3803_v47, %v4988_v52 }
  0xf1   : > { %5009 = vst [vmem:[#allocation35_spill] sm:$0xff] %v3996_v12  ;;  %5010 = vst [vmem:[#allocation31_spill] sm:$0xff] %v4000_v40  ;;  %v4009_v43 = vadd.f32 %v1101_v7, %v1065_v38  ;;  %v1171_v31 = vsel %vm354_vm0, %v3969_v42, 0.0  ;;  %v1068_v12 = vadd.f32 %v1036_v1, %v3790_v26  ;;  %v1104_v40 = vmul.f32 %v3803_v47, %v4989_v18 }
  0xf2   : > { %5011 = vst [vmem:[#allocation32_spill] sm:$0xff] %v4004_v57  ;;  %v4016_v37 = vadd.f32 %v1102_v53, %v1066_v21  ;;  %v1170_v19 = vadd.f32 %v1169_v51, %v1168_v29  ;;  %v4018_v57 = vld [vmem:[#allocation2 + $0x18a] sm:$0xff]  ;;  %v1173_v22 = vsel %vm354_vm0, %v3990_v28, 0.0  ;;  %v1225_v45 = vmul.f32 %v3868_v46, %v3868_v46 }
  0xf3   : > { %v1226_v52 = vmul.f32 %v3870_v50, %v3870_v50  ;;  %v1227_v26 = vmul.f32 %v3872_v13, %v3872_v13  ;;  %v4030_v1 = vmul.f32 %v4952_v16, %v4018_v57  ;;  %v1069_v21 = vadd.f32 %v1037_v32, %v3793_v15 }
  0xf4   : > { %v1070_v51 = vadd.f32 %v1038_v9, %v3796_v62  ;;  %v1172_v18 = vadd.f32 %v1171_v31, %v1170_v19  ;;  %v1105_v53 = vmul.f32 %v3803_v47, %v4990_v61  ;;  %v4036_v38 = vadd.f32 %v1103_v25, %v1067_v5 }
  0xf5   : > { %v1175_v7 = vsel %vm354_vm0, %v4009_v43, 0.0  ;;  %v1228_v41 = vmul.f32 %v3887_v58, %v3887_v58  ;;  %v1106_v16 = vmul.f32 %v3803_v47, %v4991_v36  ;;  %v4044_v10 = vadd.f32 %v1104_v40, %v1068_v12 }
  0xf6   : > { %v1174_v15 = vadd.f32 %v1173_v22, %v1172_v18  ;;  %v1177_v62 = vsel %vm354_vm0, %v4016_v37, 0.0  ;;  %v1229_v32 = vmul.f32 %v3895_v33, %v3895_v33  ;;  %v1257_v9 = vsel %vm354_vm0, %v1225_v45, 0.0 }
  0xf7   : > { %v1258_v61 = vsel %vm354_vm0, %v1226_v52, 0.0  ;;  %v1260_v19 = vsel %vm354_vm0, %v1227_v26, 0.0  ;;  %v1071_v5 = vadd.f32 %v3918_v56, %v3806_v2  ;;  %v1107_v36 = vmul.f32 %v3803_v47, %v4992_v30 }
  0xf8   : > { %v1176_v31 = vadd.f32 %v1175_v7, %v1174_v15  ;;  %v1259_v12 = vadd.f32 %v1258_v61, %v1257_v9  ;;  %v4057_v40 = vadd.f32 %v1105_v53, %v1069_v21  ;;  %v1179_v29 = vsel %vm354_vm0, %v4036_v38, 0.0 }
  0xf9   : > { %v1230_v25 = vmul.f32 %v3912_v54, %v3912_v54  ;;  %v1262_v22 = vsel %vm354_vm0, %v1228_v41, 0.0  ;;  %v1072_v45 = vadd.f32 %v3922_v27, %v3809_v8  ;;  %v1108_v2 = vmul.f32 %v3803_v47, %v4993_v44 }
  0xfa   : > { %v1178_v56 = vadd.f32 %v1177_v62, %v1176_v31  ;;  %v1261_v30 = vadd.f32 %v1260_v19, %v1259_v12  ;;  %v4068_v52 = vadd.f32 %v1106_v16, %v1070_v51  ;;  %v1181_v26 = vsel %vm354_vm0, %v4044_v10, 0.0 }
  0xfb   : > { %v1231_v21 = vmul.f32 %v3931_v23, %v3931_v23  ;;  %v1264_v18 = vsel %vm354_vm0, %v1229_v32, 0.0  ;;  %v1073_v53 = vadd.f32 %v3926_v59, %v3812_v4  ;;  %v1109_v8 = vmul.f32 %v3803_v47, %v4994_v63 }
  0xfc   : > { %v1180_v27 = vadd.f32 %v1179_v29, %v1178_v56  ;;  %v1263_v44 = vadd.f32 %v1262_v22, %v1261_v30  ;;  %v4079_v7 = vadd.f32 %v1107_v36, %v1071_v5  ;;  %v1183_v51 = vsel %vm354_vm0, %v4057_v40, 0.0  ;;  %v5012_v56 = vld [vmem:[#allocation14_spill] sm:$0xff]  ;;  %v5013_v30 = vld [vmem:[#allocation28_spill] sm:$0xff] }
  0xfd   : > { %v1232_v41 = vmul.f32 %v3950_v39, %v3950_v39  ;;  %v1266_v16 = vsel %vm354_vm0, %v1230_v25, 0.0  ;;  %v1074_v15 = vadd.f32 %v3937_v24, %v3815_v14  ;;  %v1110_v4 = vmul.f32 %v3803_v47, %v4995_v35 }
  0xfe   : > { %v1182_v59 = vadd.f32 %v1181_v26, %v1180_v27  ;;  %v1265_v63 = vadd.f32 %v1264_v18, %v1263_v44  ;;  %v4090_v62 = vadd.f32 %v1108_v2, %v1072_v45  ;;  %v1185_v32 = vsel %vm354_vm0, %v4068_v52, 0.0  ;;  %v5014_v27 = vld [vmem:[#allocation13_spill] sm:$0xff]  ;;  %v5015_v44 = vld [vmem:[#allocation19_spill] sm:$0xff] }
  0xff   : > { %v1233_v9 = vmul.f32 %v3969_v42, %v3969_v42  ;;  %v1268_v61 = vsel %vm354_vm0, %v1231_v21, 0.0  ;;  %v1075_v19 = vadd.f32 %v3941_v55, %v3818_v60  ;;  %v1111_v14 = vmul.f32 %v3803_v47, %v4996_v3 }
 0x100   : > { %v1184_v24 = vadd.f32 %v1183_v51, %v1182_v59  ;;  %v1267_v35 = vadd.f32 %v1266_v16, %v1265_v63  ;;  %v4101_v5 = vadd.f32 %v1109_v8, %v1073_v53  ;;  %v1187_v36 = vsel %vm354_vm0, %v4079_v7, 0.0 }
 0x101   : > { %v1234_v31 = vmul.f32 %v3990_v28, %v3990_v28  ;;  %v1270_v12 = vsel %vm354_vm0, %v1232_v41, 0.0  ;;  %v1076_v29 = vadd.f32 %v3945_v49, %v3821_v11  ;;  %v1112_v60 = vmul.f32 %v3803_v47, %v4998_v34 }
 0x102   : > { %v1186_v55 = vadd.f32 %v1185_v32, %v1184_v24  ;;  %v1269_v3 = vadd.f32 %v1268_v61, %v1267_v35  ;;  %v4112_v25 = vadd.f32 %v1110_v4, %v1074_v15  ;;  %v1189_v22 = vsel %vm354_vm0, %v4090_v62, 0.0  ;;  %v5016_v32 = vld [vmem:[#allocation17_spill] sm:$0xff] }
 0x103   : > { %v1235_v45 = vmul.f32 %v4009_v43, %v4009_v43  ;;  %v1272_v2 = vsel %vm354_vm0, %v1233_v9, 0.0  ;;  %v1077_v26 = vadd.f32 %v5013_v30, %v5012_v56  ;;  %v1113_v11 = vmul.f32 %v3803_v47, %v5000_v17  ;;  %v5017_v9 = vld [vmem:[#allocation24_spill] sm:$0xff]  ;;  %v5020_v30 = vld [vmem:[#allocation21_spill] sm:$0xff] }
 0x104   : > { %v1188_v49 = vadd.f32 %v1187_v36, %v1186_v55  ;;  %v1271_v34 = vadd.f32 %v1270_v12, %v1269_v3  ;;  %v4123_v21 = vadd.f32 %v1111_v14, %v1075_v19  ;;  %v1191_v18 = vsel %vm354_vm0, %v4101_v5, 0.0  ;;  %v5018_v12 = vld [vmem:[#allocation20_spill] sm:$0xff] }
 0x105   : > { %v1236_v53 = vmul.f32 %v4016_v37, %v4016_v37  ;;  %v1274_v8 = vsel %vm354_vm0, %v1234_v31, 0.0  ;;  %v1078_v51 = vadd.f32 %v5015_v44, %v5014_v27  ;;  %v1114_v41 = vmul.f32 %v3803_v47, %v5002_v20  ;;  %v5022_v44 = vld [vmem:[#allocation22_spill] sm:$0xff] }
 0x106   : > { %v1190_v16 = vadd.f32 %v1189_v22, %v1188_v49  ;;  %v1273_v17 = vadd.f32 %v1272_v2, %v1271_v34  ;;  %v4134_v15 = vadd.f32 %v1112_v60, %v1076_v29  ;;  %v1193_v4 = vsel %vm354_vm0, %v4112_v25, 0.0  ;;  %v5019_v29 = vld [vmem:[#allocation25_spill] sm:$0xff] }
 0x107   : > { %v1237_v59 = vmul.f32 %v4036_v38, %v4036_v38  ;;  %v1276_v63 = vsel %vm354_vm0, %v1235_v45, 0.0  ;;  %v1079_v61 = vadd.f32 %v5017_v9, %v5016_v32  ;;  %v1115_v19 = vmul.f32 %v3803_v47, %v5005_v0 }
 0x108   : > { %v1192_v14 = vadd.f32 %v1191_v18, %v1190_v16  ;;  %v1275_v20 = vadd.f32 %v1274_v8, %v1273_v17  ;;  %v4145_v24 = vadd.f32 %v1113_v11, %v1077_v26  ;;  %v1195_v35 = vsel %vm354_vm0, %v4123_v21, 0.0  ;;  %v5021_v11 = vld [vmem:[#allocation7_spill] sm:$0xff]  ;;  %v5024_v16 = vld [vmem:[#allocation9_spill] sm:$0xff] }
 0x109   : > { %v1238_v36 = vmul.f32 %v4044_v10, %v4044_v10  ;;  %v1278_v31 = vsel %vm354_vm0, %v1236_v53, 0.0  ;;  %v1080_v60 = vadd.f32 %v5019_v29, %v5018_v12  ;;  %v1116_v55 = vmul.f32 %v3803_v47, %v5006_v48  ;;  %v949_v12 = vld [vmem:[#allocation2 + $0x19a] sm:$0xff] }
 0x10a   : > { %v1194_v3 = vadd.f32 %v1193_v4, %v1192_v14  ;;  %v1277_v0 = vadd.f32 %v1276_v63, %v1275_v20  ;;  %v4156_v22 = vadd.f32 %v1114_v41, %v1078_v51  ;;  %v1197_v45 = vsel %vm354_vm0, %v4134_v15, 0.0  ;;  %v5023_v51 = vld [vmem:[#allocation30_spill] sm:$0xff]  ;;  %v5027_v20 = vld [vmem:[#allocation29_spill] sm:$0xff] }
 0x10b   : > { %v1239_v2 = vmul.f32 %v4057_v40, %v4057_v40  ;;  %v1280_v56 = vsel %vm354_vm0, %v1237_v59, 0.0  ;;  %v1081_v26 = vadd.f32 %v3984_v6, %v5020_v30  ;;  %v1117_v49 = vmul.f32 %v3803_v47, %v5021_v11 }
 0x10c   : > { %v1196_v34 = vadd.f32 %v1195_v35, %v1194_v3  ;;  %v1279_v48 = vadd.f32 %v1278_v31, %v1277_v0  ;;  %v4167_v18 = vadd.f32 %v1115_v19, %v1079_v61  ;;  %v1199_v53 = vsel %vm354_vm0, %v4145_v24, 0.0  ;;  %v5025_v61 = vld [vmem:[#allocation16_spill] sm:$0xff]  ;;  %v5026_v19 = vld [vmem:[#allocation35_spill] sm:$0xff] }
 0x10d   : > { %v1240_v8 = vmul.f32 %v4068_v52, %v4068_v52  ;;  %v1282_v27 = vsel %vm354_vm0, %v1238_v36, 0.0  ;;  %v1082_v41 = vadd.f32 %v5023_v51, %v5022_v44  ;;  %v1118_v6 = vmul.f32 %v3803_v47, %v5024_v16  ;;  %v5028_v0 = vld [vmem:[#allocation12_spill] sm:$0xff] }
 0x10e   : > { %v1198_v17 = vadd.f32 %v1197_v45, %v1196_v34  ;;  %v1281_v4 = vadd.f32 %v1280_v56, %v1279_v48  ;;  %v4178_v59 = vadd.f32 %v1116_v55, %v1080_v60  ;;  %v1201_v63 = vsel %vm354_vm0, %v4156_v22, 0.0  ;;  %v5029_v45 = vld [vmem:[#allocation31_spill] sm:$0xff]  ;;  %v950_v34 = vld [vmem:[#allocation2 + $0x1a2] sm:$0xff] }
 0x10f   : > { %v1241_v32 = vmul.f32 %v4079_v7, %v4079_v7  ;;  %v1284_v9 = vsel %vm354_vm0, %v1239_v2, 0.0  ;;  %v1083_v14 = vadd.f32 %v5026_v19, %v5025_v61  ;;  %v1119_v35 = vmul.f32 %v3803_v47, %v5027_v20 }
 0x110   : > { %v1200_v36 = vadd.f32 %v1199_v53, %v1198_v17  ;;  %v1283_v31 = vadd.f32 %v1282_v27, %v1281_v4  ;;  %v4189_v29 = vadd.f32 %v1117_v49, %v1081_v26  ;;  %v1203_v60 = vsel %vm354_vm0, %v4167_v18, 0.0  ;;  %v5031_v27 = vld [vmem:[#allocation32_spill] sm:$0xff] }
 0x111   : > { %v1242_v55 = vmul.f32 %v4090_v62, %v4090_v62  ;;  %v1286_v3 = vsel %vm354_vm0, %v1240_v8, 0.0  ;;  %v1084_v2 = vadd.f32 %v5029_v45, %v5028_v0  ;;  %v1120_v56 = vmul.f32 %v3803_v47, %v4018_v57  ;;  %v5030_v8 = vld [vmem:[#allocation26_spill] sm:$0xff] }
 0x112   : > { %v1202_v30 = vadd.f32 %v1201_v63, %v1200_v36  ;;  %v1285_v11 = vadd.f32 %v1284_v9, %v1283_v31  ;;  %v4200_v48 = vadd.f32 %v1118_v6, %v1082_v41  ;;  %v1205_v26 = vsel %vm354_vm0, %v4178_v59, 0.0  ;;  %v5032_v63 = vld [vmem:[#allocation18_spill] sm:$0xff] }
 0x113   : > { %v1243_v49 = vmul.f32 %v4101_v5, %v4101_v5  ;;  %v1288_v53 = vsel %vm354_vm0, %v1241_v32, 0.0  ;;  %v1085_v44 = vadd.f32 %v5031_v27, %v5030_v8  ;;  %v1121_v51 = vmul.f32 %v3803_v47, %v949_v12 }
 0x114   : > { %v1204_v16 = vadd.f32 %v1203_v60, %v1202_v30  ;;  %v1287_v57 = vadd.f32 %v1286_v3, %v1285_v11  ;;  %v4210_v17 = vadd.f32 %v1119_v35, %v1083_v14  ;;  %v1207_v41 = vsel %vm354_vm0, %v4189_v29, 0.0 }
 0x115   : > { %v1244_v6 = vmul.f32 %v4112_v25, %v4112_v25  ;;  %v1290_v4 = vsel %vm354_vm0, %v1242_v55, 0.0  ;;  %v1086_v32 = vadd.f32 %v4030_v1, %v5032_v63  ;;  %v1122_v9 = vmul.f32 %v3803_v47, %v950_v34 }
 0x116   : > { %v1206_v61 = vadd.f32 %v1205_v26, %v1204_v16  ;;  %v1289_v19 = vadd.f32 %v1288_v53, %v1287_v57  ;;  %v4220_v20 = vadd.f32 %v1120_v56, %v1084_v2  ;;  %v1209_v14 = vsel %vm354_vm0, %v4200_v48, 0.0 }
 0x117   : > { %v1245_v35 = vmul.f32 %v4123_v21, %v4123_v21  ;;  %v1292_v36 = vsel %vm354_vm0, %v1243_v49, 0.0  ;;  %v4227_v60 = vadd.f32 %v1121_v51, %v1085_v44  ;;  %v1211_v1 = vsel %vm354_vm0, %v4210_v17, 0.0 }
 0x118   : > { %v1208_v31 = vadd.f32 %v1207_v41, %v1206_v61  ;;  %v1291_v12 = vadd.f32 %v1290_v4, %v1289_v19  ;;  %v1246_v47 = vmul.f32 %v4134_v15, %v4134_v15  ;;  %v1294_v55 = vsel %vm354_vm0, %v1244_v6, 0.0 }
 0x119   : > { %v4234_v45 = vadd.f32 %v1122_v9, %v1086_v32  ;;  %v1213_v2 = vsel %vm354_vm0, %v4220_v20, 0.0  ;;  %v1247_v56 = vmul.f32 %v4145_v24, %v4145_v24  ;;  %v1296_v30 = vsel %vm354_vm0, %v1245_v35, 0.0 }
 0x11a   : > { %v1210_v3 = vadd.f32 %v1209_v14, %v1208_v31  ;;  %v1293_v0 = vadd.f32 %v1292_v36, %v1291_v12  ;;  %v1215_v26 = vsel %vm354_vm0, %v4227_v60, 0.0  ;;  %v1248_v49 = vmul.f32 %v4156_v22, %v4156_v22 }
 0x11b   : > { %v1298_v53 = vsel %vm354_vm0, %v1246_v47, 0.0  ;;  %v1217_v44 = vsel %vm354_vm0, %v4234_v45, 0.0  ;;  %v1249_v51 = vmul.f32 %v4167_v18, %v4167_v18  ;;  %v1300_v16 = vsel %vm354_vm0, %v1247_v56, 0.0 }
 0x11c   : > { %v1212_v11 = vadd.f32 %v1211_v1, %v1210_v3  ;;  %v1295_v34 = vadd.f32 %v1294_v55, %v1293_v0  ;;  %v1250_v6 = vmul.f32 %v4178_v59, %v4178_v59  ;;  %v1302_v4 = vsel %vm354_vm0, %v1248_v49, 0.0 }
 0x11d   : > { %v1251_v9 = vmul.f32 %v4189_v29, %v4189_v29  ;;  %v1304_v61 = vsel %vm354_vm0, %v1249_v51, 0.0  ;;  %v1252_v14 = vmul.f32 %v4200_v48, %v4200_v48  ;;  %v1253_v12 = vmul.f32 %v4210_v17, %v4210_v17 }
 0x11e   : > { %v1214_v8 = vadd.f32 %v1213_v2, %v1212_v11  ;;  %v1297_v27 = vadd.f32 %v1296_v30, %v1295_v34  ;;  %v1306_v35 = vsel %vm354_vm0, %v1250_v6, 0.0  ;;  %v1254_v55 = vmul.f32 %v4220_v20, %v4220_v20 }
 0x11f   : > { %v1308_v1 = vsel %vm354_vm0, %v1251_v9, 0.0  ;;  %v1310_v3 = vsel %vm354_vm0, %v1252_v14, 0.0  ;;  %v1255_v56 = vmul.f32 %v4227_v60, %v4227_v60  ;;  %v1312_v30 = vsel %vm354_vm0, %v1253_v12, 0.0 }
 0x120   : > { %v1216_v57 = vadd.f32 %v1215_v26, %v1214_v8  ;;  %v1299_v41 = vadd.f32 %v1298_v53, %v1297_v27  ;;  %v1256_v34 = vmul.f32 %v4234_v45, %v4234_v45  ;;  %v1314_v26 = vsel %vm354_vm0, %v1254_v55, 0.0 }
 0x121   : > { %v1316_v8 = vsel %vm354_vm0, %v1255_v56, 0.0  ;;  %v1524_v56 = vld [vmem:[%s4508_s6 + $0x8] sm:$0xff] }
 0x122   : > { %v1218_v63 = vadd.f32 %v1217_v44, %v1216_v57  ;;  %v1301_v32 = vadd.f32 %v1300_v16, %v1299_v41  ;;  %v1318_v44 = vsel %vm354_vm0, %v1256_v34, 0.0  ;;  %v1525_v34 = vld [vmem:[%s4508_s6 + $0x10] sm:$0xff] }
 0x124   : > { %v1303_v19 = vadd.f32 %v1302_v4, %v1301_v32  ;;  %v1219_v36 = vrot.slane %v1218_v63, 4  ;;  %v1155_v4 = vld [vmem:[%s4504_s2] sm:$0x1] }
 0x125   : > { %v1326_v14 = vmul.f32 256.0, %v1155_v4 }
 0x126   : > { %v1305_v31 = vadd.f32 %v1304_v61, %v1303_v19  ;;  %v1220_v0 = vadd.f32 %v1219_v36, %v1218_v63  ;;  %v1328_v61 = vmul.f32 2.0, %v1155_v4 }
 0x127   : > { %v1331_v12 = vmul.f32 %v1326_v14, %v1155_v4 }
 0x128   : > { %v1307_v47 = vadd.f32 %v1306_v35, %v1305_v31  ;;  %v1221_v49 = vrot.slane %v1220_v0, 2 }
 0x12a   : > { %v1309_v2 = vadd.f32 %v1308_v1, %v1307_v47  ;;  %v1222_v51 = vadd.f32 %v1221_v49, %v1220_v0 }
 0x12c   : > { %v1311_v11 = vadd.f32 %v1310_v3, %v1309_v2  ;;  %v1223_v41 = vrot.slane %v1222_v51, 1  ;;  %v1523_v2 = vld [vmem:[%s4508_s6] sm:$0xff] }
 0x12e   : > { %v1313_v53 = vadd.f32 %v1312_v30, %v1311_v11  ;;  %v1224_v32 = vadd.f32 %v1223_v41, %v1222_v51  ;;  %v2164_v30 = vpack.c.bf16 %v1524_v56, %v1523_v2  ;;  %v5033_v11 = vmov 0.0|0.0   ;;  %v1530_v51 = vld [vmem:[%s4508_s6 + $0x38] sm:$0xff] }
 0x130   : > { %v1315_v27 = vadd.f32 %v1314_v26, %v1313_v53  ;;  %v1329_v36 = vmul.f32 %v1328_v61, %v1224_v32  ;;  %v1327_v47 = vadd.f32 %v1326_v14, %v1224_v32  ;;  %2165 = vmatpush3.bf16.msra.mxu1 %v2164_v30  ;;  %v1526_v26 = vld [vmem:[%s4508_s6 + $0x18] sm:$0xff]  ;;  %v1527_v53 = vld [vmem:[%s4508_s6 + $0x20] sm:$0xff]  ;;  %v2302_v61 = vmov 1966171168   ;;  %v1456_v30 = vld [vmem:[%s4509_s7 + $0x8] sm:$0xff] }
 0x131   : > { %2166 = vmatprep.subr.bf16.mxu1 %v5033_v11  ;;  %v2167_v49 = vpack.c.bf16 %v1526_v26, %v1525_v34  ;;  %v1453_v26 = vld [vmem:[%s4506_s4] sm:$0x1] }
 0x132   : > { %v1317_v16 = vadd.f32 %v1316_v8, %v1315_v27  ;;  %v1528_v8 = vld [vmem:[%s4508_s6 + $0x28] sm:$0xff] }
 0x133   : > { %v2170_v27 = vpack.c.bf16 %v1528_v8, %v1527_v53  ;;  %v1457_v8 = vld [vmem:[%s4509_s7 + $0x10] sm:$0xff] }
 0x134   : > { %v1319_v57 = vadd.f32 %v1318_v44, %v1317_v16  ;;  %2168 = vmatpush3.bf16.msra.mxu1 %v2167_v49  ;;  %v1529_v44 = vld [vmem:[%s4508_s6 + $0x30] sm:$0xff] }
 0x135   : > { %2169 = vmatprep.subr.bf16.mxu1 %v5033_v11  ;;  %v2173_v16 = vpack.c.bf16 %v1530_v51, %v1529_v44 }
 0x136   : > { %v1320_v6 = vrot.slane %v1319_v57, 4 }
 0x138   : > { %v1321_v63 = vadd.f32 %v1320_v6, %v1319_v57  ;;  %2171 = vmatpush3.bf16.msra.mxu1 %v2170_v27 }
 0x139   : > { %2172 = vmatprep.subr.bf16.mxu1 %v5033_v11 }
 0x13a   : > { %v1322_v9 = vrot.slane %v1321_v63, 2 }
 0x13c   : > { %v1323_v19 = vadd.f32 %v1322_v9, %v1321_v63  ;;  %2174 = vmatpush3.bf16.msra.mxu1 %v2173_v16  ;;  %v1459_v16 = vld [vmem:[%s4509_s7 + $0x20] sm:$0xff] }
 0x13e   : > { %v1324_v35 = vrot.slane %v1323_v19, 1 }
 0x140   : > { %v1325_v31 = vadd.f32 %v1324_v35, %v1323_v19  ;;  %v1437_v19 = vunpack.c.l.s4 %v2302_v61  ;;  %v2013_v35 = vld [vmem:[%s4505_s3] ss:$0 sm:$0xff] }
 0x142   : > { %v1330_v1 = vadd.f32 %v1329_v36, %v1325_v31  ;;  %v1438_v14 = vunpack.c.0.s8 %v1437_v19  ;;  %v5034_v36 = vld [vmem:[#allocation6_spill] sm:$0xff]  ;;  %v1463_v19 = vld [vmem:[%s4509_s7 + $0x40] sm:$0xff] }
 0x144   : > { %v1332_v55 = vadd.f32 %v1331_v12, %v1330_v1  ;;  %v1441_v31 = vsub.s32 %v1438_v14, %v5034_v36 }
 0x146   : > { %v1334_v3 = vrot.slane %v1332_v55, 7 }
 0x148   : > { %v1337_v0 = vsel %vm1336_vm4, %v1327_v47, %v1334_v3  ;;  %v1455_v47 = vld [vmem:[%s4509_s7] sm:$0xff]  ;;  %v5035_v3 = vsub.s32 1, %v5034_v36 }
 0x149   : > { %2090 = vmatmul.mubr.msk.f32.vlgmr.msra.gmra.mrb[0].mxu0 %vm354_vm0, %v1337_v0 }
 0x21c   : > { %v1415_v57 = vpop.f32.mrb[0].mxu0 }
 0x21d   : > { %v1419_v41 = vmul.f32 %v1415_v57, %v1415_v57  ;;  %v2091_v6 = vpop.f32.mrb[1].mxu0  ;;  %v1434_v11 = vsub.f32 %v1155_v4, %v1415_v57  ;;  %v1458_v4 = vld [vmem:[%s4509_s7 + $0x18] sm:$0xff] }
 0x21f   : > { %v1421_v63 = vrot.slane %v1419_v41, 7  ;;  %v1460_v41 = vld [vmem:[%s4509_s7 + $0x28] sm:$0xff] }
 0x221   : > { %v1423_v32 = vsub.f32 %v1415_v57, %v1421_v63  ;;  %v1461_v63 = vld [vmem:[%s4509_s7 + $0x30] sm:$0xff] }
 0x223   : > { %v1424_v9 = vadd.f32 1e-05, %v1423_v32 }
 0x225   : > { %2228 = vrsqrt.f32 %v1424_v9  ;;  %v1462_v9 = vld [vmem:[%s4509_s7 + $0x38] sm:$0xff] }
 0x22f   : > { %v2229_v12 = vpop.eup %2228 }
 0x230   : > { %v1433_v1 = vmul.f32 %v2229_v12, %v2013_v35  ;;  %v1464_v35 = vld [vmem:[%s4509_s7 + $0x48] sm:$0xff]  ;;  %v1613_v12 = vpack.c.bf16 %v4090_v62, %v4079_v7 }
 0x231   : > { %v1468_v62 = vld [vmem:[%s4509_s7 + $0x68] sm:$0xff] }
 0x232   : > { %v1442_v55 = vrot.slane %v1433_v1, %v1441_v31  ;;  %v1474_v0 = vrot.slane %v1433_v1, %v5035_v3  ;;  %v1466_v3 = vld [vmem:[%s4509_s7 + $0x58] sm:$0xff] }
 0x234   : > { %v1443_v2 = vcombine.high %v1442_v55, %v1442_v55  ;;  %v1475_v56 = vmul.f32 %v1474_v0, %v1455_v47  ;;  %v1476_v53 = vmul.f32 %v1474_v0, %v1456_v30  ;;  %v1477_v44 = vmul.f32 %v1474_v0, %v1457_v8  ;;  %v1465_v47 = vld [vmem:[%s4509_s7 + $0x50] sm:$0xff] }
 0x235   : > { %v1478_v51 = vmul.f32 %v1474_v0, %v1458_v4  ;;  %v1479_v57 = vmul.f32 %v1474_v0, %v1459_v16  ;;  %v1480_v6 = vmul.f32 %v1474_v0, %v1460_v41  ;;  %v1481_v32 = vmul.f32 %v1474_v0, %v1461_v63 }
 0x236   : > { %v1450_v34 = vrot.slane %v1443_v2, %v1441_v31  ;;  %1491 = vxpose.xlu0.b32.start [1/16] (narrow) %v1475_v56, 64  ;;  %v1482_v61 = vmul.f32 %v1474_v0, %v1462_v9  ;;  %v1483_v14 = vmul.f32 %v1474_v0, %v1463_v19  ;;  %v1605_v31 = vpack.c.bf16 %v3870_v50, %v3868_v46  ;;  %v1467_v50 = vld [vmem:[%s4509_s7 + $0x60] sm:$0xff]  ;;  %v1469_v56 = vld [vmem:[%s4509_s7 + $0x70] sm:$0xff] }
 0x237   : > { %v1484_v1 = vmul.f32 %v1474_v0, %v1464_v35  ;;  %v1485_v55 = vmul.f32 %v1474_v0, %v1465_v47  ;;  %v1486_v46 = vmul.f32 %v1474_v0, %v1466_v3  ;;  %v1487_v7 = vmul.f32 %v1474_v0, %v1467_v50 }
 0x238   : > { %v1452_v49 = vmul.f32 %v1450_v34, %v1434_v11  ;;  %2119 = vmatprep.mubr.msk.bf16.mxu0 %vm354_vm0, %v1605_v31  ;;  %v1488_v2 = vmul.f32 %v1474_v0, %v1468_v62  ;;  %v1489_v30 = vmul.f32 %v1474_v0, %v1469_v56  ;;  %v1470_v11 = vld [vmem:[%s4509_s7 + $0x78] sm:$0xff]  ;;  %v1614_v63 = vpack.c.bf16 %v4112_v25, %v4101_v5  ;;  %v1531_v5 = vld [vmem:[%s4510_s8] sm:$0x1] }
 0x239   : > { %v1490_v34 = vmul.f32 %v1474_v0, %v1470_v11  ;;  %v1615_v9 = vpack.c.bf16 %v4134_v15, %v4123_v21  ;;  %v5036_v21 = vsub.s32 0, %v5034_v36 }
 0x23a   : > { %1492 = vxpose.xlu0.b32.cont [2/16] (narrow) %v1476_v53, 64  ;;  %v1454_v27 = vadd.f32 %v1453_v26, %v1452_v49 }
 0x23c   : > { %2109 = vmatmul.mubr.msk.f32.vlgmr.msra.gmra.mrb[0].mxu1 %vm354_vm0, %v1454_v27 }
 0x23d   : > { %2135 = vmatprep.mubr.msk.bf16.mxu1 %vm354_vm0, %v1613_v12 }
 0x23e   : > { %1493 = vxpose.xlu0.b32.cont [3/16] (narrow) %v1477_v44, 64 }
 0x242   : > { %1494 = vxpose.xlu0.b32.cont [4/16] (narrow) %v1478_v51, 64 }
 0x246   : > { %1495 = vxpose.xlu0.b32.cont [5/16] (narrow) %v1479_v57, 64 }
 0x24a   : > { %1496 = vxpose.xlu0.b32.cont [6/16] (narrow) %v1480_v6, 64  ;;  %v1606_v6 = vpack.c.bf16 %v3887_v58, %v3872_v13  ;;  %v1608_v13 = vpack.c.bf16 %v3950_v39, %v3931_v23  ;;  %v1616_v58 = vpack.c.bf16 %v4156_v22, %v4145_v24  ;;  %v1610_v23 = vpack.c.bf16 %v4016_v37, %v4009_v43 }
 0x24b   : > { %v1618_v39 = vpack.c.bf16 %v4200_v48, %v4189_v29  ;;  %v1612_v37 = vpack.c.bf16 %v4068_v52, %v4057_v40  ;;  %v1620_v43 = vpack.c.bf16 %v4234_v45, %v4227_v60 }
 0x24e   : > { %1497 = vxpose.xlu0.b32.cont [7/16] (narrow) %v1481_v32, 64  ;;  %v1607_v32 = vpack.c.bf16 %v3912_v54, %v3895_v33  ;;  %v1609_v33 = vpack.c.bf16 %v3990_v28, %v3969_v42  ;;  %v1617_v54 = vpack.c.bf16 %v4178_v59, %v4167_v18  ;;  %v1611_v42 = vpack.c.bf16 %v4044_v10, %v4036_v38 }
 0x24f   : > { %v1619_v28 = vpack.c.bf16 %v4220_v20, %v4210_v17 }
 0x252   : > { %1498 = vxpose.xlu0.b32.cont [8/16] (narrow) %v1482_v61, 64 }
 0x256   : > { %1499 = vxpose.xlu0.b32.cont [9/16] (narrow) %v1483_v14, 64 }
 0x25a   : > { %1500 = vxpose.xlu0.b32.cont [10/16] (narrow) %v1484_v1, 64 }
 0x25e   : > { %1501 = vxpose.xlu0.b32.cont [11/16] (narrow) %v1485_v55, 64 }
 0x262   : > { %1502 = vxpose.xlu0.b32.cont [12/16] (narrow) %v1486_v46, 64 }
 0x266   : > { %1503 = vxpose.xlu0.b32.cont [13/16] (narrow) %v1487_v7, 64 }
 0x26a   : > { %1504 = vxpose.xlu0.b32.cont [14/16] (narrow) %v1488_v2, 64 }
 0x26e   : > { %1505 = vxpose.xlu0.b32.cont [15/16] (narrow) %v1489_v30, 64 }
 0x272   : > { %1506 = vxpose.xlu0.b32.end [16/16] (narrow) %v1490_v34, 64 }
 0x2b6   : > { %v1507_v26 = vpop.trf.xlu0 }
 0x2ba   : > { %v1508_v49 = vpop.trf.xlu0 }
 0x2bb   : > { %v1621_v53 = vpack.c.bf16 %v1508_v49, %v1507_v26 }
 0x2bd   : > { %2111 = vmatprep.subr.bf16.mxu0 %v1621_v53  ;;  %2175 = vmatprep.subr.bf16.mxu1 %v1621_v53 }
 0x2be   : > { %2112 = vmatpush3.bf16.msra.mxu0 %v1621_v53  ;;  %v1509_v8 = vpop.trf.xlu0  ;;  %2179 = vmatpush3.bf16.msra.mxu1 %v1621_v53 }
 0x2c2   : > { %v1510_v27 = vpop.trf.xlu0 }
 0x2c3   : > { %v1622_v44 = vpack.c.bf16 %v1510_v27, %v1509_v8 }
 0x2c5   : > { %2113 = vmatprep.subr.bf16.mxu0 %v1622_v44  ;;  %2176 = vmatprep.subr.bf16.mxu1 %v1622_v44 }
 0x2c6   : > { %2114 = vmatpush3.bf16.msra.mxu0 %v1622_v44  ;;  %v1511_v4 = vpop.trf.xlu0  ;;  %2180 = vmatpush3.bf16.msra.mxu1 %v1622_v44 }
 0x2ca   : > { %v1512_v51 = vpop.trf.xlu0 }
 0x2cb   : > { %v1623_v16 = vpack.c.bf16 %v1512_v51, %v1511_v4 }
 0x2cd   : > { %2115 = vmatprep.subr.bf16.mxu0 %v1623_v16  ;;  %2177 = vmatprep.subr.bf16.mxu1 %v1623_v16 }
 0x2ce   : > { %2116 = vmatpush3.bf16.msra.mxu0 %v1623_v16  ;;  %v1513_v0 = vpop.trf.xlu0  ;;  %2181 = vmatpush3.bf16.msra.mxu1 %v1623_v16 }
 0x2d2   : > { %v1514_v57 = vpop.trf.xlu0 }
 0x2d3   : > { %v1624_v41 = vpack.c.bf16 %v1514_v57, %v1513_v0 }
 0x2d5   : > { %2117 = vmatprep.subr.bf16.mxu0 %v1624_v41  ;;  %2178 = vmatprep.subr.bf16.mxu1 %v1624_v41 }
 0x2d6   : > { %2118 = vmatpush3.bf16.msra.mxu0 %v1624_v41  ;;  %2182 = vmatpush3.bf16.msra.mxu1 %v1624_v41 }
 0x2d9   : > { %2120 = vmatmul.mubr.msk.bf16.vlgmr.msra.gmra.mrb[4].mxu0 %vm354_vm0, %v1606_v6  ;;  %2136 = vmatmul.mubr.msk.bf16.vlgmr.msra.gmra.mrb[4].mxu1 %vm354_vm0, %v1614_v63 }
 0x2da   : > { %2123 = vmatprep.mubr.msk.bf16.mxu0 %vm354_vm0, %v1607_v32  ;;  %2139 = vmatprep.mubr.msk.bf16.mxu1 %vm354_vm0, %v1615_v9 }
 0x2e1   : > { %2124 = vmatmul.mubr.msk.bf16.gmra.mrb[8].mxu0 %vm354_vm0, %v1608_v13  ;;  %2140 = vmatmul.mubr.msk.bf16.gmra.mrb[8].mxu1 %vm354_vm0, %v1616_v58 }
 0x2e2   : > { %2127 = vmatprep.mubr.msk.bf16.mxu0 %vm354_vm0, %v1609_v33  ;;  %2143 = vmatprep.mubr.msk.bf16.mxu1 %vm354_vm0, %v1617_v54 }
 0x2e9   : > { %2128 = vmatmul.mubr.msk.bf16.gmra.mrb[12].mxu0 %vm354_vm0, %v1610_v23  ;;  %2144 = vmatmul.mubr.msk.bf16.gmra.mrb[12].mxu1 %vm354_vm0, %v1618_v39 }
 0x2ea   : > { %2131 = vmatprep.mubr.msk.bf16.mxu0 %vm354_vm0, %v1611_v42  ;;  %2147 = vmatprep.mubr.msk.bf16.mxu1 %vm354_vm0, %v1619_v28 }
 0x2f1   : > { %2132 = vmatmul.mubr.msk.bf16.gmra.mrb[16].mxu0 %vm354_vm0, %v1612_v37  ;;  %2148 = vmatmul.mubr.msk.bf16.gmra.mrb[16].mxu1 %vm354_vm0, %v1620_v43 }
 0x30f   : > { %v1601_v38 = vpop.f32.mrb[0].mxu1 }
 0x310   : > { %v2110_v10 = vpop.f32.mrb[1].mxu1  ;;  %v1602_v25 = vadd.f32 %v1601_v38, %v1531_v5 }
 0x312   : > { %v4416_v15 = vrot.slane %v1602_v25, %v5036_v21 }
 0x3ac   : > { %v2121_v24 = vpop.f32.mrb[4].mxu0  ;;  %v2137_v40 = vpop.f32.mrb[4].mxu1 }
 0x3ad   : > { %v1720_v52 = vadd.f32 %v2121_v24, %v4416_v15  ;;  %v1784_v22 = vadd.f32 %v2137_v40, %v4416_v15  ;;  %v1711_v18 = vpop.f32.mrb[5].mxu0  ;;  %v1775_v59 = vpop.f32.mrb[5].mxu1 }
 0x3ae   : > { %v1776_v29 = vadd.f32 %v1775_v59, %v4416_v15  ;;  %v2122_v48 = vpop.f32.mrb[6].mxu0  ;;  %v2138_v17 = vpop.f32.mrb[6].mxu1  ;;  %v1712_v20 = vadd.f32 %v1711_v18, %v4416_v15 }
 0x3af   : > { %v1723_v60 = vadd.f32 %v2122_v48, %v4416_v15  ;;  %v1787_v45 = vadd.f32 %v2138_v17, %v4416_v15  ;;  %v1714_v36 = vpop.f32.mrb[7].mxu0  ;;  %v1778_v61 = vpop.f32.mrb[7].mxu1 }
 0x3b0   : > { %v1715_v19 = vadd.f32 %v1714_v36, %v4416_v15  ;;  %v1779_v14 = vadd.f32 %v1778_v61, %v4416_v15  ;;  %1870 = vxpose.xlu0.b32.start [1/16] %v1776_v29, 128  ;;  %1838 = vxpose.xlu1.b32.start [1/16] %v1712_v20, 128 }
 0x3b4   : > { %v2141_v35 = vpop.f32.mrb[8].mxu1  ;;  %1871 = vxpose.xlu0.b32.cont [2/16] %v1779_v14, 128  ;;  %v2125_v31 = vpop.f32.mrb[8].mxu0  ;;  %1839 = vxpose.xlu1.b32.cont [2/16] %v1715_v19, 128 }
 0x3b5   : > { %v1800_v12 = vadd.f32 %v2141_v35, %v4416_v15  ;;  %v1736_v1 = vadd.f32 %v2125_v31, %v4416_v15  ;;  %v1727_v47 = vpop.f32.mrb[9].mxu0  ;;  %v1791_v55 = vpop.f32.mrb[9].mxu1 }
 0x3b6   : > { %v1728_v3 = vadd.f32 %v1727_v47, %v4416_v15  ;;  %v1792_v46 = vadd.f32 %v1791_v55, %v4416_v15  ;;  %v2126_v50 = vpop.f32.mrb[10].mxu0  ;;  %v2142_v7 = vpop.f32.mrb[10].mxu1 }
 0x3b7   : > { %v1739_v62 = vadd.f32 %v2126_v50, %v4416_v15  ;;  %v1803_v2 = vadd.f32 %v2142_v7, %v4416_v15  ;;  %v1730_v56 = vpop.f32.mrb[11].mxu0  ;;  %v1794_v30 = vpop.f32.mrb[11].mxu1 }
 0x3b8   : > { %v1731_v11 = vadd.f32 %v1730_v56, %v4416_v15  ;;  %v1795_v34 = vadd.f32 %v1794_v30, %v4416_v15  ;;  %1872 = vxpose.xlu0.b32.cont [3/16] %v1784_v22, 128  ;;  %1840 = vxpose.xlu1.b32.cont [3/16] %v1720_v52, 128 }
 0x3bc   : > { %v2145_v26 = vpop.f32.mrb[12].mxu1  ;;  %1873 = vxpose.xlu0.b32.cont [4/16] %v1787_v45, 128  ;;  %v2129_v49 = vpop.f32.mrb[12].mxu0  ;;  %1841 = vxpose.xlu1.b32.cont [4/16] %v1723_v60, 128 }
 0x3bd   : > { %v1816_v53 = vadd.f32 %v2145_v26, %v4416_v15  ;;  %v1752_v8 = vadd.f32 %v2129_v49, %v4416_v15  ;;  %v1743_v27 = vpop.f32.mrb[13].mxu0  ;;  %v1807_v44 = vpop.f32.mrb[13].mxu1 }
 0x3be   : > { %v1744_v4 = vadd.f32 %v1743_v27, %v4416_v15  ;;  %v1808_v51 = vadd.f32 %v1807_v44, %v4416_v15  ;;  %v2130_v16 = vpop.f32.mrb[14].mxu0  ;;  %v2146_v0 = vpop.f32.mrb[14].mxu1 }
 0x3bf   : > { %v1755_v57 = vadd.f32 %v2130_v16, %v4416_v15  ;;  %v1819_v41 = vadd.f32 %v2146_v0, %v4416_v15  ;;  %v1746_v6 = vpop.f32.mrb[15].mxu0  ;;  %v1810_v63 = vpop.f32.mrb[15].mxu1 }
 0x3c0   : > { %v1747_v32 = vadd.f32 %v1746_v6, %v4416_v15  ;;  %v1811_v9 = vadd.f32 %v1810_v63, %v4416_v15  ;;  %1874 = vxpose.xlu0.b32.cont [5/16] %v1792_v46, 128  ;;  %1842 = vxpose.xlu1.b32.cont [5/16] %v1728_v3, 128 }
 0x3c4   : > { %v2149_v13 = vpop.f32.mrb[16].mxu1  ;;  %1875 = vxpose.xlu0.b32.cont [6/16] %v1795_v34, 128  ;;  %v2133_v58 = vpop.f32.mrb[16].mxu0  ;;  %1843 = vxpose.xlu1.b32.cont [6/16] %v1731_v11, 128 }
 0x3c5   : > { %v1832_v33 = vadd.f32 %v2149_v13, %v4416_v15  ;;  %v1768_v54 = vadd.f32 %v2133_v58, %v4416_v15  ;;  %v1759_v23 = vpop.f32.mrb[17].mxu0  ;;  %v1823_v39 = vpop.f32.mrb[17].mxu1 }
 0x3c6   : > { %v1760_v42 = vadd.f32 %v1759_v23, %v4416_v15  ;;  %v1824_v28 = vadd.f32 %v1823_v39, %v4416_v15  ;;  %v2134_v37 = vpop.f32.mrb[18].mxu0  ;;  %v2150_v43 = vpop.f32.mrb[18].mxu1 }
 0x3c7   : > { %v1771_v38 = vadd.f32 %v2134_v37, %v4416_v15  ;;  %v1835_v10 = vadd.f32 %v2150_v43, %v4416_v15  ;;  %v1762_v5 = vpop.f32.mrb[19].mxu0  ;;  %v1826_v25 = vpop.f32.mrb[19].mxu1 }
 0x3c8   : > { %v1763_v21 = vadd.f32 %v1762_v5, %v4416_v15  ;;  %v1827_v24 = vadd.f32 %v1826_v25, %v4416_v15  ;;  %1876 = vxpose.xlu0.b32.cont [7/16] %v1800_v12, 128  ;;  %1844 = vxpose.xlu1.b32.cont [7/16] %v1736_v1, 128 }
 0x3cc   : > { %1877 = vxpose.xlu0.b32.cont [8/16] %v1803_v2, 128  ;;  %1845 = vxpose.xlu1.b32.cont [8/16] %v1739_v62, 128 }
 0x3d0   : > { %1878 = vxpose.xlu0.b32.cont [9/16] %v1808_v51, 128  ;;  %1846 = vxpose.xlu1.b32.cont [9/16] %v1744_v4, 128 }
 0x3d4   : > { %1879 = vxpose.xlu0.b32.cont [10/16] %v1811_v9, 128  ;;  %1847 = vxpose.xlu1.b32.cont [10/16] %v1747_v32, 128 }
 0x3d8   : > { %1880 = vxpose.xlu0.b32.cont [11/16] %v1816_v53, 128  ;;  %1848 = vxpose.xlu1.b32.cont [11/16] %v1752_v8, 128 }
 0x3dc   : > { %1881 = vxpose.xlu0.b32.cont [12/16] %v1819_v41, 128  ;;  %1849 = vxpose.xlu1.b32.cont [12/16] %v1755_v57, 128 }
 0x3e0   : > { %1882 = vxpose.xlu0.b32.cont [13/16] %v1824_v28, 128  ;;  %1850 = vxpose.xlu1.b32.cont [13/16] %v1760_v42, 128 }
 0x3e4   : > { %1883 = vxpose.xlu0.b32.cont [14/16] %v1827_v24, 128  ;;  %1851 = vxpose.xlu1.b32.cont [14/16] %v1763_v21, 128 }
 0x3e8   : > { %1884 = vxpose.xlu0.b32.cont [15/16] %v1832_v33, 128  ;;  %1852 = vxpose.xlu1.b32.cont [15/16] %v1768_v54, 128 }
 0x3ec   : > { %1885 = vxpose.xlu0.b32.end [16/16] %v1835_v10, 128  ;;  %1853 = vxpose.xlu1.b32.end [16/16] %v1771_v38, 128 }
 0x430   : > { %v1886_v15 = vpop.trf.xlu0  ;;  %v1854_v40 = vpop.trf.xlu1 }
 0x431   : > { %1903 = vst [vmem:[%s4455_s12 + $0x8] sm:$0xff] %v1886_v15  ;;  %1902 = vst [vmem:[%s4455_s12] sm:$0xff] %v1854_v40 }
 0x434   : > { %v1887_v52 = vpop.trf.xlu0  ;;  %v1855_v22 = vpop.trf.xlu1 }
 0x435   : > { %1905 = vst [vmem:[%s4455_s12 + $0x18] sm:$0xff] %v1887_v52  ;;  %1904 = vst [vmem:[%s4455_s12 + $0x10] sm:$0xff] %v1855_v22 }
 0x438   : > { %v1888_v18 = vpop.trf.xlu0  ;;  %v1856_v59 = vpop.trf.xlu1 }
 0x439   : > { %1907 = vst [vmem:[%s4455_s12 + $0x28] sm:$0xff] %v1888_v18  ;;  %1906 = vst [vmem:[%s4455_s12 + $0x20] sm:$0xff] %v1856_v59 }
 0x43c   : > { %v1889_v29 = vpop.trf.xlu0  ;;  %v1857_v48 = vpop.trf.xlu1 }
 0x43d   : > { %1909 = vst [vmem:[%s4455_s12 + $0x38] sm:$0xff] %v1889_v29  ;;  %1908 = vst [vmem:[%s4455_s12 + $0x30] sm:$0xff] %v1857_v48 }
 0x440   : > { %v1890_v17 = vpop.trf.xlu0  ;;  %v1858_v20 = vpop.trf.xlu1 }
 0x441   : > { %1911 = vst [vmem:[%s4455_s12 + $0x48] sm:$0xff] %v1890_v17  ;;  %1910 = vst [vmem:[%s4455_s12 + $0x40] sm:$0xff] %v1858_v20 }
 0x444   : > { %v1891_v60 = vpop.trf.xlu0  ;;  %v1859_v45 = vpop.trf.xlu1 }
 0x445   : > { %1913 = vst [vmem:[%s4455_s12 + $0x58] sm:$0xff] %v1891_v60  ;;  %1912 = vst [vmem:[%s4455_s12 + $0x50] sm:$0xff] %v1859_v45 }
 0x448   : > { %v1892_v36 = vpop.trf.xlu0  ;;  %v1860_v61 = vpop.trf.xlu1 }
 0x449   : > { %1915 = vst [vmem:[%s4455_s12 + $0x68] sm:$0xff] %v1892_v36  ;;  %1914 = vst [vmem:[%s4455_s12 + $0x60] sm:$0xff] %v1860_v61 }
 0x44c   : > { %v1893_v19 = vpop.trf.xlu0  ;;  %v1861_v14 = vpop.trf.xlu1 }
 0x44d   : > { %1917 = vst [vmem:[%s4455_s12 + $0x78] sm:$0xff] %v1893_v19  ;;  %1916 = vst [vmem:[%s4455_s12 + $0x70] sm:$0xff] %v1861_v14 }
 0x450   : > { %v1894_v35 = vpop.trf.xlu0  ;;  %v1862_v31 = vpop.trf.xlu1 }
 0x451   : > { %1919 = vst [vmem:[%s4455_s12 + $0x88] sm:$0xff] %v1894_v35  ;;  %1918 = vst [vmem:[%s4455_s12 + $0x80] sm:$0xff] %v1862_v31 }
 0x454   : > { %v1895_v12 = vpop.trf.xlu0  ;;  %v1863_v1 = vpop.trf.xlu1 }
 0x455   : > { %1921 = vst [vmem:[%s4455_s12 + $0x98] sm:$0xff] %v1895_v12  ;;  %1920 = vst [vmem:[%s4455_s12 + $0x90] sm:$0xff] %v1863_v1 }
 0x458   : > { %v1896_v47 = vpop.trf.xlu0  ;;  %v1864_v55 = vpop.trf.xlu1 }
 0x459   : > { %1923 = vst [vmem:[%s4455_s12 + $0xa8] sm:$0xff] %v1896_v47  ;;  %1922 = vst [vmem:[%s4455_s12 + $0xa0] sm:$0xff] %v1864_v55 }
 0x45c   : > { %v1897_v3 = vpop.trf.xlu0  ;;  %v1865_v46 = vpop.trf.xlu1 }
 0x45d   : > { %1925 = vst [vmem:[%s4455_s12 + $0xb8] sm:$0xff] %v1897_v3  ;;  %1924 = vst [vmem:[%s4455_s12 + $0xb0] sm:$0xff] %v1865_v46 }
 0x460   : > { %v1898_v50 = vpop.trf.xlu0  ;;  %v1866_v7 = vpop.trf.xlu1 }
 0x461   : > { %1927 = vst [vmem:[%s4455_s12 + $0xc8] sm:$0xff] %v1898_v50  ;;  %1926 = vst [vmem:[%s4455_s12 + $0xc0] sm:$0xff] %v1866_v7 }
 0x464   : > { %v1899_v62 = vpop.trf.xlu0  ;;  %v1867_v2 = vpop.trf.xlu1 }
 0x465   : > { %1929 = vst [vmem:[%s4455_s12 + $0xd8] sm:$0xff] %v1899_v62  ;;  %1928 = vst [vmem:[%s4455_s12 + $0xd0] sm:$0xff] %v1867_v2 }
 0x468   : > { %v1900_v56 = vpop.trf.xlu0  ;;  %v1868_v30 = vpop.trf.xlu1 }
 0x469   : > { %1931 = vst [vmem:[%s4455_s12 + $0xe8] sm:$0xff] %v1900_v56  ;;  %1930 = vst [vmem:[%s4455_s12 + $0xe0] sm:$0xff] %v1868_v30 }
 0x46c   : > { %v1901_v11 = vpop.trf.xlu0  ;;  %v1869_v34 = vpop.trf.xlu1 }
 0x46d   : > { %1933 = vst [vmem:[%s4455_s12 + $0xf8] sm:$0xff] %v1901_v11  ;;  %1932 = vst [vmem:[%s4455_s12 + $0xf0] sm:$0xff] %v1869_v34 }
 0x46e PF: > { %p19_p8 = scmp.ge.s32.totalorder %s2375_s14, 4   ;;  %s5037_s30 = smov %s2286_s10 }
 0x46f   : > { %s5038_s10 = smov %s2290_s11  ;;  %s5039_s11 = smov %s2385_s17 }
 0x470   : > { %s5040_s12 = smov %s2375_s14  ;;  %21 = sbr.rel (!%p19_p8) target bundleno = 3 (0x3), region = 98 }
 0x477   :  { %1955 = vsyncpa [#allocation4], 1 }
 0x478   :  { %1957 = vsyncpa [#allocation4 + $0x1], 1 }

</bundles_post_ra>
